<compile_context>
chip_gen: v5e
topology: v5e:2x2
jax: 0.10.0
libtpu: 0.0.40
codegen_flags: <defaults>
</compile_context>

<pallas_src>
import functools

import jax
import jax.numpy as jnp
from jax.experimental import pallas as pl
from jax.experimental.pallas import tpu as pltpu

_TAIL = 8  # extra zero rows appended to the flattened padded image


# ----------------------------------------------------------------------------
# Fused bottleneck kernel: one (image n, row-tile r) step.
# Layout: channels-last on a spatially flattened, halo-padded image of width
# Wp = W + 2; flat index p = row*Wp + col.  A row tile needs the contiguous
# window [r*TH*Wp, r*TH*Wp + (TH+2)*Wp), so all 3x3 tap windows are contiguous
# row-ranges.  Two junk columns per output row are sliced away in the wrapper.
# ----------------------------------------------------------------------------
def _bottleneck_kernel(x_ref, w1_ref, w2_ref, w3_ref, wd_ref,
                       s1_ref, b1_ref, s2_ref, b2_ref, s3_ref, b3_ref,
                       sd_ref, bd_ref, o_ref, a1_scr,
                       *, TH, Wp, Lw, H, W):
    r = pl.program_id(1)
    L = TH * Wp                       # flat output rows produced by this tile
    Cmid = w1_ref.shape[1]

    start = r * L
    if L % 16 == 0:                   # guard: only claim alignment that holds
        start = pl.multiple_of(start, 16)
    elif L % 8 == 0:
        start = pl.multiple_of(start, 8)

    # ---- halo window of the flattened, padded input image (bf16, aligned) --
    xt = x_ref[0, pl.ds(start, Lw), :]                     # (Lw, Cin)

    # ---- in-kernel zero-padding mask (replaces the HBM mask input) ---------
    # Global padded coords of window-local flat index i:
    #   row = i // Wp + r*TH,  col = i % Wp    (start is a multiple of Wp).
    # The divmod is done exactly in f32 via floor((i + 0.5) / Wp) so no
    # integer vector division is required (margins >> f32 rounding error).
    idx = jax.lax.broadcasted_iota(jnp.int32, (Lw, 1), 0).astype(jnp.float32)
    lrow = jnp.floor((idx + 0.5) * (1.0 / Wp))             # exact local row
    col = idx - lrow * Wp                                  # exact column
    row = lrow + (r * TH).astype(jnp.float32)              # global padded row
    valid = ((row > 0.5) & (row < H + 0.5)
             & (col > 0.5) & (col < W + 0.5))
    msk = valid.astype(jnp.float32)                        # (Lw, 1)

    # ---- conv1 (1x1) + bn1 + relu1; zero the conv-padding ring --------------
    a1 = jnp.dot(xt, w1_ref[...], preferred_element_type=jnp.float32)
    a1 = jnp.maximum(a1 * s1_ref[...] + b1_ref[...], 0.0) * msk
    a1_scr[...] = a1                                       # stage for 3x3 taps

    # ---- conv2 (3x3, stride 1, pad 1) as 9 accumulated 2-D MXU matmuls ------
    # TODO(synk): bf16 scratch + aligned-window taps (pltpu.roll or im2col
    # long-K) would halve tap traffic; kept f32 + per-tap cast because packed
    # bf16 at odd sublane offsets is the one lowering-risk access pattern.
    acc = jnp.zeros((L, Cmid), jnp.float32)
    for dy in range(3):
        for dx in range(3):
            tap = a1_scr[pl.ds(dy * Wp + dx, L), :].astype(jnp.bfloat16)
            acc = acc + jnp.dot(tap, w2_ref[dy * 3 + dx],
                                preferred_element_type=jnp.float32)
    a2 = jnp.maximum(acc * s2_ref[...] + b2_ref[...], 0.0).astype(jnp.bfloat16)

    # ---- conv3 (1x1) + bn3 ---------------------------------------------------
    y = jnp.dot(a2, w3_ref[...], preferred_element_type=jnp.float32)
    y = y * s3_ref[...] + b3_ref[...]

    # ---- downsample (1x1 conv + bn) on the skip path -------------------------
    # Reuse the already-loaded aligned bf16 window (no f32 staging, no extra
    # x DMA): compute over all Lw rows and statically slice the centred L rows
    # of the f32 result.  The ~2*Wp extra rows (<15% of this matmul) are the
    # price of avoiding any odd-offset slice of packed bf16 data.
    # TODO(synk): fold wd into w1 (one (Cin, Cmid+Cout) matmul) for better MXU
    # N-utilization at real channel counts.
    sk = jnp.dot(xt, wd_ref[...], preferred_element_type=jnp.float32)
    sk = sk[Wp + 1:Wp + 1 + L, :] * sd_ref[...] + bd_ref[...]

    # ---- residual add + relu3 ------------------------------------------------
    o_ref[0] = jnp.maximum(y + sk, 0.0).astype(o_ref.dtype)


# ----------------------------------------------------------------------------
# VMEM budgeting / row-tile selection (generation aware).
# ----------------------------------------------------------------------------
def _vmem_capacity_bytes():
    try:
        return int(pltpu.get_tpu_info().vmem_capacity_bytes)
    except Exception:
        return 64 * 1024 * 1024       # conservative (v7x per-core VMEM)


def _vmem_need_bytes(TH, Wp, H, Cin, Cmid, Cout, w_bytes):
    L = TH * Wp
    Lw = (TH + 2) * Wp + _TAIL
    Sp = (H + 2) * Wp + _TAIL
    return (2 * Sp * Cin * 2          # resident x block, double-buffered, bf16
            + 2 * L * Cout * 2        # output block, double-buffered, bf16
            + Lw * Cmid * 4           # a1 scratch (f32)
            + 2 * w_bytes             # weights + scale/bias, double-buffered
            + 3 * Lw * max(Cmid, Cout) * 4)  # headroom: live f32 intermediates


def _pick_row_tile(H, Wp, Cin, Cmid, Cout, w_bytes, budget):
    # Prefer the largest TH (fewer grid steps, larger MXU M) that fits the
    # VMEM budget; keep the output block's second-minor dim 16-aligned.
    cands = [t for t in (64, 32, 16, 8, 4, 2)
             if H % t == 0 and (t * Wp) % 16 == 0]
    if not cands:
        return H                      # single tile; out block equals full dim
    for t in cands:
        if _vmem_need_bytes(t, Wp, H, Cin, Cmid, Cout, w_bytes) <= budget:
            return t
    return cands[-1]


# ----------------------------------------------------------------------------
# Wrapper: layout plumbing only; all compute happens in the fused kernel.
# ----------------------------------------------------------------------------
def bottleneck_forward(x_nchw, p):
    N, Cin, H, W = x_nchw.shape
    Cmid = p["w1"].shape[1]
    Cout = p["w3"].shape[1]
    Wp = W + 2  # TODO(synk): pad Wp to a multiple of 8 + pltpu.roll'd taps.
    Sp = (H + 2) * Wp + _TAIL

    w_bytes = 2 * (Cin * Cmid + 9 * Cmid * Cmid + Cmid * Cout + Cin * Cout) \
        + 4 * (4 * Cmid + 4 * Cout)
    cap = _vmem_capacity_bytes()
    TH = _pick_row_tile(H, Wp, Cin, Cmid, Cout, w_bytes, int(0.55 * cap))
    R = H // TH
    L = TH * Wp
    Lw = (TH + 2) * Wp + _TAIL
    vmem_limit = int(min(0.8 * cap,
                         max(2.0 * _vmem_need_bytes(TH, Wp, H, Cin, Cmid,
                                                    Cout, w_bytes),
                             32 * 1024 * 1024)))

    # NCHW -> NHWC, 1-pixel halo pad, flatten spatial, bf16 (fuses into one
    # XLA layout pass at the kernel boundary).
    x = jnp.transpose(x_nchw, (0, 2, 3, 1))
    x = jnp.pad(x, ((0, 0), (1, 1), (1, 1), (0, 0)))
    x = x.reshape(N, (H + 2) * Wp, Cin)
    x = jnp.pad(x, ((0, 0), (0, _TAIL), (0, 0))).astype(jnp.bfloat16)

    w1 = p["w1"].astype(jnp.bfloat16)
    w2 = p["w2"].reshape(9, Cmid, Cmid).astype(jnp.bfloat16)
    w3 = p["w3"].astype(jnp.bfloat16)
    wd = p["wd"].astype(jnp.bfloat16)
    s1, b1 = p["s1"][None, :], p["b1"][None, :]
    s2, b2 = p["s2"][None, :], p["b2"][None, :]
    s3, b3 = p["s3"][None, :], p["b3"][None, :]
    sd, bd = p["sd"][None, :], p["bd"][None, :]

    flops = 2 * N * H * W * (Cin * Cmid + 9 * Cmid * Cmid
                             + Cmid * Cout + Cin * Cout)
    bytes_accessed = int(
        x.size * 2 + N * H * Wp * Cout * 2
        + (w1.size + w2.size + w3.size + wd.size) * 2
        + 4 * (4 * Cmid + 4 * Cout))

    img_map = lambda n, r: (n, 0, 0)
    fix2 = lambda n, r: (0, 0)
    fix3 = lambda n, r: (0, 0, 0)

    out_p = pl.pallas_call(
        functools.partial(_bottleneck_kernel, TH=TH, Wp=Wp, Lw=Lw, H=H, W=W),
        out_shape=jax.ShapeDtypeStruct((N, H * Wp, Cout), jnp.bfloat16),
        grid=(N, R),
        in_specs=[
            pl.BlockSpec((1, Sp, Cin), img_map),      # x (resident per image)
            pl.BlockSpec((Cin, Cmid), fix2),          # w1
            pl.BlockSpec((9, Cmid, Cmid), fix3),      # w2 (3x3 taps)
            pl.BlockSpec((Cmid, Cout), fix2),         # w3
            pl.BlockSpec((Cin, Cout), fix2),          # wd (downsample)
            pl.BlockSpec((1, Cmid), fix2),            # s1
            pl.BlockSpec((1, Cmid), fix2),            # b1
            pl.BlockSpec((1, Cmid), fix2),            # s2
            pl.BlockSpec((1, Cmid), fix2),            # b2
            pl.BlockSpec((1, Cout), fix2),            # s3
            pl.BlockSpec((1, Cout), fix2),            # b3
            pl.BlockSpec((1, Cout), fix2),            # sd
            pl.BlockSpec((1, Cout), fix2),            # bd
        ],
        out_specs=pl.BlockSpec((1, L, Cout), lambda n, r: (n, r, 0)),
        scratch_shapes=[
            pltpu.VMEM((Lw, Cmid), jnp.float32),      # staged conv1 output
        ],
        compiler_params=pltpu.CompilerParams(
            dimension_semantics=(("parallel", "arbitrary") if N > 1
                                 else ("parallel", "parallel")),
            vmem_limit_bytes=vmem_limit,
        ),
        cost_estimate=pl.CostEstimate(
            flops=flops, transcendentals=0, bytes_accessed=bytes_accessed),
    )(x, w1, w2, w3, wd, s1, b1, s2, b2, s3, b3, sd, bd)

    # Drop the 2 junk columns per row, back to NCHW.  Kept bf16: the next
    # ResNet block consumes bf16; the check below compares against an f32
    # reference with bf16-level tolerance.
    out = out_p.reshape(N, H, Wp, Cout)[:, :, :W, :]
    return jnp.transpose(out, (0, 3, 1, 2))


# ----------------------------------------------------------------------------
# Parameter construction / BN folding (eval-mode BatchNorm -> scale/bias)
# ----------------------------------------------------------------------------
def fold_bn(key, chan, eps=1e-5):
    k1, k2, k3, k4 = jax.random.split(key, 4)
    gamma = jax.random.uniform(k1, (chan,), jnp.float32, 0.5, 1.5)
    beta = jax.random.normal(k2, (chan,), jnp.float32) * 0.1
    mean = jax.random.normal(k3, (chan,), jnp.float32) * 0.1
    var = jax.random.uniform(k4, (chan,), jnp.float32, 0.5, 1.5)
    scale = gamma * jax.lax.rsqrt(var + eps)
    bias = beta - mean * scale
    return scale, bias


def make_params(key, in_chan, out_chan):
    assert out_chan % 4 == 0
    mid_chan = out_chan // 4
    ks = jax.random.split(key, 8)
    p = {}
    p["w1"] = jax.random.normal(ks[0], (in_chan, mid_chan), jnp.float32) * 0.2
    p["w2"] = jax.random.normal(ks[1], (3, 3, mid_chan, mid_chan),
                                jnp.float32) * 0.2            # HWIO
    p["w3"] = jax.random.normal(ks[2], (mid_chan, out_chan), jnp.float32) * 0.2
    p["wd"] = jax.random.normal(ks[3], (in_chan, out_chan), jnp.float32) * 0.2
    p["s1"], p["b1"] = fold_bn(ks[4], mid_chan)
    p["s2"], p["b2"] = fold_bn(ks[5], mid_chan)
    p["s3"], p["b3"] = fold_bn(ks[6], out_chan)
    p["sd"], p["bd"] = fold_bn(ks[7], out_chan)
    return p


# ----------------------------------------------------------------------------
# Pure-JAX reference (same bf16 operand / f32 accumulation discipline)
# ----------------------------------------------------------------------------
def bottleneck_ref(x_nchw, p):
    x = jnp.transpose(x_nchw, (0, 2, 3, 1))

    def conv(v, w_hwio, padding):
        return jax.lax.conv_general_dilated(
            v.astype(jnp.bfloat16), w_hwio.astype(jnp.bfloat16), (1, 1),
            padding, dimension_numbers=("NHWC", "HWIO", "NHWC"),
            preferred_element_type=jnp.float32)

    r = jnp.maximum(conv(x, p["w1"][None, None], "VALID") * p["s1"]
                    + p["b1"], 0.0)
    r = jnp.maximum(conv(r, p["w2"], [(1, 1), (1, 1)]) * p["s2"]
                    + p["b2"], 0.0)
    r = conv(r, p["w3"][None, None], "VALID") * p["s3"] + p["b3"]
    sk = conv(x, p["wd"][None, None], "VALID") * p["sd"] + p["bd"]
    return jnp.transpose(jnp.maximum(r + sk, 0.0), (0, 3, 1, 2))


if __name__ == "__main__":
    key = jax.random.PRNGKey(0)
    kx, kp = jax.random.split(key)

    N, in_chan, H, W = 2, 8, 16, 16
    out_chan = 16                     # mid_chan = 4, downsample branch active

    x = jax.random.normal(kx, (N, in_chan, H, W), jnp.float32)
    params = make_params(kp, in_chan, out_chan)

    out = jax.jit(bottleneck_forward)(x, params)
    out = jax.block_until_ready(out)

    ref = bottleneck_ref(x, params)
    assert out.shape == (N, out_chan, H, W), out.shape
    out_f32 = out.astype(jnp.float32)
    max_err = float(jnp.max(jnp.abs(out_f32 - ref)))
    assert jnp.allclose(out_f32, ref, atol=2e-2, rtol=2e-2), max_err

    print("KERNEL_OK")
</pallas_src>

<mosaic_0001>
module attributes {stable_mosaic.version = 11 : i64} {
  func.func @_bottleneck_kernel(%arg0: i32, %arg1: i32, %arg2: memref<1x332x8xbf16, #tpu.memory_space<vmem>>, %arg3: memref<8x4xbf16, #tpu.memory_space<vmem>>, %arg4: memref<9x4x4xbf16, #tpu.memory_space<vmem>>, %arg5: memref<4x16xbf16, #tpu.memory_space<vmem>>, %arg6: memref<8x16xbf16, #tpu.memory_space<vmem>>, %arg7: memref<1x4xf32, #tpu.memory_space<vmem>>, %arg8: memref<1x4xf32, #tpu.memory_space<vmem>>, %arg9: memref<1x4xf32, #tpu.memory_space<vmem>>, %arg10: memref<1x4xf32, #tpu.memory_space<vmem>>, %arg11: memref<1x16xf32, #tpu.memory_space<vmem>>, %arg12: memref<1x16xf32, #tpu.memory_space<vmem>>, %arg13: memref<1x16xf32, #tpu.memory_space<vmem>>, %arg14: memref<1x16xf32, #tpu.memory_space<vmem>>, %arg15: memref<1x288x16xbf16, #tpu.memory_space<vmem>>, %arg16: memref<332x4xf32, #tpu.memory_space<vmem>>) attributes {dimension_semantics = [#tpu.dimension_semantics<parallel>, #tpu.dimension_semantics<arbitrary>], iteration_bounds = array<i64: 2, 1>, scalar_prefetch = 0 : i64, scratch_operands = 1 : i64, tpu.core_type = #tpu.core_type<tc>, window_params = [{transform_indices = @transform_0, window_bounds = array<i64: 1, 332, 8>}, {pipeline_mode = #tpu.pipeline_mode<synchronous>, transform_indices = @transform_1, window_bounds = array<i64: 8, 4>}, {pipeline_mode = #tpu.pipeline_mode<synchronous>, transform_indices = @transform_2, window_bounds = array<i64: 9, 4, 4>}, {pipeline_mode = #tpu.pipeline_mode<synchronous>, transform_indices = @transform_3, window_bounds = array<i64: 4, 16>}, {pipeline_mode = #tpu.pipeline_mode<synchronous>, transform_indices = @transform_4, window_bounds = array<i64: 8, 16>}, {pipeline_mode = #tpu.pipeline_mode<synchronous>, transform_indices = @transform_5, window_bounds = array<i64: 1, 4>}, {pipeline_mode = #tpu.pipeline_mode<synchronous>, transform_indices = @transform_6, window_bounds = array<i64: 1, 4>}, {pipeline_mode = #tpu.pipeline_mode<synchronous>, transform_indices = @transform_7, window_bounds = array<i64: 1, 4>}, {pipeline_mode = #tpu.pipeline_mode<synchronous>, transform_indices = @transform_8, window_bounds = array<i64: 1, 4>}, {pipeline_mode = #tpu.pipeline_mode<synchronous>, transform_indices = @transform_9, window_bounds = array<i64: 1, 16>}, {pipeline_mode = #tpu.pipeline_mode<synchronous>, transform_indices = @transform_10, window_bounds = array<i64: 1, 16>}, {pipeline_mode = #tpu.pipeline_mode<synchronous>, transform_indices = @transform_11, window_bounds = array<i64: 1, 16>}, {pipeline_mode = #tpu.pipeline_mode<synchronous>, transform_indices = @transform_12, window_bounds = array<i64: 1, 16>}, {transform_indices = @transform_13, window_bounds = array<i64: 1, 288, 16>}]} {
    %c288_i32 = arith.constant 288 : i32
    %0 = arith.muli %arg1, %c288_i32 : i32
    %1 = tpu.assume_multiple %0, 16 : i32
    %c0 = arith.constant 0 : index
    %2 = arith.index_cast %1 : i32 to index
    %c0_0 = arith.constant 0 : index
    %3 = vector.load %arg2[%c0, %2, %c0_0] : memref<1x332x8xbf16, #tpu.memory_space<vmem>>, vector<1x332x8xbf16>
    %4 = vector.shape_cast %3 : vector<1x332x8xbf16> to vector<332x8xbf16>
    %5 = tpu.iota {dimensions = array<i32: 0>} : vector<332x1xi32>
    %6 = arith.sitofp %5 : vector<332x1xi32> to vector<332x1xf32>
    %cst = arith.constant 5.000000e-01 : f32
    %7 = vector.broadcast %cst : f32 to vector<332x1xf32>
    %8 = arith.addf %6, %7 : vector<332x1xf32>
    %cst_1 = arith.constant 0.055555556 : f32
    %9 = vector.broadcast %cst_1 : f32 to vector<332x1xf32>
    %10 = arith.mulf %8, %9 : vector<332x1xf32>
    %11 = math.floor %10 : vector<332x1xf32>
    %cst_2 = arith.constant 1.800000e+01 : f32
    %12 = vector.broadcast %cst_2 : f32 to vector<332x1xf32>
    %13 = arith.mulf %11, %12 : vector<332x1xf32>
    %14 = arith.subf %6, %13 : vector<332x1xf32>
    %c16_i32 = arith.constant 16 : i32
    %15 = arith.muli %arg1, %c16_i32 : i32
    %16 = arith.sitofp %15 : i32 to f32
    %17 = vector.broadcast %16 : f32 to vector<332x1xf32>
    %18 = arith.addf %11, %17 : vector<332x1xf32>
    %cst_3 = arith.constant 5.000000e-01 : f32
    %19 = vector.broadcast %cst_3 : f32 to vector<332x1xf32>
    %20 = arith.cmpf ogt, %18, %19 : vector<332x1xf32>
    %cst_4 = arith.constant 1.650000e+01 : f32
    %21 = vector.broadcast %cst_4 : f32 to vector<332x1xf32>
    %22 = arith.cmpf olt, %18, %21 : vector<332x1xf32>
    %23 = arith.andi %20, %22 : vector<332x1xi1>
    %cst_5 = arith.constant 5.000000e-01 : f32
    %24 = vector.broadcast %cst_5 : f32 to vector<332x1xf32>
    %25 = arith.cmpf ogt, %14, %24 : vector<332x1xf32>
    %26 = arith.andi %23, %25 : vector<332x1xi1>
    %cst_6 = arith.constant 1.650000e+01 : f32
    %27 = vector.broadcast %cst_6 : f32 to vector<332x1xf32>
    %28 = arith.cmpf olt, %14, %27 : vector<332x1xf32>
    %29 = arith.andi %26, %28 : vector<332x1xi1>
    %30 = arith.extui %29 : vector<332x1xi1> to vector<332x1xi32>
    %31 = arith.sitofp %30 : vector<332x1xi32> to vector<332x1xf32>
    %c0_7 = arith.constant 0 : index
    %c0_8 = arith.constant 0 : index
    %32 = vector.load %arg3[%c0_7, %c0_8] : memref<8x4xbf16, #tpu.memory_space<vmem>>, vector<8x4xbf16>
    %cst_9 = arith.constant dense<0.000000e+00> : vector<332x4xf32>
    %33 = tpu.matmul %4, %32, %cst_9 {dimension_numbers = #tpu.dot_dimension_numbers<[1], [0], [0], [1], [0, 0, 1, 1], [], []>} : vector<332x8xbf16>, vector<8x4xbf16>, vector<332x4xf32> -> vector<332x4xf32>
    %c0_10 = arith.constant 0 : index
    %c0_11 = arith.constant 0 : index
    %34 = vector.load %arg7[%c0_10, %c0_11] : memref<1x4xf32, #tpu.memory_space<vmem>>, vector<1x4xf32>
    %35 = vector.broadcast %34 : vector<1x4xf32> to vector<332x4xf32>
    %36 = arith.mulf %33, %35 : vector<332x4xf32>
    %c0_12 = arith.constant 0 : index
    %c0_13 = arith.constant 0 : index
    %37 = vector.load %arg8[%c0_12, %c0_13] : memref<1x4xf32, #tpu.memory_space<vmem>>, vector<1x4xf32>
    %38 = vector.broadcast %37 : vector<1x4xf32> to vector<332x4xf32>
    %39 = arith.addf %36, %38 : vector<332x4xf32>
    %cst_14 = arith.constant 0.000000e+00 : f32
    %40 = vector.broadcast %cst_14 : f32 to vector<332x4xf32>
    %41 = arith.maximumf %39, %40 : vector<332x4xf32>
    %42 = vector.broadcast %31 : vector<332x1xf32> to vector<332x4xf32>
    %43 = arith.mulf %41, %42 : vector<332x4xf32>
    %c0_15 = arith.constant 0 : index
    %c0_16 = arith.constant 0 : index
    %44 = vector.load %arg16[%c0_15, %c0_16] : memref<332x4xf32, #tpu.memory_space<vmem>>, vector<332x4xf32>
    tpu.vector_store %arg16[%c0_15, %c0_16], %43 {strides = array<i32>} : memref<332x4xf32, #tpu.memory_space<vmem>>, vector<332x4xf32>,
    %cst_17 = arith.constant 0.000000e+00 : f32
    %45 = vector.broadcast %cst_17 : f32 to vector<288x4xf32>
    %c0_18 = arith.constant 0 : index
    %c0_19 = arith.constant 0 : index
    %46 = vector.load %arg16[%c0_18, %c0_19] : memref<332x4xf32, #tpu.memory_space<vmem>>, vector<288x4xf32>
    %47 = arith.truncf %46 : vector<288x4xf32> to vector<288x4xbf16>
    %c0_20 = arith.constant 0 : index
    %c0_21 = arith.constant 0 : index
    %c0_22 = arith.constant 0 : index
    %48 = vector.load %arg4[%c0_20, %c0_21, %c0_22] : memref<9x4x4xbf16, #tpu.memory_space<vmem>>, vector<1x4x4xbf16>
    %49 = vector.shape_cast %48 : vector<1x4x4xbf16> to vector<4x4xbf16>
    %cst_23 = arith.constant dense<0.000000e+00> : vector<288x4xf32>
    %50 = tpu.matmul %47, %49, %cst_23 {dimension_numbers = #tpu.dot_dimension_numbers<[1], [0], [0], [1], [0, 0, 1, 1], [], []>} : vector<288x4xbf16>, vector<4x4xbf16>, vector<288x4xf32> -> vector<288x4xf32>
    %51 = arith.addf %45, %50 : vector<288x4xf32>
    %c1 = arith.constant 1 : index
    %c0_24 = arith.constant 0 : index
    %52 = vector.load %arg16[%c1, %c0_24] : memref<332x4xf32, #tpu.memory_space<vmem>>, vector<288x4xf32>
    %53 = arith.truncf %52 : vector<288x4xf32> to vector<288x4xbf16>
    %c1_25 = arith.constant 1 : index
    %c0_26 = arith.constant 0 : index
    %c0_27 = arith.constant 0 : index
    %54 = vector.load %arg4[%c1_25, %c0_26, %c0_27] : memref<9x4x4xbf16, #tpu.memory_space<vmem>>, vector<1x4x4xbf16>
    %55 = vector.shape_cast %54 : vector<1x4x4xbf16> to vector<4x4xbf16>
    %cst_28 = arith.constant dense<0.000000e+00> : vector<288x4xf32>
    %56 = tpu.matmul %53, %55, %cst_28 {dimension_numbers = #tpu.dot_dimension_numbers<[1], [0], [0], [1], [0, 0, 1, 1], [], []>} : vector<288x4xbf16>, vector<4x4xbf16>, vector<288x4xf32> -> vector<288x4xf32>
    %57 = arith.addf %51, %56 : vector<288x4xf32>
    %c2 = arith.constant 2 : index
    %c0_29 = arith.constant 0 : index
    %58 = vector.load %arg16[%c2, %c0_29] : memref<332x4xf32, #tpu.memory_space<vmem>>, vector<288x4xf32>
    %59 = arith.truncf %58 : vector<288x4xf32> to vector<288x4xbf16>
    %c2_30 = arith.constant 2 : index
    %c0_31 = arith.constant 0 : index
    %c0_32 = arith.constant 0 : index
    %60 = vector.load %arg4[%c2_30, %c0_31, %c0_32] : memref<9x4x4xbf16, #tpu.memory_space<vmem>>, vector<1x4x4xbf16>
    %61 = vector.shape_cast %60 : vector<1x4x4xbf16> to vector<4x4xbf16>
    %cst_33 = arith.constant dense<0.000000e+00> : vector<288x4xf32>
    %62 = tpu.matmul %59, %61, %cst_33 {dimension_numbers = #tpu.dot_dimension_numbers<[1], [0], [0], [1], [0, 0, 1, 1], [], []>} : vector<288x4xbf16>, vector<4x4xbf16>, vector<288x4xf32> -> vector<288x4xf32>
    %63 = arith.addf %57, %62 : vector<288x4xf32>
    %c18 = arith.constant 18 : index
    %c0_34 = arith.constant 0 : index
    %64 = vector.load %arg16[%c18, %c0_34] : memref<332x4xf32, #tpu.memory_space<vmem>>, vector<288x4xf32>
    %65 = arith.truncf %64 : vector<288x4xf32> to vector<288x4xbf16>
    %c3 = arith.constant 3 : index
    %c0_35 = arith.constant 0 : index
    %c0_36 = arith.constant 0 : index
    %66 = vector.load %arg4[%c3, %c0_35, %c0_36] : memref<9x4x4xbf16, #tpu.memory_space<vmem>>, vector<1x4x4xbf16>
    %67 = vector.shape_cast %66 : vector<1x4x4xbf16> to vector<4x4xbf16>
    %cst_37 = arith.constant dense<0.000000e+00> : vector<288x4xf32>
    %68 = tpu.matmul %65, %67, %cst_37 {dimension_numbers = #tpu.dot_dimension_numbers<[1], [0], [0], [1], [0, 0, 1, 1], [], []>} : vector<288x4xbf16>, vector<4x4xbf16>, vector<288x4xf32> -> vector<288x4xf32>
    %69 = arith.addf %63, %68 : vector<288x4xf32>
    %c19 = arith.constant 19 : index
    %c0_38 = arith.constant 0 : index
    %70 = vector.load %arg16[%c19, %c0_38] : memref<332x4xf32, #tpu.memory_space<vmem>>, vector<288x4xf32>
    %71 = arith.truncf %70 : vector<288x4xf32> to vector<288x4xbf16>
    %c4 = arith.constant 4 : index
    %c0_39 = arith.constant 0 : index
    %c0_40 = arith.constant 0 : index
    %72 = vector.load %arg4[%c4, %c0_39, %c0_40] : memref<9x4x4xbf16, #tpu.memory_space<vmem>>, vector<1x4x4xbf16>
    %73 = vector.shape_cast %72 : vector<1x4x4xbf16> to vector<4x4xbf16>
    %cst_41 = arith.constant dense<0.000000e+00> : vector<288x4xf32>
    %74 = tpu.matmul %71, %73, %cst_41 {dimension_numbers = #tpu.dot_dimension_numbers<[1], [0], [0], [1], [0, 0, 1, 1], [], []>} : vector<288x4xbf16>, vector<4x4xbf16>, vector<288x4xf32> -> vector<288x4xf32>
    %75 = arith.addf %69, %74 : vector<288x4xf32>
    %c20 = arith.constant 20 : index
    %c0_42 = arith.constant 0 : index
    %76 = vector.load %arg16[%c20, %c0_42] : memref<332x4xf32, #tpu.memory_space<vmem>>, vector<288x4xf32>
    %77 = arith.truncf %76 : vector<288x4xf32> to vector<288x4xbf16>
    %c5 = arith.constant 5 : index
    %c0_43 = arith.constant 0 : index
    %c0_44 = arith.constant 0 : index
    %78 = vector.load %arg4[%c5, %c0_43, %c0_44] : memref<9x4x4xbf16, #tpu.memory_space<vmem>>, vector<1x4x4xbf16>
    %79 = vector.shape_cast %78 : vector<1x4x4xbf16> to vector<4x4xbf16>
    %cst_45 = arith.constant dense<0.000000e+00> : vector<288x4xf32>
    %80 = tpu.matmul %77, %79, %cst_45 {dimension_numbers = #tpu.dot_dimension_numbers<[1], [0], [0], [1], [0, 0, 1, 1], [], []>} : vector<288x4xbf16>, vector<4x4xbf16>, vector<288x4xf32> -> vector<288x4xf32>
    %81 = arith.addf %75, %80 : vector<288x4xf32>
    %c36 = arith.constant 36 : index
    %c0_46 = arith.constant 0 : index
    %82 = vector.load %arg16[%c36, %c0_46] : memref<332x4xf32, #tpu.memory_space<vmem>>, vector<288x4xf32>
    %83 = arith.truncf %82 : vector<288x4xf32> to vector<288x4xbf16>
    %c6 = arith.constant 6 : index
    %c0_47 = arith.constant 0 : index
    %c0_48 = arith.constant 0 : index
    %84 = vector.load %arg4[%c6, %c0_47, %c0_48] : memref<9x4x4xbf16, #tpu.memory_space<vmem>>, vector<1x4x4xbf16>
    %85 = vector.shape_cast %84 : vector<1x4x4xbf16> to vector<4x4xbf16>
    %cst_49 = arith.constant dense<0.000000e+00> : vector<288x4xf32>
    %86 = tpu.matmul %83, %85, %cst_49 {dimension_numbers = #tpu.dot_dimension_numbers<[1], [0], [0], [1], [0, 0, 1, 1], [], []>} : vector<288x4xbf16>, vector<4x4xbf16>, vector<288x4xf32> -> vector<288x4xf32>
    %87 = arith.addf %81, %86 : vector<288x4xf32>
    %c37 = arith.constant 37 : index
    %c0_50 = arith.constant 0 : index
    %88 = vector.load %arg16[%c37, %c0_50] : memref<332x4xf32, #tpu.memory_space<vmem>>, vector<288x4xf32>
    %89 = arith.truncf %88 : vector<288x4xf32> to vector<288x4xbf16>
    %c7 = arith.constant 7 : index
    %c0_51 = arith.constant 0 : index
    %c0_52 = arith.constant 0 : index
    %90 = vector.load %arg4[%c7, %c0_51, %c0_52] : memref<9x4x4xbf16, #tpu.memory_space<vmem>>, vector<1x4x4xbf16>
    %91 = vector.shape_cast %90 : vector<1x4x4xbf16> to vector<4x4xbf16>
    %cst_53 = arith.constant dense<0.000000e+00> : vector<288x4xf32>
    %92 = tpu.matmul %89, %91, %cst_53 {dimension_numbers = #tpu.dot_dimension_numbers<[1], [0], [0], [1], [0, 0, 1, 1], [], []>} : vector<288x4xbf16>, vector<4x4xbf16>, vector<288x4xf32> -> vector<288x4xf32>
    %93 = arith.addf %87, %92 : vector<288x4xf32>
    %c38 = arith.constant 38 : index
    %c0_54 = arith.constant 0 : index
    %94 = vector.load %arg16[%c38, %c0_54] : memref<332x4xf32, #tpu.memory_space<vmem>>, vector<288x4xf32>
    %95 = arith.truncf %94 : vector<288x4xf32> to vector<288x4xbf16>
    %c8 = arith.constant 8 : index
    %c0_55 = arith.constant 0 : index
    %c0_56 = arith.constant 0 : index
    %96 = vector.load %arg4[%c8, %c0_55, %c0_56] : memref<9x4x4xbf16, #tpu.memory_space<vmem>>, vector<1x4x4xbf16>
    %97 = vector.shape_cast %96 : vector<1x4x4xbf16> to vector<4x4xbf16>
    %cst_57 = arith.constant dense<0.000000e+00> : vector<288x4xf32>
    %98 = tpu.matmul %95, %97, %cst_57 {dimension_numbers = #tpu.dot_dimension_numbers<[1], [0], [0], [1], [0, 0, 1, 1], [], []>} : vector<288x4xbf16>, vector<4x4xbf16>, vector<288x4xf32> -> vector<288x4xf32>
    %99 = arith.addf %93, %98 : vector<288x4xf32>
    %c0_58 = arith.constant 0 : index
    %c0_59 = arith.constant 0 : index
    %100 = vector.load %arg9[%c0_58, %c0_59] : memref<1x4xf32, #tpu.memory_space<vmem>>, vector<1x4xf32>
    %101 = vector.broadcast %100 : vector<1x4xf32> to vector<288x4xf32>
    %102 = arith.mulf %99, %101 : vector<288x4xf32>
    %c0_60 = arith.constant 0 : index
    %c0_61 = arith.constant 0 : index
    %103 = vector.load %arg10[%c0_60, %c0_61] : memref<1x4xf32, #tpu.memory_space<vmem>>, vector<1x4xf32>
    %104 = vector.broadcast %103 : vector<1x4xf32> to vector<288x4xf32>
    %105 = arith.addf %102, %104 : vector<288x4xf32>
    %cst_62 = arith.constant 0.000000e+00 : f32
    %106 = vector.broadcast %cst_62 : f32 to vector<288x4xf32>
    %107 = arith.maximumf %105, %106 : vector<288x4xf32>
    %108 = arith.truncf %107 : vector<288x4xf32> to vector<288x4xbf16>
    %c0_63 = arith.constant 0 : index
    %c0_64 = arith.constant 0 : index
    %109 = vector.load %arg5[%c0_63, %c0_64] : memref<4x16xbf16, #tpu.memory_space<vmem>>, vector<4x16xbf16>
    %cst_65 = arith.constant dense<0.000000e+00> : vector<288x16xf32>
    %110 = tpu.matmul %108, %109, %cst_65 {dimension_numbers = #tpu.dot_dimension_numbers<[1], [0], [0], [1], [0, 0, 1, 1], [], []>} : vector<288x4xbf16>, vector<4x16xbf16>, vector<288x16xf32> -> vector<288x16xf32>
    %c0_66 = arith.constant 0 : index
    %c0_67 = arith.constant 0 : index
    %111 = vector.load %arg11[%c0_66, %c0_67] : memref<1x16xf32, #tpu.memory_space<vmem>>, vector<1x16xf32>
    %112 = vector.broadcast %111 : vector<1x16xf32> to vector<288x16xf32>
    %113 = arith.mulf %110, %112 : vector<288x16xf32>
    %c0_68 = arith.constant 0 : index
    %c0_69 = arith.constant 0 : index
    %114 = vector.load %arg12[%c0_68, %c0_69] : memref<1x16xf32, #tpu.memory_space<vmem>>, vector<1x16xf32>
    %115 = vector.broadcast %114 : vector<1x16xf32> to vector<288x16xf32>
    %116 = arith.addf %113, %115 : vector<288x16xf32>
    %c0_70 = arith.constant 0 : index
    %c0_71 = arith.constant 0 : index
    %117 = vector.load %arg6[%c0_70, %c0_71] : memref<8x16xbf16, #tpu.memory_space<vmem>>, vector<8x16xbf16>
    %cst_72 = arith.constant dense<0.000000e+00> : vector<332x16xf32>
    %118 = tpu.matmul %4, %117, %cst_72 {dimension_numbers = #tpu.dot_dimension_numbers<[1], [0], [0], [1], [0, 0, 1, 1], [], []>} : vector<332x8xbf16>, vector<8x16xbf16>, vector<332x16xf32> -> vector<332x16xf32>
    %119 = vector.extract_strided_slice %118 {offsets = [19, 0], sizes = [288, 16], strides = [1, 1]} : vector<332x16xf32> to vector<288x16xf32>
    %c0_73 = arith.constant 0 : index
    %c0_74 = arith.constant 0 : index
    %120 = vector.load %arg13[%c0_73, %c0_74] : memref<1x16xf32, #tpu.memory_space<vmem>>, vector<1x16xf32>
    %121 = vector.broadcast %120 : vector<1x16xf32> to vector<288x16xf32>
    %122 = arith.mulf %119, %121 : vector<288x16xf32>
    %c0_75 = arith.constant 0 : index
    %c0_76 = arith.constant 0 : index
    %123 = vector.load %arg14[%c0_75, %c0_76] : memref<1x16xf32, #tpu.memory_space<vmem>>, vector<1x16xf32>
    %124 = vector.broadcast %123 : vector<1x16xf32> to vector<288x16xf32>
    %125 = arith.addf %122, %124 : vector<288x16xf32>
    %126 = arith.addf %116, %125 : vector<288x16xf32>
    %cst_77 = arith.constant 0.000000e+00 : f32
    %127 = vector.broadcast %cst_77 : f32 to vector<288x16xf32>
    %128 = arith.maximumf %126, %127 : vector<288x16xf32>
    %129 = arith.truncf %128 : vector<288x16xf32> to vector<288x16xbf16>
    %c0_78 = arith.constant 0 : index
    %c0_79 = arith.constant 0 : index
    %c0_80 = arith.constant 0 : index
    %130 = vector.load %arg15[%c0_78, %c0_79, %c0_80] : memref<1x288x16xbf16, #tpu.memory_space<vmem>>, vector<1x288x16xbf16>
    %131 = vector.shape_cast %130 : vector<1x288x16xbf16> to vector<288x16xbf16>
    %132 = vector.shape_cast %129 : vector<288x16xbf16> to vector<1x288x16xbf16>
    tpu.vector_store %arg15[%c0_78, %c0_79, %c0_80], %132 {strides = array<i32>} : memref<1x288x16xbf16, #tpu.memory_space<vmem>>, vector<1x288x16xbf16>,
    return
  }
  func.func @transform_0(%arg0: i32, %arg1: i32) -> (i32, i32, i32) {
    %c0_i32 = arith.constant 0 : i32
    %c0_i32_0 = arith.constant 0 : i32
    %c0_i32_1 = arith.constant 0 : i32
    return %arg0, %c0_i32, %c0_i32_0 : i32, i32, i32
  }
  func.func @transform_1(%arg0: i32, %arg1: i32) -> (i32, i32) {
    %c0_i32 = arith.constant 0 : i32
    %c0_i32_0 = arith.constant 0 : i32
    %c0_i32_1 = arith.constant 0 : i32
    return %c0_i32, %c0_i32_0 : i32, i32
  }
  func.func @transform_2(%arg0: i32, %arg1: i32) -> (i32, i32, i32) {
    %c0_i32 = arith.constant 0 : i32
    %c0_i32_0 = arith.constant 0 : i32
    %c0_i32_1 = arith.constant 0 : i32
    %c0_i32_2 = arith.constant 0 : i32
    return %c0_i32, %c0_i32_0, %c0_i32_1 : i32, i32, i32
  }
  func.func @transform_3(%arg0: i32, %arg1: i32) -> (i32, i32) {
    %c0_i32 = arith.constant 0 : i32
    %c0_i32_0 = arith.constant 0 : i32
    %c0_i32_1 = arith.constant 0 : i32
    return %c0_i32, %c0_i32_0 : i32, i32
  }
  func.func @transform_4(%arg0: i32, %arg1: i32) -> (i32, i32) {
    %c0_i32 = arith.constant 0 : i32
    %c0_i32_0 = arith.constant 0 : i32
    %c0_i32_1 = arith.constant 0 : i32
    return %c0_i32, %c0_i32_0 : i32, i32
  }
  func.func @transform_5(%arg0: i32, %arg1: i32) -> (i32, i32) {
    %c0_i32 = arith.constant 0 : i32
    %c0_i32_0 = arith.constant 0 : i32
    %c0_i32_1 = arith.constant 0 : i32
    return %c0_i32, %c0_i32_0 : i32, i32
  }
  func.func @transform_6(%arg0: i32, %arg1: i32) -> (i32, i32) {
    %c0_i32 = arith.constant 0 : i32
    %c0_i32_0 = arith.constant 0 : i32
    %c0_i32_1 = arith.constant 0 : i32
    return %c0_i32, %c0_i32_0 : i32, i32
  }
  func.func @transform_7(%arg0: i32, %arg1: i32) -> (i32, i32) {
    %c0_i32 = arith.constant 0 : i32
    %c0_i32_0 = arith.constant 0 : i32
    %c0_i32_1 = arith.constant 0 : i32
    return %c0_i32, %c0_i32_0 : i32, i32
  }
  func.func @transform_8(%arg0: i32, %arg1: i32) -> (i32, i32) {
    %c0_i32 = arith.constant 0 : i32
    %c0_i32_0 = arith.constant 0 : i32
    %c0_i32_1 = arith.constant 0 : i32
    return %c0_i32, %c0_i32_0 : i32, i32
  }
  func.func @transform_9(%arg0: i32, %arg1: i32) -> (i32, i32) {
    %c0_i32 = arith.constant 0 : i32
    %c0_i32_0 = arith.constant 0 : i32
    %c0_i32_1 = arith.constant 0 : i32
    return %c0_i32, %c0_i32_0 : i32, i32
  }
  func.func @transform_10(%arg0: i32, %arg1: i32) -> (i32, i32) {
    %c0_i32 = arith.constant 0 : i32
    %c0_i32_0 = arith.constant 0 : i32
    %c0_i32_1 = arith.constant 0 : i32
    return %c0_i32, %c0_i32_0 : i32, i32
  }
  func.func @transform_11(%arg0: i32, %arg1: i32) -> (i32, i32) {
    %c0_i32 = arith.constant 0 : i32
    %c0_i32_0 = arith.constant 0 : i32
    %c0_i32_1 = arith.constant 0 : i32
    return %c0_i32, %c0_i32_0 : i32, i32
  }
  func.func @transform_12(%arg0: i32, %arg1: i32) -> (i32, i32) {
    %c0_i32 = arith.constant 0 : i32
    %c0_i32_0 = arith.constant 0 : i32
    %c0_i32_1 = arith.constant 0 : i32
    return %c0_i32, %c0_i32_0 : i32, i32
  }
  func.func @transform_13(%arg0: i32, %arg1: i32) -> (i32, i32, i32) {
    %c0_i32 = arith.constant 0 : i32
    %c0_i32_0 = arith.constant 0 : i32
    return %arg0, %arg1, %c0_i32 : i32, i32, i32
  }
}

</mosaic_0001>

<bundles_post_ra>
// kernel: bottleneck_forward.1
= control target key start
LH: loop header
LB: loop body
LE: loop exit
PB: predicated region body
PF: predicated region fallthrough
CT: control target
= control target key end

     0   :  { %s5387_s25 = smov 0   ;;  %s5389_s26 = smov 0   ;;  %s7430_s0 = inlined_call_operand.vmem [shape: bf16[2,332,8], index: 0, kind: input, shape index: {}]   ;;  %s7431_s1 = inlined_call_operand.vmem [shape: bf16[8,4], index: 1, kind: input, shape index: {}]   ;;  %s7432_s2 = inlined_call_operand.vmem [shape: bf16[9,4,4], index: 2, kind: input, shape index: {}]   ;;  %s7433_s3 = inlined_call_operand.vmem [shape: bf16[4,16], index: 3, kind: input, shape index: {}]   ;;  %s7434_s4 = inlined_call_operand.vmem [shape: bf16[8,16], index: 4, kind: input, shape index: {}]   ;;  %s7435_s5 = inlined_call_operand.vmem [shape: f32[1,4], index: 5, kind: input, shape index: {}]   ;;  %s7436_s6 = inlined_call_operand.vmem [shape: f32[1,4], index: 6, kind: input, shape index: {}]   ;;  %s7437_s7 = inlined_call_operand.vmem [shape: f32[1,4], index: 7, kind: input, shape index: {}]   ;;  %s7438_s8 = inlined_call_operand.vmem [shape: f32[1,4], index: 8, kind: input, shape index: {}]   ;;  %s7439_s9 = inlined_call_operand.vmem [shape: f32[1,16], index: 9, kind: input, shape index: {}]   ;;  %s7440_s10 = inlined_call_operand.vmem [shape: f32[1,16], index: 10, kind: input, shape index: {}]   ;;  %s7441_s11 = inlined_call_operand.vmem [shape: f32[1,16], index: 11, kind: input, shape index: {}]   ;;  %s7442_s12 = inlined_call_operand.vmem [shape: f32[1,16], index: 12, kind: input, shape index: {}]   ;;  %s7443_s13 = inlined_call_operand.vmem [shape: bf16[2,288,16], index: 13, kind: output, shape index: {}]  }
   0x1   :  { %s5391_s27 = smov 0  }
   0x2 LB: > { %s35_s28 = sadd.s32 1, %s5310_s26  ;;  %p4843_p0 = scmp.ge.s32.totalorder %s5314_s27, 1  ;;  %s5314_s27 = sphi %s5391_s27, %s23_s27   ;;  %s5310_s26 = sphi %s5389_s26, %s7631_s26   ;;  %s5306_s25 = sphi %s5387_s25, %s7630_s25  }
   0x3   : > { %p37_p1 = scmp.ge.s32.totalorder %s35_s28, 2  ;;  %p401_p2 = scmp.lt.s32.totalorder %s5314_s27, 3 }
   0x5   : > { %s7633_s28 = smov (%p37_p1, %s35_s28), 0  ;;  %p402_p3 = pnand %p4843_p0, %p401_p2 }
   0x7   : > { %405 = sbr.rel (%p402_p3) target bundleno = 1324 (0x52c), region = 72 }
   0xc   : > { %v1230_v0 = vld [vmem:[%s7431_s1] sm:$0xf]  ;;  %vm7444_vm0 = vcmask 1043456   ;;  %p449_p4 = scmp.lt.s32.totalorder %s5306_s25, 1  ;;  %vm7446_vm1 = vcmask 64512   ;;  %vm7445_vm2 = vcmask 1041408   ;;  %v512_v16 = vlaneseq }
   0xd   : > { %v1402_v1 = vsel %vm7444_vm0, %v1230_v0, 0  ;;  %v1792_v14 = vld [vmem:[%s7432_s2] sm:$0x3]  ;;  %v4993_v22 = vld [vmem:[%s7432_s2 + $0x2] sm:$0x3]  ;;  %v5316_v57 = vmov 0.0  }
   0xe   : > { %1411 = vmatpush.bf16.msra.mxu0 %v1402_v1  ;;  %s7635_s25 = smov (!%p449_p4, %s5306_s25), 1  ;;  %5225 = vmatpush.bf16.msra.mxu1 %v1402_v1  ;;  %v2061_v15 = vsel %vm7445_vm2, %v1792_v14, 0  ;;  %v5446_v18 = vshrl.u32 %v512_v16, 7  ;;  %v1905_v23 = vsel %vm7445_vm2, %v4993_v22, 0  ;;  %v5465_v40 = vld [vmem:[%s7435_s5] ss:$0 sm:$0xff] }
   0xf   : > { %5226 = vmatpush.bf16.msra.mxu2 %v1402_v1  ;;  %s5227_s14 = smul.u32 168, %s7635_s25  ;;  %v5030_v42 = vld [vmem:[%s7432_s2 + $0x4] sm:$0x3]  ;;  %v5473_v43 = vld [vmem:[%s7436_s6] ss:$0 sm:$0xff]  ;;  %vm1694_vm14 = vcmask 31744  }
  0x10   : > { %v555_v19 = vcvt.s32.f32 %v5446_v18  ;;  %v514_v20 = vadd.s32 8, %v5446_v18  ;;  %v515_v29 = vadd.s32 16, %v5446_v18  ;;  %v5459_v36 = vadd.s32 24, %v5446_v18  ;;  %v5068_v51 = vld [vmem:[%s7432_s2 + $0x8] sm:$0x3]  ;;  %s5228_s15 = smul.u32 144, %s7635_s25 }
  0x11   : > { %s5415_s17 = scalar_lea.vmem %s7430_s0, %s5227_s14  ;;  %v5477_v47 = vadd.s32 32, %v5446_v18  ;;  %v2273_v48 = vsel %vm7445_vm2, %v5030_v42, 0  ;;  %v2769_v52 = vsel %vm7445_vm2, %v5068_v51, 0  ;;  %v5490_v60 = vadd.s32 40, %v5446_v18 }
  0x12   : > { %v5204_v2 = vld [vmem:[%s5415_s17] sm:$0xff]  ;;  %v5205_v3 = vld [vmem:[%s5415_s17 + $0x8] sm:$0xff]  ;;  %v5206_v4 = vld [vmem:[%s5415_s17 + $0x10] sm:$0xff]  ;;  %v597_v21 = vadd.f32 0.5, %v555_v19  ;;  %v556_v24 = vcvt.s32.f32 %v514_v20  ;;  %1914 = vmatpush.bf16.msrb.mxu1 %v1905_v23  ;;  %v557_v32 = vcvt.s32.f32 %v515_v29  ;;  %v558_v39 = vcvt.s32.f32 %v5459_v36  ;;  %2282 = vmatpush.bf16.msra.mxu3 %v2273_v48  ;;  %s6969_s18 = scalar_lea.vmem %s7443_s13, %s5228_s15 }
  0x13   : > { %4972 = vmatmul.msk.bf16.vlgmr.msra.gmra.mxu0 %vm7446_vm1, %v5204_v2  ;;  %v5207_v5 = vld [vmem:[%s5415_s17 + $0x18] sm:$0xff]  ;;  %v5208_v6 = vld [vmem:[%s5415_s17 + $0x20] sm:$0xff]  ;;  %v5221_v7 = vld [vmem:[%s5415_s17 + $0x88] sm:$0xff]  ;;  %2070 = vmatpush.bf16.msrb.mxu2 %v2061_v15  ;;  %v559_v56 = vcvt.s32.f32 %v5477_v47 }
  0x14   : > { %v5223_v8 = vld [vmem:[%s5415_s17 + $0x98] sm:$0xff]  ;;  %4989 = vmatmul.msk.bf16.vlgmr.msra.gmra.mxu1 %vm7446_vm1, %v5221_v7  ;;  %v5209_v9 = vld [vmem:[%s5415_s17 + $0x28] sm:$0xff]  ;;  %v5222_v10 = vld [vmem:[%s5415_s17 + $0x90] sm:$0xff]  ;;  %v639_v25 = vmul.f32 0.055555556, %v597_v21  ;;  %v598_v26 = vadd.f32 0.5, %v556_v24 }
  0x15   : > { %4991 = vmatmul.msk.bf16.vlgmr.msra.gmra.mxu2 %vm7446_vm1, %v5223_v8  ;;  %v4970_v11 = vld [vmem:[%s5415_s17 + $0xa0] sm:$0xf]  ;;  %v5224_v12 = vld [vmem:[%s5415_s17 + $0xa0] sm:$0x30]  ;;  %v5210_v17 = vld [vmem:[%s5415_s17 + $0x30] sm:$0xff]  ;;  %v599_v35 = vadd.f32 0.5, %v557_v32 }
  0x16   : > { %v5436_v13 = vor.u32 %v5224_v12, %v4970_v11  ;;  %v5211_v27 = vld [vmem:[%s5415_s17 + $0x38] sm:$0xff]  ;;  %v681_v28 = vfloor.f32 %v639_v25  ;;  %v640_v30 = vmul.f32 0.055555556, %v598_v26  ;;  %v5212_v44 = vld [vmem:[%s5415_s17 + $0x40] sm:$0xff]  ;;  %v600_v46 = vadd.f32 0.5, %v558_v39  ;;  %v5213_v15 = vld [vmem:[%s5415_s17 + $0x48] sm:$0xff] }
  0x17   : > { %v641_v38 = vmul.f32 0.055555556, %v599_v35  ;;  %2778 = vmatpush.bf16.msra.mxu2 %v2769_v52  ;;  %v601_v0 = vadd.f32 0.5, %v559_v56  ;;  %v5530_v52 = vadd.s32 64, %v5446_v18 }
  0x18   : > { %7448 = vst [vmem:[#allocation3_spill] sm:$0xff] %v5436_v13  ;;  %v723_v31 = vmul.f32 18.0, %v681_v28  ;;  %v682_v33 = vfloor.f32 %v640_v30  ;;  %vm852_vm3 = vcmp.gt.f32.partialorder %v681_v28, 0.5  ;;  %vm894_vm4 = vcmp.lt.f32.partialorder %v681_v28, 16.5 }
  0x19   : > { %vm936_vm5 = vmand %vm852_vm3, %vm894_vm4  ;;  %v683_v45 = vfloor.f32 %v641_v38  ;;  %v642_v55 = vmul.f32 0.055555556, %v600_v46  ;;  %v643_v8 = vmul.f32 0.055555556, %v601_v0  ;;  %v5514_v28 = vadd.s32 56, %v5446_v18 }
  0x1a   : > { %v765_v34 = vsub.f32 %v555_v19, %v723_v31  ;;  %v724_v37 = vmul.f32 18.0, %v682_v33  ;;  %vm853_vm9 = vcmp.gt.f32.partialorder %v682_v33, 0.5  ;;  %vm895_vm10 = vcmp.lt.f32.partialorder %v682_v33, 16.5 }
  0x1b   : > { %vm937_vm13 = vmand %vm853_vm9, %vm895_vm10  ;;  %v725_v54 = vmul.f32 18.0, %v683_v45  ;;  %v684_v63 = vfloor.f32 %v642_v55  ;;  %vm854_vm4 = vcmp.gt.f32.partialorder %v683_v45, 0.5  ;;  %v562_v38 = vcvt.s32.f32 %v5514_v28 }
  0x1c   : > { %vm978_vm6 = vcmp.gt.f32.partialorder %v765_v34, 0.5  ;;  %vm1062_vm8 = vcmp.lt.f32.partialorder %v765_v34, 16.5  ;;  %v766_v41 = vsub.f32 %v556_v24, %v724_v37  ;;  %v563_v0 = vcvt.s32.f32 %v5530_v52 }
  0x1d   : > { %vm1020_vm7 = vmand %vm936_vm5, %vm978_vm6  ;;  %v767_v62 = vsub.f32 %v557_v32, %v725_v54  ;;  %vm896_vm5 = vcmp.lt.f32.partialorder %v683_v45, 16.5  ;;  %v726_v7 = vmul.f32 18.0, %v684_v63  ;;  %v604_v46 = vadd.f32 0.5, %v562_v38 }
  0x1e   : > { %vm1104_vm11 = vmand %vm1020_vm7, %vm1062_vm8  ;;  %vm979_vm12 = vcmp.gt.f32.partialorder %v766_v41, 0.5  ;;  %vm1063_vm3 = vcmp.lt.f32.partialorder %v766_v41, 16.5 }
  0x1f   : > { %v4846_v58 = vsel %vm1104_vm11, 1.0, %v5316_v57  ;;  %vm1021_vm15 = vmand %vm937_vm13, %vm979_vm12  ;;  %vm980_vm8 = vcmp.gt.f32.partialorder %v767_v62, 0.5  ;;  %vm1064_vm10 = vcmp.lt.f32.partialorder %v767_v62, 16.5  ;;  %v768_v16 = vsub.f32 %v558_v39, %v726_v7 }
  0x20   : > { %vm1105_vm6 = vmand %vm1021_vm15, %vm1063_vm3  ;;  %vm855_vm11 = vcmp.gt.f32.partialorder %v684_v63, 0.5  ;;  %vm897_vm12 = vcmp.lt.f32.partialorder %v684_v63, 16.5  ;;  %v646_v62 = vmul.f32 0.055555556, %v604_v46  ;;  %v605_v7 = vadd.f32 0.5, %v563_v0 }
  0x21   : > { %vm938_vm7 = vmand %vm854_vm4, %vm896_vm5  ;;  %vm981_vm3 = vcmp.gt.f32.partialorder %v768_v16, 0.5  ;;  %vm1065_vm5 = vcmp.lt.f32.partialorder %v768_v16, 16.5 }
  0x22   : > { %vm1022_vm9 = vmand %vm938_vm7, %vm980_vm8 }
  0x23   : > { %4973 = vmatmul.msk.bf16.gmra.mxu0 %vm7446_vm1, %v5205_v3  ;;  %v5049_v3 = vld [vmem:[%s7432_s2 + $0x6] sm:$0x3]  ;;  %vm1106_vm13 = vmand %vm1022_vm9, %vm1064_vm10 }
  0x24   : > { %4990 = vmatmul.msk.bf16.gmra.mxu1 %vm7446_vm1, %v5222_v10  ;;  %v5502_v10 = vadd.s32 48, %v5446_v18  ;;  %vm939_vm15 = vmand %vm855_vm11, %vm897_vm12  ;;  %v4848_v25 = vsel %vm1106_vm13, 1.0, %v5316_v57 }
  0x25   : > { %4992 = vmatmul.msk.bf16.gmra.mxu2 %vm7446_vm1, %v5436_v13  ;;  %vm1023_vm4 = vmand %vm939_vm15, %vm981_vm3 }
  0x26   : > { %v561_v20 = vcvt.s32.f32 %v5502_v10  ;;  %vm1107_vm8 = vmand %vm1023_vm4, %vm1065_vm5 }
  0x27   : > { %v4849_v42 = vsel %vm1107_vm8, 1.0, %v5316_v57 }
  0x28   : > { %v603_v26 = vadd.f32 0.5, %v561_v20 }
  0x2a   : > { %v645_v35 = vmul.f32 0.055555556, %v603_v26 }
  0x33   : > { %4974 = vmatmul.msk.bf16.gmra.mxu0 %vm7446_vm1, %v5206_v4  ;;  %v2521_v4 = vsel %vm7445_vm2, %v5049_v3, 0 }
  0x34   : > { %2530 = vmatpush.bf16.msra.mxu1 %v2521_v4 }
  0x43   : > { %4975 = vmatmul.msk.bf16.gmra.mxu0 %vm7446_vm1, %v5207_v5  ;;  %v560_v5 = vcvt.s32.f32 %v5490_v60 }
  0x45   : > { %v602_v12 = vadd.f32 0.5, %v560_v5 }
  0x47   : > { %v644_v22 = vmul.f32 0.055555556, %v602_v12 }
  0x49   : > { %v686_v29 = vfloor.f32 %v644_v22 }
  0x4b   : > { %v728_v39 = vmul.f32 18.0, %v686_v29  ;;  %vm857_vm13 = vcmp.gt.f32.partialorder %v686_v29, 0.5  ;;  %vm899_vm15 = vcmp.lt.f32.partialorder %v686_v29, 16.5  ;;  %v5215_v29 = vld [vmem:[%s5415_s17 + $0x58] sm:$0xff] }
  0x4c   : > { %vm941_vm4 = vmand %vm857_vm13, %vm899_vm15 }
  0x4d   : > { %v770_v48 = vsub.f32 %v560_v5, %v728_v39  ;;  %v688_v5 = vfloor.f32 %v646_v62 }
  0x4f   : > { %vm983_vm5 = vcmp.gt.f32.partialorder %v770_v48, 0.5  ;;  %v730_v16 = vmul.f32 18.0, %v688_v5 }
  0x53   : > { %4976 = vmatmul.msk.bf16.gmra.mxu0 %vm7446_vm1, %v5208_v6 }
  0x63   : > { %4977 = vmatmul.msk.bf16.gmra.mxu0 %vm7446_vm1, %v5209_v9  ;;  %v4847_v9 = vsel %vm1105_vm6, 1.0, %v5316_v57 }
  0x73   : > { %4978 = vmatmul.msk.bf16.gmra.mxu0 %vm7446_vm1, %v5210_v17  ;;  %v685_v17 = vfloor.f32 %v643_v8 }
  0x75   : > { %v727_v24 = vmul.f32 18.0, %v685_v17  ;;  %vm856_vm6 = vcmp.gt.f32.partialorder %v685_v17, 0.5  ;;  %vm898_vm7 = vcmp.lt.f32.partialorder %v685_v17, 16.5 }
  0x76   : > { %vm940_vm9 = vmand %vm856_vm6, %vm898_vm7  ;;  %vm1067_vm7 = vcmp.lt.f32.partialorder %v770_v48, 16.5 }
  0x77   : > { %v769_v31 = vsub.f32 %v559_v56, %v727_v24  ;;  %vm1025_vm6 = vmand %vm941_vm4, %vm983_vm5  ;;  %v772_v24 = vsub.f32 %v562_v38, %v730_v16  ;;  %vm901_vm4 = vcmp.lt.f32.partialorder %v688_v5, 16.5 }
  0x79   : > { %vm982_vm10 = vcmp.gt.f32.partialorder %v769_v31, 0.5  ;;  %vm1066_vm12 = vcmp.lt.f32.partialorder %v769_v31, 16.5 }
  0x7a   : > { %vm5524_vm11 = vmand %vm940_vm9, %vm982_vm10 }
  0x7b   : > { %vm1108_vm3 = vmand %vm5524_vm11, %vm1066_vm12 }
  0x7c   : > { %vm1109_vm10 = vmand %vm1025_vm6, %vm1067_vm7  ;;  %vm985_vm7 = vcmp.gt.f32.partialorder %v772_v24, 0.5 }
  0x83   : > { %4979 = vmatmul.msk.bf16.gmra.mxu0 %vm7446_vm1, %v5211_v27 }
  0x90   : > { %v1413_v49 = vpop.f32.mrf.mxu0 }
  0x91   : > { %v1522_v50 = vmul.f32 %v5465_v40, %v1413_v49 }
  0x93   : > { %v1568_v53 = vadd.f32 %v5473_v43, %v1522_v50  ;;  %4980 = vmatmul.msk.bf16.gmra.mxu0 %vm7446_vm1, %v5212_v44  ;;  %v687_v44 = vfloor.f32 %v645_v35  ;;  %v5214_v50 = vld [vmem:[%s5415_s17 + $0x50] sm:$0xff] }
  0x95   : > { %v1610_v59 = vmax.f32 %v1568_v53, 0.0  ;;  %vm858_vm8 = vcmp.gt.f32.partialorder %v687_v44, 0.5  ;;  %vm900_vm9 = vcmp.lt.f32.partialorder %v687_v44, 16.5 }
  0x96   : > { %vm942_vm11 = vmand %vm858_vm8, %vm900_vm9  ;;  %vm1069_vm9 = vcmp.lt.f32.partialorder %v772_v24, 16.5 }
  0x97   : > { %v1652_v61 = vmul.f32 %v4846_v58, %v1610_v59  ;;  %v729_v58 = vmul.f32 18.0, %v687_v44 }
  0x98   : > { %v1415_v1 = vpop.f32.mrf.mxu0 }
  0x99   : > { %1695 = vst.msk [vmem:[#allocation2] sm:$0xff] %vm1694_vm14, %v1652_v61  ;;  %v1523_v2 = vmul.f32 %v5465_v40, %v1415_v1  ;;  %v4850_v1 = vsel %vm1108_vm3, 1.0, %v5316_v57  ;;  %v771_v4 = vsub.f32 %v561_v20, %v729_v58  ;;  %v4851_v20 = vsel %vm1109_vm10, 1.0, %v5316_v57 }
  0x9a   : > { %vm859_vm3 = vcmp.gt.f32.partialorder %v688_v5, 0.5 }
  0x9b   : > { %v1569_v6 = vadd.f32 %v5473_v43, %v1523_v2  ;;  %v5543_v2 = vadd.s32 72, %v5446_v18  ;;  %vm984_vm12 = vcmp.gt.f32.partialorder %v771_v4, 0.5  ;;  %vm1068_vm15 = vcmp.lt.f32.partialorder %v771_v4, 16.5  ;;  %vm943_vm6 = vmand %vm859_vm3, %vm901_vm4 }
  0x9c   : > { %vm1026_vm13 = vmand %vm942_vm11, %vm984_vm12 }
  0x9d   : > { %v1611_v11 = vmax.f32 %v1569_v6, 0.0  ;;  %v564_v12 = vcvt.s32.f32 %v5543_v2  ;;  %vm5566_vm5 = vmand %vm1026_vm13, %vm1068_vm15 }
  0x9e   : > { %v4852_v46 = vsel %vm5566_vm5, 1.0, %v5316_v57  ;;  %vm1027_vm8 = vmand %vm943_vm6, %vm985_vm7 }
  0x9f   : > { %v1653_v14 = vmul.f32 %v4847_v9, %v1611_v11  ;;  %vm1111_vm10 = vmand %vm1027_vm8, %vm1069_vm9 }
  0xa0   : > { %v1418_v19 = vpop.f32.mrf.mxu0  ;;  %v1738_v33 = vld [vmem:[#allocation2] sm:$0xff] }
  0xa1   : > { %1696 = vst.msk [vmem:[#allocation2 + $0x8] sm:$0xff] %vm1694_vm14, %v1653_v14  ;;  %v1524_v21 = vmul.f32 %v5465_v40, %v1418_v19  ;;  %v5551_v14 = vadd.s32 80, %v5446_v18  ;;  %v647_v19 = vmul.f32 0.055555556, %v605_v7 }
  0xa3   : > { %v1570_v23 = vadd.f32 %v5473_v43, %v1524_v21  ;;  %4981 = vmatmul.msk.bf16.gmra.mxu0 %vm7446_vm1, %v5213_v15  ;;  %v606_v21 = vadd.f32 0.5, %v564_v12  ;;  %v565_v22 = vcvt.s32.f32 %v5551_v14  ;;  %v689_v31 = vfloor.f32 %v647_v19 }
  0xa5   : > { %v1612_v27 = vmax.f32 %v1570_v23, 0.0  ;;  %v607_v28 = vadd.f32 0.5, %v565_v22  ;;  %v731_v44 = vmul.f32 18.0, %v689_v31  ;;  %vm860_vm11 = vcmp.gt.f32.partialorder %v689_v31, 0.5 }
  0xa6   : > { %vm902_vm12 = vcmp.lt.f32.partialorder %v689_v31, 16.5 }
  0xa7   : > { %v1654_v30 = vmul.f32 %v4848_v25, %v1612_v27  ;;  %v5564_v25 = vadd.s32 88, %v5446_v18  ;;  %v649_v48 = vmul.f32 0.055555556, %v607_v28  ;;  %vm944_vm13 = vmand %vm860_vm11, %vm902_vm12 }
  0xa8   : > { %v1420_v32 = vpop.f32.mrf.mxu0  ;;  %v1739_v34 = vld [vmem:[#allocation2 + $0x8] sm:$0xff] }
  0xa9   : > { %1697 = vst.msk [vmem:[#allocation2 + $0x10] sm:$0xff] %vm1694_vm14, %v1654_v30  ;;  %v1525_v36 = vmul.f32 %v5465_v40, %v1420_v32  ;;  %v1774_v37 = vpack.c.bf16 %v1739_v34, %v1738_v33  ;;  %v1793_v51 = vld [vmem:[#allocation2 + $0x1] sm:$0xff] }
  0xaa   : > { %v2162_v55 = vld [vmem:[#allocation2 + $0x2] sm:$0xff] }
  0xab   : > { %v1571_v41 = vadd.f32 %v5473_v43, %v1525_v36  ;;  %5012 = vmatmul.msk.bf16.vlgmr.msrb.gmra.mxu2 %vm1694_vm14, %v1774_v37  ;;  %v648_v36 = vmul.f32 0.055555556, %v606_v21  ;;  %v566_v37 = vcvt.s32.f32 %v5564_v25  ;;  %v527_v25 = vadd.s32 112, %v5446_v18 }
  0xad   : > { %v1613_v45 = vmax.f32 %v1571_v41, 0.0  ;;  %v690_v47 = vfloor.f32 %v648_v36  ;;  %v5711_v36 = vadd.s32 128, %v5446_v18 }
  0xaf   : > { %v1655_v49 = vmul.f32 %v4849_v42, %v1613_v45  ;;  %v608_v45 = vadd.f32 0.5, %v566_v37  ;;  %vm861_vm3 = vcmp.gt.f32.partialorder %v690_v47, 0.5  ;;  %vm903_vm4 = vcmp.lt.f32.partialorder %v690_v47, 16.5 }
  0xb0   : > { %v1423_v53 = vpop.f32.mrf.mxu0  ;;  %v1794_v54 = vld [vmem:[#allocation2 + $0x9] sm:$0xff]  ;;  %vm5609_vm7 = vmand %vm861_vm3, %vm903_vm4 }
  0xb1   : > { %v2163_v56 = vld [vmem:[#allocation2 + $0xa] sm:$0xff]  ;;  %1698 = vst.msk [vmem:[#allocation2 + $0x18] sm:$0xff] %vm1694_vm14, %v1655_v49  ;;  %v1526_v59 = vmul.f32 %v5465_v40, %v1423_v53  ;;  %v1829_v60 = vpack.c.bf16 %v1794_v54, %v1793_v51  ;;  %v773_v53 = vsub.f32 %v563_v0, %v731_v44  ;;  %v650_v54 = vmul.f32 0.055555556, %v608_v45 }
  0xb2   : > { %v2198_v61 = vpack.c.bf16 %v2163_v56, %v2162_v55  ;;  %v1740_v9 = vld [vmem:[#allocation2 + $0x10] sm:$0xff] }
  0xb3   : > { %v1572_v63 = vadd.f32 %v5473_v43, %v1526_v59  ;;  %4982 = vmatmul.msk.bf16.gmra.mxu0 %vm7446_vm1, %v5214_v50  ;;  %4994 = vmatmul.msk.bf16.vlgmr.msrb.gmra.mxu1 %vm1694_vm14, %v1829_v60  ;;  %v5588_v50 = vadd.s32 96, %v5446_v18  ;;  %v732_v59 = vmul.f32 18.0, %v690_v47  ;;  %v691_v60 = vfloor.f32 %v649_v48 }
  0xb4   : > { %5031 = vmatmul.msk.bf16.vlgmr.msra.gmra.mxu3 %vm1694_vm14, %v2198_v61  ;;  %vm986_vm15 = vcmp.gt.f32.partialorder %v773_v53, 0.5  ;;  %v692_v0 = vfloor.f32 %v650_v54  ;;  %vm1070_vm6 = vcmp.lt.f32.partialorder %v773_v53, 16.5  ;;  %v1498_v53 = vpop.f32.mrf.mxu1 }
  0xb5   : > { %v1614_v3 = vmax.f32 %v1572_v63, 0.0  ;;  %v567_v61 = vcvt.s32.f32 %v5588_v50  ;;  %v774_v4 = vsub.f32 %v564_v12, %v732_v59  ;;  %v733_v5 = vmul.f32 18.0, %v691_v60  ;;  %vm5601_vm5 = vmand %vm944_vm13, %vm986_vm15  ;;  %v5217_v59 = vld [vmem:[%s5415_s17 + $0x68] sm:$0xff] }
  0xb6   : > { %v734_v2 = vmul.f32 18.0, %v692_v0  ;;  %vm1112_vm9 = vmand %vm5601_vm5, %vm1070_vm6  ;;  %vm904_vm11 = vcmp.lt.f32.partialorder %v691_v60, 16.5  ;;  %vm863_vm15 = vcmp.gt.f32.partialorder %v692_v0, 0.5  ;;  %vm905_vm3 = vcmp.lt.f32.partialorder %v692_v0, 16.5 }
  0xb7   : > { %v1656_v6 = vmul.f32 %v4850_v1, %v1614_v3  ;;  %v4853_v1 = vsel %vm1111_vm10, 1.0, %v5316_v57  ;;  %v609_v3 = vadd.f32 0.5, %v567_v61  ;;  %vm987_vm8 = vcmp.gt.f32.partialorder %v774_v4, 0.5 }
  0xb8   : > { %v1425_v8 = vpop.f32.mrf.mxu0  ;;  %v1741_v11 = vld [vmem:[#allocation2 + $0x18] sm:$0xff]  ;;  %vm862_vm10 = vcmp.gt.f32.partialorder %v691_v60, 0.5  ;;  %vm1029_vm12 = vmand %vm5609_vm7, %vm987_vm8  ;;  %vm1071_vm13 = vcmp.lt.f32.partialorder %v774_v4, 16.5 }
  0xb9   : > { %1699 = vst.msk [vmem:[#allocation2 + $0x20] sm:$0xff] %vm1694_vm14, %v1656_v6  ;;  %v1527_v10 = vmul.f32 %v5465_v40, %v1425_v8  ;;  %v1775_v15 = vpack.c.bf16 %v1741_v11, %v1740_v9  ;;  %v1795_v30 = vld [vmem:[#allocation2 + $0x11] sm:$0xff]  ;;  %v651_v6 = vmul.f32 0.055555556, %v609_v3  ;;  %v5606_v11 = vadd.s32 104, %v5446_v18  ;;  %vm946_vm4 = vmand %vm862_vm10, %vm904_vm11 }
  0xba   : > { %v2164_v34 = vld [vmem:[#allocation2 + $0x12] sm:$0xff]  ;;  %vm5634_vm6 = vmand %vm1029_vm12, %vm1071_vm13  ;;  %v547_v8 = vadd.s32 272, %v5446_v18 }
  0xbb   : > { %v1573_v17 = vadd.f32 %v5473_v43, %v1527_v10  ;;  %5013 = vmatmul.msk.bf16.gmra.mxu2 %vm1694_vm14, %v1775_v15  ;;  %v693_v9 = vfloor.f32 %v651_v6  ;;  %v5216_v15 = vld [vmem:[%s5415_s17 + $0x60] sm:$0xff]  ;;  %v568_v24 = vcvt.s32.f32 %v5606_v11  ;;  %v4855_v48 = vsel %vm5634_vm6, 1.0, %v5316_v57 }
  0xbc   : > { %v1556_v11 = vmul.f32 %v5465_v40, %v1498_v53 }
  0xbd   : > { %v1615_v23 = vmax.f32 %v1573_v17, 0.0  ;;  %v610_v31 = vadd.f32 0.5, %v568_v24  ;;  %vm864_vm7 = vcmp.gt.f32.partialorder %v693_v9, 0.5  ;;  %vm906_vm8 = vcmp.lt.f32.partialorder %v693_v9, 16.5 }
  0xbe   : > { %vm948_vm10 = vmand %vm864_vm7, %vm906_vm8 }
  0xbf   : > { %v1657_v26 = vmul.f32 %v4851_v20, %v1615_v23  ;;  %v775_v23 = vsub.f32 %v565_v22, %v733_v5  ;;  %v776_v22 = vsub.f32 %v566_v37, %v734_v2  ;;  %v5684_v2 = vadd.f32 %v5473_v43, %v1556_v11 }
  0xc0   : > { %v1428_v32 = vpop.f32.mrf.mxu0  ;;  %v1796_v33 = vld [vmem:[#allocation2 + $0x19] sm:$0xff] }
  0xc1   : > { %v2165_v35 = vld [vmem:[#allocation2 + $0x1a] sm:$0xff]  ;;  %1700 = vst.msk [vmem:[#allocation2 + $0x28] sm:$0xff] %vm1694_vm14, %v1657_v26  ;;  %v1528_v38 = vmul.f32 %v5465_v40, %v1428_v32  ;;  %v1830_v39 = vpack.c.bf16 %v1796_v33, %v1795_v30  ;;  %v735_v30 = vmul.f32 18.0, %v693_v9  ;;  %v4854_v32 = vsel %vm1112_vm9, 1.0, %v5316_v57  ;;  %vm947_vm9 = vmand %vm863_vm15, %vm905_vm3 }
  0xc2   : > { %v2199_v41 = vpack.c.bf16 %v2165_v35, %v2164_v34  ;;  %v1742_v56 = vld [vmem:[#allocation2 + $0x20] sm:$0xff]  ;;  %v652_v33 = vmul.f32 0.055555556, %v610_v31  ;;  %vm988_vm5 = vcmp.gt.f32.partialorder %v775_v23, 0.5  ;;  %vm989_vm0 = vcmp.gt.f32.partialorder %v776_v22, 0.5 }
  0xc3   : > { %v1574_v42 = vadd.f32 %v5473_v43, %v1528_v38  ;;  %4983 = vmatmul.msk.bf16.gmra.mxu0 %vm7446_vm1, %v5215_v29  ;;  %4995 = vmatmul.msk.bf16.gmra.mxu1 %vm1694_vm14, %v1830_v39  ;;  %v777_v35 = vsub.f32 %v567_v61, %v735_v30  ;;  %vm1030_vm2 = vmand %vm946_vm4, %vm988_vm5  ;;  %vm1073_vm13 = vcmp.lt.f32.partialorder %v776_v22, 16.5 }
  0xc4   : > { %5032 = vmatmul.msk.bf16.gmra.mxu3 %vm1694_vm14, %v2199_v41  ;;  %v5639_v41 = vfloor.f32 %v652_v33  ;;  %vm1031_vm12 = vmand %vm947_vm9, %vm989_vm0  ;;  %v1500_v33 = vpop.f32.mrf.mxu1 }
  0xc5   : > { %v1616_v49 = vmax.f32 %v1574_v42, 0.0  ;;  %v569_v42 = vcvt.s32.f32 %v527_v25  ;;  %vm990_vm11 = vcmp.gt.f32.partialorder %v777_v35, 0.5  ;;  %vm1074_vm4 = vcmp.lt.f32.partialorder %v777_v35, 16.5  ;;  %vm1115_vm5 = vmand %vm1031_vm12, %vm1073_vm13 }
  0xc6   : > { %vm1032_vm3 = vmand %vm948_vm10, %vm990_vm11  ;;  %v5657_v3 = vsel %vm1115_vm5, 1.0, %v5316_v57  ;;  %vm907_vm6 = vcmp.lt.f32.partialorder %v5639_v41, 16.5 }
  0xc7   : > { %v1658_v51 = vmul.f32 %v4852_v46, %v1616_v49  ;;  %v611_v46 = vadd.f32 0.5, %v569_v42  ;;  %v736_v49 = vmul.f32 18.0, %v5639_v41  ;;  %vm1116_vm0 = vmand %vm1032_vm3, %vm1074_vm4 }
  0xc8   : > { %v1430_v55 = vpop.f32.mrf.mxu0  ;;  %v1743_v58 = vld [vmem:[#allocation2 + $0x28] sm:$0xff]  ;;  %v5668_v9 = vsel %vm1116_vm0, 1.0, %v5316_v57 }
  0xc9   : > { %1701 = vst.msk [vmem:[#allocation2 + $0x30] sm:$0xff] %vm1694_vm14, %v1658_v51  ;;  %v1529_v62 = vmul.f32 %v5465_v40, %v1430_v55  ;;  %v1776_v63 = vpack.c.bf16 %v1743_v58, %v1742_v56  ;;  %v1797_v16 = vld [vmem:[#allocation2 + $0x21] sm:$0xff]  ;;  %v653_v50 = vmul.f32 0.055555556, %v611_v46  ;;  %v5652_v55 = vadd.s32 120, %v5446_v18 }
  0xca   : > { %v2166_v20 = vld [vmem:[#allocation2 + $0x22] sm:$0xff] }
  0xcb   : > { %v1575_v52 = vadd.f32 %v5473_v43, %v1529_v62  ;;  %5014 = vmatmul.msk.bf16.gmra.mxu2 %vm1694_vm14, %v1776_v63  ;;  %v695_v54 = vfloor.f32 %v653_v50  ;;  %v570_v4 = vcvt.s32.f32 %v5652_v55 }
  0xcd   : > { %v1617_v7 = vmax.f32 %v1575_v52, 0.0  ;;  %v5661_v52 = vsub.f32 %v568_v24, %v736_v49  ;;  %v737_v0 = vmul.f32 18.0, %v695_v54  ;;  %v612_v17 = vadd.f32 0.5, %v570_v4 }
  0xce   : > { %vm866_vm9 = vcmp.gt.f32.partialorder %v695_v54, 0.5  ;;  %vm908_vm10 = vcmp.lt.f32.partialorder %v695_v54, 16.5  ;;  %v5743_v54 = vadd.s32 312, %v5446_v18 }
  0xcf   : > { %v1659_v10 = vmul.f32 %v4853_v1, %v1617_v7  ;;  %vm991_vm7 = vcmp.gt.f32.partialorder %v5661_v52, 0.5  ;;  %vm1075_vm8 = vcmp.lt.f32.partialorder %v5661_v52, 16.5 }
  0xd0   : > { %v1433_v12 = vpop.f32.mrf.mxu0  ;;  %v1798_v19 = vld [vmem:[#allocation2 + $0x29] sm:$0xff] }
  0xd1   : > { %v2167_v21 = vld [vmem:[#allocation2 + $0x2a] sm:$0xff]  ;;  %1702 = vst.msk [vmem:[#allocation2 + $0x38] sm:$0xff] %vm1694_vm14, %v1659_v10  ;;  %v1530_v26 = vmul.f32 %v5465_v40, %v1433_v12  ;;  %v1831_v27 = vpack.c.bf16 %v1798_v19, %v1797_v16  ;;  %v5672_v10 = vsub.f32 %v569_v42, %v737_v0  ;;  %v589_v16 = vcvt.s32.f32 %v547_v8 }
  0xd2   : > { %v2200_v29 = vpack.c.bf16 %v2167_v21, %v2166_v20  ;;  %v1744_v38 = vld [vmem:[#allocation2 + $0x30] sm:$0xff]  ;;  %v654_v20 = vmul.f32 0.055555556, %v612_v17  ;;  %v5689_v21 = vadd.s32 280, %v5446_v18 }
  0xd3   : > { %v1576_v14 = vadd.f32 %v5473_v43, %v1530_v26  ;;  %4984 = vmatmul.msk.bf16.gmra.mxu0 %vm7446_vm1, %v5216_v15  ;;  %4996 = vmatmul.msk.bf16.gmra.mxu1 %vm1694_vm14, %v1831_v27  ;;  %vm1072_vm1 = vcmp.lt.f32.partialorder %v775_v23, 16.5  ;;  %v631_v19 = vadd.f32 0.5, %v589_v16  ;;  %vm992_vm11 = vcmp.gt.f32.partialorder %v5672_v10, 0.5 }
  0xd4   : > { %5033 = vmatmul.msk.bf16.gmra.mxu3 %vm1694_vm14, %v2200_v29  ;;  %vm1114_vm15 = vmand %vm1030_vm2, %vm1072_vm1  ;;  %vm865_vm1 = vcmp.gt.f32.partialorder %v5639_v41, 0.5  ;;  %vm7459_vm2 = vcmask 64512   ;;  %vm1076_vm12 = vcmp.lt.f32.partialorder %v5672_v10, 16.5  ;;  %v5692_v23 = vadd.s32 288, %v5446_v18 }
  0xd5   : > { %v1618_v34 = vmax.f32 %v1576_v14, 0.0  ;;  %v4856_v58 = vsel %vm1114_vm15, 1.0, %v5316_v57  ;;  %v673_v26 = vmul.f32 0.055555556, %v631_v19  ;;  %v1644_v27 = vmax.f32 %v5684_v2, 0.0  ;;  %vm5701_vm13 = vmand %vm865_vm1, %vm907_vm6 }
  0xd6   : > { %v5695_v29 = vfloor.f32 %v654_v20  ;;  %v591_v35 = vcvt.s32.f32 %v5692_v23  ;;  %vm950_vm15 = vmand %vm866_vm9, %vm908_vm10  ;;  %v5873_v23 = vadd.s32 320, %v5446_v18 }
  0xd7   : > { %v1660_v28 = vmul.f32 %v4854_v32, %v1618_v34  ;;  %v590_v32 = vcvt.s32.f32 %v5689_v21  ;;  %v5707_v34 = vadd.s32 304, %v5446_v18  ;;  %vm5727_vm3 = vmand %vm5701_vm13, %vm991_vm7 }
  0xd8   : > { %v1435_v37 = vpop.f32.mrf.mxu0  ;;  %v1745_v39 = vld [vmem:[#allocation2 + $0x38] sm:$0xff]  ;;  %vm5733_vm0 = vmand %vm950_vm15, %vm992_vm11  ;;  %vm909_vm10 = vcmp.lt.f32.partialorder %v5695_v29, 16.5 }
  0xd9   : > { %1703 = vst.msk [vmem:[#allocation2 + $0x40] sm:$0xff] %vm1694_vm14, %v1660_v28  ;;  %v1531_v44 = vmul.f32 %v5465_v40, %v1435_v37  ;;  %v1777_v45 = vpack.c.bf16 %v1745_v39, %v1744_v38  ;;  %v1799_v60 = vld [vmem:[#allocation2 + $0x31] sm:$0xff]  ;;  %v715_v37 = vfloor.f32 %v673_v26  ;;  %v1557_v38 = vmul.f32 %v5465_v40, %v1500_v33  ;;  %v1508_v39 = vpop.f32.mrf.mxu2  ;;  %vm5764_vm6 = vmand %vm5727_vm3, %vm1075_vm8 }
  0xda   : > { %v2168_v63 = vld [vmem:[#allocation2 + $0x32] sm:$0xff]  ;;  %v632_v41 = vadd.f32 0.5, %v590_v32  ;;  %v593_v42 = vcvt.s32.f32 %v5707_v34  ;;  %vm5775_vm13 = vmand %vm5733_vm0, %vm1076_vm12  ;;  %v594_v34 = vcvt.s32.f32 %v5743_v54  ;;  %v4859_v49 = vsel %vm5764_vm6, 1.0, %v5316_v57 }
  0xdb   : > { %v1577_v47 = vadd.f32 %v5473_v43, %v1531_v44  ;;  %5015 = vmatmul.msk.bf16.gmra.mxu2 %vm1694_vm14, %v1777_v45  ;;  %v1560_v44 = vmul.f32 %v5465_v40, %v1508_v39  ;;  %v738_v45 = vmul.f32 18.0, %v5695_v29  ;;  %vm886_vm4 = vcmp.gt.f32.partialorder %v715_v37, 0.5 }
  0xdc   : > { %vm928_vm5 = vcmp.lt.f32.partialorder %v715_v37, 16.5  ;;  %v674_v50 = vmul.f32 0.055555556, %v632_v41  ;;  %v635_v53 = vadd.f32 0.5, %v593_v42  ;;  %v636_v39 = vadd.f32 0.5, %v594_v34 }
  0xdd   : > { %v1619_v51 = vmax.f32 %v1577_v47, 0.0  ;;  %vm5745_vm1 = vmand %vm886_vm4, %vm928_vm5  ;;  %vm7474_vm5 = vcmask 64512  }
  0xde   : > { %v677_v0 = vmul.f32 0.055555556, %v635_v53 }
  0xdf   : > { %v1661_v56 = vmul.f32 %v4855_v48, %v1619_v51  ;;  %v757_v48 = vmul.f32 18.0, %v715_v37  ;;  %v5738_v51 = vadd.f32 %v5473_v43, %v1557_v38 }
  0xe0   : > { %v1438_v61 = vpop.f32.mrf.mxu0  ;;  %v1800_v62 = vld [vmem:[#allocation2 + $0x39] sm:$0xff] }
  0xe1   : > { %v2169_v1 = vld [vmem:[#allocation2 + $0x3a] sm:$0xff]  ;;  %1704 = vst.msk [vmem:[#allocation2 + $0x48] sm:$0xff] %vm1694_vm14, %v1661_v56  ;;  %v1532_v5 = vmul.f32 %v5465_v40, %v1438_v61  ;;  %v1832_v6 = vpack.c.bf16 %v1800_v62, %v1799_v60  ;;  %v5750_v60 = vadd.f32 %v5473_v43, %v1560_v44  ;;  %v5754_v61 = vsub.f32 %v570_v4, %v738_v45  ;;  %v5218_v62 = vld [vmem:[%s5415_s17 + $0x70] sm:$0xff]  ;;  %v1510_v22 = vpop.f32.mrf.mxu2 }
  0xe2   : > { %v2201_v7 = vpack.c.bf16 %v2169_v1, %v2168_v63  ;;  %v1746_v31 = vld [vmem:[#allocation2 + $0x40] sm:$0xff]  ;;  %v716_v63 = vfloor.f32 %v674_v50  ;;  %v1645_v1 = vmax.f32 %v5738_v51, 0.0  ;;  %v1561_v41 = vmul.f32 %v5465_v40, %v1510_v22 }
  0xe3   : > { %v1578_v15 = vadd.f32 %v5473_v43, %v1532_v5  ;;  %4985 = vmatmul.msk.bf16.gmra.mxu0 %vm7459_vm2, %v5217_v59  ;;  %4997 = vmatmul.msk.bf16.gmra.mxu1 %vm1694_vm14, %v1832_v6  ;;  %vm867_vm2 = vcmp.gt.f32.partialorder %v5695_v29, 0.5  ;;  %v1648_v10 = vmax.f32 %v5750_v60, 0.0  ;;  %v633_v29 = vadd.f32 0.5, %v591_v35 }
  0xe4   : > { %5034 = vmatmul.msk.bf16.gmra.mxu3 %vm1694_vm14, %v2201_v7  ;;  %v758_v52 = vmul.f32 18.0, %v716_v63  ;;  %vm887_vm8 = vcmp.gt.f32.partialorder %v716_v63, 0.5  ;;  %vm929_vm15 = vcmp.lt.f32.partialorder %v716_v63, 16.5  ;;  %v678_v63 = vmul.f32 0.055555556, %v636_v39 }
  0xe5   : > { %v1620_v12 = vmax.f32 %v1578_v15, 0.0  ;;  %v719_v15 = vfloor.f32 %v677_v0  ;;  %vm5784_vm12 = vmand %vm887_vm8, %vm929_vm15 }
  0xe6   : > { %v800_v20 = vsub.f32 %v590_v32, %v758_v52 }
  0xe7   : > { %v1662_v24 = vmul.f32 %v4856_v58, %v1620_v12  ;;  %v799_v58 = vsub.f32 %v589_v16, %v757_v48  ;;  %vm890_vm4 = vcmp.gt.f32.partialorder %v719_v15, 0.5  ;;  %vm932_vm0 = vcmp.lt.f32.partialorder %v719_v15, 16.5 }
  0xe8   : > { %v1440_v30 = vpop.f32.mrf.mxu0  ;;  %v1747_v14 = vld [vmem:[#allocation2 + $0x48] sm:$0xff]  ;;  %vm5805_vm8 = vmand %vm890_vm4, %vm932_vm0 }
  0xe9   : > { %1705 = vst.msk [vmem:[#allocation2 + $0x50] sm:$0xff] %vm1694_vm14, %v1662_v24  ;;  %v1533_v25 = vmul.f32 %v5465_v40, %v1440_v30  ;;  %v1778_v28 = vpack.c.bf16 %v1747_v14, %v1746_v31  ;;  %v1801_v6 = vld [vmem:[#allocation2 + $0x41] sm:$0xff]  ;;  %vm1012_vm7 = vcmp.gt.f32.partialorder %v799_v58, 0.5  ;;  %vm1096_vm9 = vcmp.lt.f32.partialorder %v799_v58, 16.5  ;;  %v1503_v14 = vpop.f32.mrf.mxu1 }
  0xea   : > { %v2170_v7 = vld [vmem:[#allocation2 + $0x42] sm:$0xff]  ;;  %vm1054_vm11 = vmand %vm5745_vm1, %vm1012_vm7  ;;  %v761_v24 = vmul.f32 18.0, %v719_v15  ;;  %vm993_vm7 = vcmp.gt.f32.partialorder %v5754_v61, 0.5  ;;  %v1558_v33 = vmul.f32 %v5465_v40, %v1503_v14 }
  0xeb   : > { %v1579_v46 = vadd.f32 %v5473_v43, %v1533_v25  ;;  %5016 = vmatmul.msk.bf16.gmra.mxu2 %vm1694_vm14, %v1778_v28  ;;  %vm1138_vm3 = vmand %vm1054_vm11, %vm1096_vm9  ;;  %vm1013_vm9 = vcmp.gt.f32.partialorder %v800_v20, 0.5  ;;  %vm1097_vm11 = vcmp.lt.f32.partialorder %v800_v20, 16.5  ;;  %v675_v25 = vmul.f32 0.055555556, %v633_v29 }
  0xec   : > { %v4880_v19 = vsel %vm1138_vm3, 1.0, %v5316_v57  ;;  %vm5797_vm1 = vmand %vm867_vm2, %vm909_vm10  ;;  %v803_v2 = vsub.f32 %v593_v42, %v761_v24  ;;  %vm1077_vm10 = vcmp.lt.f32.partialorder %v5754_v61, 16.5  ;;  %v571_v28 = vcvt.s32.f32 %v5711_v36 }
  0xed   : > { %v1621_v56 = vmax.f32 %v1579_v46, 0.0  ;;  %v1686_v30 = vmul.f32 %v4880_v19, %v1644_v27  ;;  %vm1055_vm2 = vmand %vm5784_vm12, %vm1013_vm9  ;;  %v717_v47 = vfloor.f32 %v675_v25  ;;  %v5855_v61 = vadd.f32 %v5473_v43, %v1561_v41 }
  0xee   : > { %vm1139_vm15 = vmand %vm1055_vm2, %vm1097_vm11  ;;  %vm1016_vm3 = vcmp.gt.f32.partialorder %v803_v2, 0.5  ;;  %vm1100_vm4 = vcmp.lt.f32.partialorder %v803_v2, 16.5  ;;  %v613_v48 = vadd.f32 0.5, %v571_v28 }
  0xef   : > { %v1663_v5 = vmul.f32 %v5657_v3, %v1621_v56  ;;  %1729 = vst.msk [vmem:[#allocation2 + $0x110] sm:$0xff] %vm1694_vm14, %v1686_v30  ;;  %v4881_v38 = vsel %vm1139_vm15, 1.0, %v5316_v57  ;;  %vm1035_vm0 = vmand %vm5797_vm1, %vm993_vm7  ;;  %v759_v59 = vmul.f32 18.0, %v717_v47  ;;  %vm888_vm6 = vcmp.gt.f32.partialorder %v717_v47, 0.5  ;;  %v5219_v3 = vld [vmem:[%s5415_s17 + $0x78] sm:$0xff] }
  0xf0   : > { %v1443_v55 = vpop.f32.mrf.mxu0  ;;  %v1802_v4 = vld [vmem:[#allocation2 + $0x49] sm:$0xff]  ;;  %v1687_v46 = vmul.f32 %v4881_v38, %v1645_v1  ;;  %vm5843_vm9 = vmand %vm1035_vm0, %vm1077_vm10  ;;  %vm930_vm11 = vcmp.lt.f32.partialorder %v717_v47, 16.5  ;;  %v1649_v54 = vmax.f32 %v5855_v61, 0.0 }
  0xf1   : > { %v2171_v11 = vld [vmem:[#allocation2 + $0x4a] sm:$0xff]  ;;  %1706 = vst.msk [vmem:[#allocation2 + $0x58] sm:$0xff] %vm1694_vm14, %v1663_v5  ;;  %v1534_v16 = vmul.f32 %v5465_v40, %v1443_v55  ;;  %v1833_v17 = vpack.c.bf16 %v1802_v4, %v1801_v6  ;;  %v801_v1 = vsub.f32 %v591_v35, %v759_v59  ;;  %vm5860_vm1 = vmand %vm888_vm6, %vm930_vm11  ;;  %v655_v6 = vmul.f32 0.055555556, %v613_v48  ;;  %v1513_v35 = vpop.f32.mrf.mxu2 }
  0xf2   : > { %v2202_v12 = vpack.c.bf16 %v2171_v11, %v2170_v7  ;;  %v1748_v44 = vld [vmem:[#allocation2 + $0x50] sm:$0xff]  ;;  %1730 = vst.msk [vmem:[#allocation2 + $0x118] sm:$0xff] %vm1694_vm14, %v1687_v46  ;;  %v5865_v7 = vadd.s32 296, %v5446_v18  ;;  %v5870_v55 = vsel %vm5843_vm9, 1.0, %v5316_v57  ;;  %v720_v4 = vfloor.f32 %v678_v63  ;;  %v1505_v11 = vpop.f32.mrf.mxu1  ;;  %v5106_v38 = vld [vmem:[%s7432_s2 + $0xc] sm:$0x3] }
  0xf3   : > { %v1580_v26 = vadd.f32 %v5473_v43, %v1534_v16  ;;  %4986 = vmatmul.msk.bf16.gmra.mxu0 %vm7474_vm5, %v5218_v62  ;;  %4998 = vmatmul.msk.bf16.gmra.mxu1 %vm1694_vm14, %v1833_v17  ;;  %vm1058_vm5 = vmand %vm5805_vm8, %vm1016_vm3  ;;  %v5852_v62 = vsel %vm5775_vm13, 1.0, %v5316_v57  ;;  %vm1014_vm13 = vcmp.gt.f32.partialorder %v801_v1, 0.5  ;;  %vm1098_vm7 = vcmp.lt.f32.partialorder %v801_v1, 16.5 }
  0xf4   : > { %5035 = vmatmul.msk.bf16.gmra.mxu3 %vm1694_vm14, %v2202_v12  ;;  %vm1142_vm12 = vmand %vm1058_vm5, %vm1100_vm4  ;;  %v697_v52 = vfloor.f32 %v655_v6  ;;  %v592_v15 = vcvt.s32.f32 %v5865_v7  ;;  %vm891_vm2 = vcmp.gt.f32.partialorder %v720_v4, 0.5  ;;  %vm933_vm10 = vcmp.lt.f32.partialorder %v720_v4, 16.5 }
  0xf5   : > { %v1622_v32 = vmax.f32 %v1580_v26, 0.0  ;;  %v4884_v56 = vsel %vm1142_vm12, 1.0, %v5316_v57  ;;  %vm1056_vm8 = vmand %vm5860_vm1, %vm1014_vm13  ;;  %v1559_v30 = vmul.f32 %v5465_v40, %v1505_v11  ;;  %v1562_v31 = vmul.f32 %v5465_v40, %v1513_v35 }
  0xf6   : > { %v1690_v51 = vmul.f32 %v4884_v56, %v1648_v10  ;;  %v762_v10 = vmul.f32 18.0, %v720_v4  ;;  %vm1140_vm15 = vmand %vm1056_vm8, %vm1098_vm7  ;;  %v739_v24 = vmul.f32 18.0, %v697_v52  ;;  %v634_v26 = vadd.f32 0.5, %v592_v15 }
  0xf7   : > { %v1664_v37 = vmul.f32 %v5668_v9, %v1622_v32  ;;  %v1604_v9 = vadd.f32 %v5473_v43, %v1558_v33  ;;  %v4882_v27 = vsel %vm1140_vm15, 1.0, %v5316_v57  ;;  %vm5890_vm3 = vmand %vm891_vm2, %vm933_vm10  ;;  %vm7485_vm4 = vcmask 64512  }
  0xf8   : > { %v1445_v42 = vpop.f32.mrf.mxu0  ;;  %v1749_v45 = vld [vmem:[#allocation2 + $0x58] sm:$0xff]  ;;  %1733 = vst.msk [vmem:[#allocation2 + $0x130] sm:$0xff] %vm1694_vm14, %v1690_v51  ;;  %v804_v32 = vsub.f32 %v594_v34, %v762_v10  ;;  %v5896_v25 = vsub.f32 %v571_v28, %v739_v24  ;;  %vm868_vm5 = vcmp.gt.f32.partialorder %v697_v52, 0.5  ;;  %v595_v34 = vcvt.s32.f32 %v5873_v23 }
  0xf9   : > { %1707 = vst.msk [vmem:[#allocation2 + $0x60] sm:$0xff] %vm1694_vm14, %v1664_v37  ;;  %v1535_v50 = vmul.f32 %v5465_v40, %v1445_v42  ;;  %v1779_v53 = vpack.c.bf16 %v1749_v45, %v1748_v44  ;;  %v1646_v5 = vmax.f32 %v1604_v9, 0.0  ;;  %v1803_v17 = vld [vmem:[#allocation2 + $0x51] sm:$0xff]  ;;  %v676_v37 = vmul.f32 0.055555556, %v634_v26  ;;  %v1515_v4 = vpop.f32.mrf.mxu2 }
  0xfa   : > { %v2172_v12 = vld [vmem:[#allocation2 + $0x52] sm:$0xff]  ;;  %vm1017_vm12 = vcmp.gt.f32.partialorder %v804_v32, 0.5  ;;  %vm1101_vm0 = vcmp.lt.f32.partialorder %v804_v32, 16.5  ;;  %vm910_vm9 = vcmp.lt.f32.partialorder %v697_v52, 16.5  ;;  %v637_v41 = vadd.f32 0.5, %v595_v34 }
  0xfb   : > { %v1581_v60 = vadd.f32 %v5473_v43, %v1535_v50  ;;  %5017 = vmatmul.msk.bf16.gmra.mxu2 %vm1694_vm14, %v1779_v53  ;;  %v1688_v29 = vmul.f32 %v4882_v27, %v1646_v5  ;;  %vm1059_vm6 = vmand %vm5890_vm3, %vm1017_vm12  ;;  %v718_v39 = vfloor.f32 %v676_v37  ;;  %vm994_vm1 = vcmp.gt.f32.partialorder %v5896_v25, 0.5 }
  0xfc   : > { %vm1143_vm11 = vmand %vm1059_vm6, %vm1101_vm0  ;;  %v5921_v44 = vadd.s32 136, %v5446_v18  ;;  %v5924_v45 = vadd.s32 144, %v5446_v18  ;;  %vm7486_vm13 = vcmask 1041408   ;;  %v679_v58 = vmul.f32 0.055555556, %v637_v41 }
  0xfd   : > { %v1623_v8 = vmax.f32 %v1581_v60, 0.0  ;;  %1731 = vst.msk [vmem:[#allocation2 + $0x120] sm:$0xff] %vm1694_vm14, %v1688_v29  ;;  %v3265_v46 = vsel %vm7486_vm13, %v5106_v38, 0  ;;  %v4885_v9 = vsel %vm1143_vm11, 1.0, %v5316_v57  ;;  %v760_v48 = vmul.f32 18.0, %v718_v39  ;;  %vm5931_vm8 = vmand %vm868_vm5, %vm910_vm9 }
  0xfe   : > { %vm889_vm7 = vcmp.gt.f32.partialorder %v718_v39, 0.5  ;;  %3274 = vmatpush.bf16.msrb.mxu0 %v3265_v46  ;;  %v1691_v50 = vmul.f32 %v4885_v9, %v1649_v54  ;;  %vm931_vm2 = vcmp.lt.f32.partialorder %v718_v39, 16.5  ;;  %v572_v59 = vcvt.s32.f32 %v5921_v44  ;;  %v5940_v60 = vld [vmem:[%s7435_s5] ss:$0 sm:$0xff]  ;;  %vm5955_vm3 = vmand %vm5931_vm8, %vm994_vm1 }
  0xff   : > { %v1665_v16 = vmul.f32 %v4859_v49, %v1623_v8  ;;  %vm1078_vm10 = vcmp.lt.f32.partialorder %v5896_v25, 16.5  ;;  %v802_v61 = vsub.f32 %v592_v15, %v760_v48  ;;  %vm973_vm15 = vmand %vm889_vm7, %vm931_vm2  ;;  %v721_v1 = vfloor.f32 %v679_v58 }
 0x100   : > { %v1448_v19 = vpop.f32.mrf.mxu0  ;;  %v1804_v20 = vld [vmem:[#allocation2 + $0x59] sm:$0xff]  ;;  %1734 = vst.msk [vmem:[#allocation2 + $0x138] sm:$0xff] %vm1694_vm14, %v1691_v50  ;;  %v614_v0 = vadd.f32 0.5, %v572_v59  ;;  %v573_v5 = vcvt.s32.f32 %v5924_v45  ;;  %vm5973_vm1 = vmand %vm5955_vm3, %vm1078_vm10  ;;  %vm7495_vm3 = vcmask 64512   ;;  %v5989_v54 = vadd.s32 160, %v5446_v18 }
 0x101   : > { %v2173_v21 = vld [vmem:[#allocation2 + $0x5a] sm:$0xff]  ;;  %1708 = vst.msk [vmem:[#allocation2 + $0x68] sm:$0xff] %vm1694_vm14, %v1665_v16  ;;  %v1536_v14 = vmul.f32 %v5465_v40, %v1448_v19  ;;  %v1834_v22 = vpack.c.bf16 %v1804_v20, %v1803_v17  ;;  %vm1099_vm5 = vcmp.lt.f32.partialorder %v802_v61, 16.5  ;;  %v763_v11 = vmul.f32 18.0, %v721_v1 }
 0x102   : > { %v2203_v2 = vpack.c.bf16 %v2173_v21, %v2172_v12  ;;  %v1750_v53 = vld [vmem:[#allocation2 + $0x60] sm:$0xff]  ;;  %vm892_vm0 = vcmp.gt.f32.partialorder %v721_v1, 0.5  ;;  %vm934_vm9 = vcmp.lt.f32.partialorder %v721_v1, 16.5  ;;  %v656_v23 = vmul.f32 0.055555556, %v614_v0  ;;  %v3155_v1 = vld [vmem:[#allocation2 + $0x2c] sm:$0xff] }
 0x103   : > { %v1582_v40 = vadd.f32 %v5473_v43, %v1536_v14  ;;  %4987 = vmatmul.msk.bf16.gmra.mxu0 %vm7485_vm4, %v5219_v3  ;;  %4999 = vmatmul.msk.bf16.gmra.mxu1 %vm1694_vm14, %v1834_v22  ;;  %v5911_v43 = vld [vmem:[%s7436_s6] ss:$0 sm:$0xff]  ;;  %vm1015_vm4 = vcmp.gt.f32.partialorder %v802_v61, 0.5  ;;  %v615_v52 = vadd.f32 0.5, %v573_v5  ;;  %v805_v16 = vsub.f32 %v595_v34, %v763_v11  ;;  %vm5963_vm11 = vmand %vm892_vm0, %vm934_vm9 }
 0x104   : > { %5036 = vmatmul.msk.bf16.gmra.mxu3 %vm1694_vm14, %v2203_v2  ;;  %v1605_v36 = vadd.f32 %v5911_v43, %v1559_v30  ;;  %v5917_v42 = vadd.f32 %v5911_v43, %v1562_v31  ;;  %vm1057_vm12 = vmand %vm973_vm15, %vm1015_vm4  ;;  %v698_v12 = vfloor.f32 %v656_v23  ;;  %v5220_v20 = vld [vmem:[%s5415_s17 + $0x80] sm:$0xff]  ;;  %v4862_v34 = vsel %vm5973_vm1, 1.0, %v5316_v57 }
 0x105   : > { %v1624_v28 = vmax.f32 %v1582_v40, 0.0  ;;  %vm1141_vm6 = vmand %vm1057_vm12, %vm1099_vm5  ;;  %v657_v26 = vmul.f32 0.055555556, %v615_v52  ;;  %vm1018_vm13 = vcmp.gt.f32.partialorder %v805_v16, 0.5  ;;  %vm1102_vm7 = vcmp.lt.f32.partialorder %v805_v16, 16.5 }
 0x106   : > { %v1647_v7 = vmax.f32 %v1605_v36, 0.0  ;;  %v1650_v3 = vmax.f32 %v5917_v42, 0.0  ;;  %v4883_v15 = vsel %vm1141_vm6, 1.0, %v5316_v57  ;;  %v740_v2 = vmul.f32 18.0, %v698_v12  ;;  %vm1060_vm2 = vmand %vm5963_vm11, %vm1018_vm13 }
 0x107   : > { %v1666_v47 = vmul.f32 %v5852_v62, %v1624_v28  ;;  %vm869_vm8 = vcmp.gt.f32.partialorder %v698_v12, 0.5  ;;  %vm911_vm10 = vcmp.lt.f32.partialorder %v698_v12, 16.5  ;;  %vm1144_vm15 = vmand %vm1060_vm2, %vm1102_vm7  ;;  %v699_v33 = vfloor.f32 %v657_v26 }
 0x108   : > { %v1450_v49 = vpop.f32.mrf.mxu0  ;;  %v1751_v56 = vld [vmem:[#allocation2 + $0x68] sm:$0xff]  ;;  %v1689_v19 = vmul.f32 %v4883_v15, %v1647_v7  ;;  %v782_v32 = vsub.f32 %v572_v59, %v740_v2  ;;  %v4886_v37 = vsel %vm1144_vm15, 1.0, %v5316_v57  ;;  %vm953_vm4 = vmand %vm869_vm8, %vm911_vm10  ;;  %v532_v40 = vadd.s32 152, %v5446_v18 }
 0x109   : > { %1709 = vst.msk [vmem:[#allocation2 + $0x70] sm:$0xff] %vm1694_vm14, %v1666_v47  ;;  %v1537_v62 = vmul.f32 %v5940_v60, %v1450_v49  ;;  %v1780_v63 = vpack.c.bf16 %v1751_v56, %v1750_v53  ;;  %v1805_v21 = vld [vmem:[#allocation2 + $0x61] sm:$0xff]  ;;  %v1692_v38 = vmul.f32 %v4886_v37, %v1650_v3  ;;  %v741_v36 = vmul.f32 18.0, %v699_v33  ;;  %v5087_v37 = vld [vmem:[%s7432_s2 + $0xa] sm:$0x3] }
 0x10a   : > { %v2174_v24 = vld [vmem:[#allocation2 + $0x62] sm:$0xff]  ;;  %1732 = vst.msk [vmem:[#allocation2 + $0x128] sm:$0xff] %vm1694_vm14, %v1689_v19  ;;  %vm995_vm5 = vcmp.gt.f32.partialorder %v782_v32, 0.5  ;;  %vm1079_vm12 = vcmp.lt.f32.partialorder %v782_v32, 16.5  ;;  %vm870_vm9 = vcmp.gt.f32.partialorder %v699_v33, 0.5  ;;  %v574_v39 = vcvt.s32.f32 %v532_v40 }
 0x10b   : > { %v1583_v6 = vadd.f32 %v5911_v43, %v1537_v62  ;;  %5018 = vmatmul.msk.bf16.gmra.mxu2 %vm1694_vm14, %v1780_v63  ;;  %1735 = vst.msk [vmem:[#allocation2 + $0x140] sm:$0xff] %vm1694_vm14, %v1692_v38  ;;  %vm1037_vm0 = vmand %vm953_vm4, %vm995_vm5  ;;  %v575_v41 = vcvt.s32.f32 %v5989_v54  ;;  %v5998_v42 = vadd.s32 168, %v5446_v18  ;;  %v783_v46 = vsub.f32 %v573_v5, %v741_v36  ;;  %v3154_v7 = vld [vmem:[#allocation2 + $0x24] sm:$0xff] }
 0x10c   : > { %vm912_vm6 = vcmp.lt.f32.partialorder %v699_v33, 16.5  ;;  %vm1121_vm11 = vmand %vm1037_vm0, %vm1079_vm12  ;;  %v616_v53 = vadd.f32 0.5, %v574_v39  ;;  %v6016_v11 = vadd.s32 176, %v5446_v18  ;;  %v6037_v40 = vadd.s32 184, %v5446_v18 }
 0x10d   : > { %v1625_v35 = vmax.f32 %v1583_v6, 0.0  ;;  %vm954_vm1 = vmand %vm870_vm9, %vm912_vm6  ;;  %v617_v56 = vadd.f32 0.5, %v575_v41  ;;  %v576_v51 = vcvt.s32.f32 %v5998_v42  ;;  %vm996_vm13 = vcmp.gt.f32.partialorder %v783_v46, 0.5 }
 0x10e   : > { %v4863_v45 = vsel %vm1121_vm11, 1.0, %v5316_v57  ;;  %v658_v59 = vmul.f32 0.055555556, %v616_v53  ;;  %vm6009_vm7 = vmand %vm954_vm1, %vm996_vm13  ;;  %vm1080_vm8 = vcmp.lt.f32.partialorder %v783_v46, 16.5  ;;  %v577_v26 = vcvt.s32.f32 %v6016_v11 }
 0x10f   : > { %v1667_v10 = vmul.f32 %v5870_v55, %v1625_v35  ;;  %v659_v62 = vmul.f32 0.055555556, %v617_v56  ;;  %v618_v5 = vadd.f32 0.5, %v576_v51  ;;  %vm1122_vm15 = vmand %vm6009_vm7, %vm1080_vm8  ;;  %vm7498_vm11 = vcmask 1041408  }
 0x110   : > { %v1453_v31 = vpop.f32.mrf.mxu0  ;;  %v1806_v14 = vld [vmem:[#allocation2 + $0x69] sm:$0xff]  ;;  %v700_v0 = vfloor.f32 %v658_v59  ;;  %v4864_v30 = vsel %vm1122_vm15, 1.0, %v5316_v57 }
 0x111   : > { %v2175_v22 = vld [vmem:[#allocation2 + $0x6a] sm:$0xff]  ;;  %1710 = vst.msk [vmem:[#allocation2 + $0x78] sm:$0xff] %vm1694_vm14, %v1667_v10  ;;  %v1538_v55 = vmul.f32 %v5940_v60, %v1453_v31  ;;  %v1835_v27 = vpack.c.bf16 %v1806_v14, %v1805_v21  ;;  %v701_v4 = vfloor.f32 %v659_v62  ;;  %v3190_v10 = vpack.c.bf16 %v3155_v1, %v3154_v7 }
 0x112   : > { %v2204_v29 = vpack.c.bf16 %v2175_v22, %v2174_v24  ;;  %v1752_v9 = vld [vmem:[#allocation2 + $0x70] sm:$0xff]  ;;  %v742_v15 = vmul.f32 18.0, %v700_v0  ;;  %vm871_vm2 = vcmp.gt.f32.partialorder %v700_v0, 0.5  ;;  %vm913_vm10 = vcmp.lt.f32.partialorder %v700_v0, 16.5 }
 0x113   : > { %v1584_v25 = vadd.f32 %v5911_v43, %v1538_v55  ;;  %4988 = vmatmul.msk.bf16.gmra.mxu0 %vm7495_vm3, %v5220_v20  ;;  %5000 = vmatmul.msk.bf16.gmra.mxu1 %vm1694_vm14, %v1835_v27  ;;  %v660_v20 = vmul.f32 0.055555556, %v618_v5  ;;  %vm955_vm3 = vmand %vm871_vm2, %vm913_vm10  ;;  %v743_v24 = vmul.f32 18.0, %v701_v4  ;;  %v619_v55 = vadd.f32 0.5, %v577_v26 }
 0x114   : > { %5037 = vmatmul.msk.bf16.gmra.mxu3 %vm1694_vm14, %v2204_v29  ;;  %v784_v19 = vsub.f32 %v574_v39, %v742_v15  ;;  %vm872_vm0 = vcmp.gt.f32.partialorder %v701_v4, 0.5  ;;  %vm914_vm9 = vcmp.lt.f32.partialorder %v701_v4, 16.5  ;;  %v6058_v5 = vadd.s32 192, %v5446_v18 }
 0x115   : > { %v1626_v28 = vmax.f32 %v1584_v25, 0.0  ;;  %v702_v14 = vfloor.f32 %v660_v20  ;;  %v785_v2 = vsub.f32 %v575_v41, %v743_v24  ;;  %vm956_vm1 = vmand %vm872_vm0, %vm914_vm9  ;;  %v661_v36 = vmul.f32 0.055555556, %v619_v55 }
 0x116   : > { %vm997_vm4 = vcmp.gt.f32.partialorder %v784_v19, 0.5  ;;  %vm1081_vm12 = vcmp.lt.f32.partialorder %v784_v19, 16.5 }
 0x117   : > { %v1668_v44 = vmul.f32 %v4862_v34, %v1626_v28  ;;  %vm1039_vm5 = vmand %vm955_vm3, %vm997_vm4  ;;  %v744_v54 = vmul.f32 18.0, %v702_v14  ;;  %v3017_v34 = vsel %vm7498_vm11, %v5087_v37, 0  ;;  %vm998_vm13 = vcmp.gt.f32.partialorder %v785_v2, 0.5 }
 0x118   : > { %v1455_v47 = vpop.f32.mrf.mxu0  ;;  %v1753_v48 = vld [vmem:[#allocation2 + $0x78] sm:$0xff]  ;;  %vm1123_vm6 = vmand %vm1039_vm5, %vm1081_vm12  ;;  %3026 = vmatpush.bf16.msrb.mxu3 %v3017_v34  ;;  %v578_v28 = vcvt.s32.f32 %v6037_v40  ;;  %vm1082_vm8 = vcmp.lt.f32.partialorder %v785_v2, 16.5  ;;  %v703_v53 = vfloor.f32 %v661_v36  ;;  %vm873_vm2 = vcmp.gt.f32.partialorder %v702_v14, 0.5  ;;  %v3158_v36 = vld [vmem:[#allocation2 + $0x44] sm:$0xff] }
 0x119   : > { %1711 = vst.msk [vmem:[#allocation2 + $0x80] sm:$0xff] %vm1694_vm14, %v1668_v44  ;;  %v1539_v49 = vmul.f32 %v5940_v60, %v1455_v47  ;;  %v1781_v50 = vpack.c.bf16 %v1753_v48, %v1752_v9  ;;  %v1807_v8 = vld [vmem:[#allocation2 + $0x71] sm:$0xff]  ;;  %v4865_v39 = vsel %vm1123_vm6, 1.0, %v5316_v57  ;;  %v3157_v44 = vld [vmem:[#allocation2 + $0x3c] sm:$0xff]  ;;  %vm6044_vm7 = vmand %vm956_vm1, %vm998_vm13  ;;  %vm915_vm10 = vcmp.lt.f32.partialorder %v702_v14, 16.5 }
 0x11a   : > { %v2176_v3 = vld [vmem:[#allocation2 + $0x72] sm:$0xff]  ;;  %v620_v56 = vadd.f32 0.5, %v578_v28  ;;  %vm1124_vm15 = vmand %vm6044_vm7, %vm1082_vm8  ;;  %vm874_vm0 = vcmp.gt.f32.partialorder %v703_v53, 0.5  ;;  %vm916_vm9 = vcmp.lt.f32.partialorder %v703_v53, 16.5  ;;  %v6081_v14 = vadd.s32 200, %v5446_v18 }
 0x11b   : > { %v1585_v58 = vadd.f32 %v5911_v43, %v1539_v49  ;;  %5019 = vmatmul.msk.bf16.gmra.mxu2 %vm1694_vm14, %v1781_v50  ;;  %v3156_v49 = vld [vmem:[#allocation2 + $0x34] sm:$0xff]  ;;  %v786_v50 = vsub.f32 %v576_v51, %v744_v54  ;;  %vm957_vm3 = vmand %vm873_vm2, %vm915_vm10  ;;  %v4866_v4 = vsel %vm1124_vm15, 1.0, %v5316_v57 }
 0x11c   : > { %v3191_v61 = vpack.c.bf16 %v3157_v44, %v3156_v49  ;;  %v662_v7 = vmul.f32 0.055555556, %v620_v56  ;;  %vm958_vm11 = vmand %vm874_vm0, %vm916_vm9 }
 0x11d   : > { %v1627_v63 = vmax.f32 %v1585_v58, 0.0  ;;  %vm999_vm4 = vcmp.gt.f32.partialorder %v786_v50, 0.5  ;;  %vm1083_vm12 = vcmp.lt.f32.partialorder %v786_v50, 16.5 }
 0x11e   : > { %vm6066_vm5 = vmand %vm957_vm3, %vm999_vm4 }
 0x11f   : > { %v1669_v6 = vmul.f32 %v4863_v45, %v1627_v63  ;;  %vm1125_vm6 = vmand %vm6066_vm5, %vm1083_vm12 }
 0x120   : > { %v1458_v23 = vpop.f32.mrf.mxu0  ;;  %v1808_v35 = vld [vmem:[#allocation2 + $0x79] sm:$0xff] }
 0x121   : > { %v2177_v52 = vld [vmem:[#allocation2 + $0x7a] sm:$0xff]  ;;  %1712 = vst.msk [vmem:[#allocation2 + $0x88] sm:$0xff] %vm1694_vm14, %v1669_v6  ;;  %v1540_v16 = vmul.f32 %v5940_v60, %v1458_v23  ;;  %v1836_v17 = vpack.c.bf16 %v1808_v35, %v1807_v8  ;;  %v745_v8 = vmul.f32 18.0, %v703_v53  ;;  %v579_v23 = vcvt.s32.f32 %v6058_v5 }
 0x122   : > { %v2205_v12 = vpack.c.bf16 %v2177_v52, %v2176_v3  ;;  %v1754_v29 = vld [vmem:[#allocation2 + $0x80] sm:$0xff] }
 0x123   : > { %v1586_v21 = vadd.f32 %v5911_v43, %v1540_v16  ;;  %5001 = vmatmul.msk.bf16.gmra.mxu1 %vm1694_vm14, %v1836_v17  ;;  %5107 = vmatmul.msk.bf16.vlgmr.msrb.gmra.mxu0 %vm1694_vm14, %v3190_v10  ;;  %v787_v17 = vsub.f32 %v577_v26, %v745_v8  ;;  %v621_v10 = vadd.f32 0.5, %v579_v23 }
 0x124   : > { %5038 = vmatmul.msk.bf16.gmra.mxu3 %vm1694_vm14, %v2205_v12  ;;  %v704_v12 = vfloor.f32 %v662_v7 }
 0x125   : > { %v1628_v31 = vmax.f32 %v1586_v21, 0.0  ;;  %vm1000_vm1 = vcmp.gt.f32.partialorder %v787_v17, 0.5  ;;  %v663_v55 = vmul.f32 0.055555556, %v621_v10  ;;  %vm1084_vm7 = vcmp.lt.f32.partialorder %v787_v17, 16.5 }
 0x126   : > { %v746_v2 = vmul.f32 18.0, %v704_v12  ;;  %vm6087_vm13 = vmand %vm958_vm11, %vm1000_vm1  ;;  %vm875_vm8 = vcmp.gt.f32.partialorder %v704_v12, 0.5  ;;  %vm917_vm2 = vcmp.lt.f32.partialorder %v704_v12, 16.5  ;;  %v6126_v10 = vadd.s32 216, %v5446_v18 }
 0x127   : > { %v1670_v22 = vmul.f32 %v4864_v30, %v1628_v31  ;;  %vm1126_vm10 = vmand %vm6087_vm13, %vm1084_vm7 }
 0x128   : > { %v1460_v27 = vpop.f32.mrf.mxu0  ;;  %v1755_v32 = vld [vmem:[#allocation2 + $0x88] sm:$0xff]  ;;  %vm959_vm15 = vmand %vm875_vm8, %vm917_vm2 }
 0x129   : > { %1713 = vst.msk [vmem:[#allocation2 + $0x90] sm:$0xff] %vm1694_vm14, %v1670_v22  ;;  %v1541_v33 = vmul.f32 %v5940_v60, %v1460_v27  ;;  %v1782_v25 = vpack.c.bf16 %v1755_v32, %v1754_v29  ;;  %v1809_v48 = vld [vmem:[#allocation2 + $0x81] sm:$0xff]  ;;  %v4867_v27 = vsel %vm1125_vm6, 1.0, %v5316_v57  ;;  %v580_v29 = vcvt.s32.f32 %v6081_v14 }
 0x12a   : > { %v2178_v62 = vld [vmem:[#allocation2 + $0x82] sm:$0xff] }
 0x12b   : > { %v1587_v38 = vadd.f32 %v5911_v43, %v1541_v33  ;;  %5020 = vmatmul.msk.bf16.gmra.mxu2 %vm1694_vm14, %v1782_v25  ;;  %v3159_v33 = vld [vmem:[#allocation2 + $0x4c] sm:$0xff]  ;;  %v622_v44 = vadd.f32 0.5, %v580_v29 }
 0x12c   : > { %v3192_v53 = vpack.c.bf16 %v3159_v33, %v3158_v36  ;;  %v3160_v33 = vld [vmem:[#allocation2 + $0x54] sm:$0xff] }
 0x12d   : > { %v1629_v41 = vmax.f32 %v1587_v38, 0.0 }
 0x12e   : > { %v2072_v46 = vpop.f32.mrf.mxu2 }
 0x12f   : > { %v1671_v9 = vmul.f32 %v4865_v39, %v1629_v41  ;;  %v788_v39 = vsub.f32 %v578_v28, %v746_v2  ;;  %v705_v41 = vfloor.f32 %v663_v55  ;;  %v3162_v2 = vld [vmem:[#allocation2 + $0x64] sm:$0xff] }
 0x130   : > { %v1463_v58 = vpop.f32.mrf.mxu0  ;;  %v1916_v45 = vpop.f32.mrf.mxu1  ;;  %v1810_v59 = vld [vmem:[#allocation2 + $0x89] sm:$0xff] }
 0x131   : > { %v2179_v63 = vld [vmem:[#allocation2 + $0x8a] sm:$0xff]  ;;  %1714 = vst.msk [vmem:[#allocation2 + $0x98] sm:$0xff] %vm1694_vm14, %v1671_v9  ;;  %v1542_v42 = vmul.f32 %v5940_v60, %v1463_v58  ;;  %v2073_v51 = vadd.f32 %v2072_v46, %v1916_v45  ;;  %v1837_v1 = vpack.c.bf16 %v1810_v59, %v1809_v48  ;;  %v6103_v45 = vadd.s32 208, %v5446_v18 }
 0x132   : > { %v2206_v0 = vpack.c.bf16 %v2179_v63, %v2178_v62  ;;  %v1756_v24 = vld [vmem:[#allocation2 + $0x90] sm:$0xff]  ;;  %vm1001_vm3 = vcmp.gt.f32.partialorder %v788_v39, 0.5  ;;  %v747_v62 = vmul.f32 18.0, %v705_v41  ;;  %v664_v63 = vmul.f32 0.055555556, %v622_v44 }
 0x133   : > { %v1588_v6 = vadd.f32 %v5911_v43, %v1542_v42  ;;  %5002 = vmatmul.msk.bf16.gmra.mxu1 %vm1694_vm14, %v1837_v1  ;;  %5108 = vmatmul.msk.bf16.gmra.mxu0 %vm1694_vm14, %v3191_v61  ;;  %v4868_v61 = vsel %vm1126_vm10, 1.0, %v5316_v57  ;;  %v581_v42 = vcvt.s32.f32 %v6103_v45  ;;  %vm6111_vm4 = vmand %vm959_vm15, %vm1001_vm3  ;;  %vm1085_vm5 = vcmp.lt.f32.partialorder %v788_v39, 16.5 }
 0x134   : > { %5039 = vmatmul.msk.bf16.gmra.mxu3 %vm1694_vm14, %v2206_v0  ;;  %v789_v7 = vsub.f32 %v579_v23, %v747_v62  ;;  %vm876_vm12 = vcmp.gt.f32.partialorder %v705_v41, 0.5  ;;  %vm918_vm0 = vcmp.lt.f32.partialorder %v705_v41, 16.5  ;;  %vm1127_vm9 = vmand %vm6111_vm4, %vm1085_vm5 }
 0x135   : > { %v1630_v35 = vmax.f32 %v1588_v6, 0.0  ;;  %vm960_vm6 = vmand %vm876_vm12, %vm918_vm0 }
 0x136   : > { %v2074_v3 = vpop.f32.mrf.mxu2  ;;  %vm1002_vm11 = vcmp.gt.f32.partialorder %v789_v7, 0.5  ;;  %vm1086_vm13 = vcmp.lt.f32.partialorder %v789_v7, 16.5 }
 0x137   : > { %v1672_v15 = vmul.f32 %v4866_v4, %v1630_v35  ;;  %v2284_v16 = vpop.f32.mrf.mxu3  ;;  %v706_v4 = vfloor.f32 %v664_v63  ;;  %v623_v35 = vadd.f32 0.5, %v581_v42  ;;  %vm6132_vm1 = vmand %vm960_vm6, %vm1002_vm11 }
 0x138   : > { %v6074_v19 = vadd.f32 %v2284_v16, %v2073_v51  ;;  %v1465_v20 = vpop.f32.mrf.mxu0  ;;  %v1918_v21 = vpop.f32.mrf.mxu1  ;;  %v1757_v30 = vld [vmem:[#allocation2 + $0x98] sm:$0xff]  ;;  %vm1128_vm2 = vmand %vm6132_vm1, %vm1086_vm13 }
 0x139   : > { %1715 = vst.msk [vmem:[#allocation2 + $0xa0] sm:$0xff] %vm1694_vm14, %v1672_v15  ;;  %v1543_v11 = vmul.f32 %v5940_v60, %v1465_v20  ;;  %v2075_v26 = vadd.f32 %v2074_v3, %v1918_v21  ;;  %v1783_v31 = vpack.c.bf16 %v1757_v30, %v1756_v24  ;;  %v1811_v38 = vld [vmem:[#allocation2 + $0x91] sm:$0xff]  ;;  %v748_v21 = vmul.f32 18.0, %v706_v4 }
 0x13a   : > { %v2180_v49 = vld [vmem:[#allocation2 + $0x92] sm:$0xff]  ;;  %v665_v24 = vmul.f32 0.055555556, %v623_v35  ;;  %v4869_v30 = vsel %vm1127_vm9, 1.0, %v5316_v57  ;;  %vm877_vm7 = vcmp.gt.f32.partialorder %v706_v4, 0.5  ;;  %vm919_vm8 = vcmp.lt.f32.partialorder %v706_v4, 16.5 }
 0x13b   : > { %v1589_v22 = vadd.f32 %v5911_v43, %v1543_v11  ;;  %5021 = vmatmul.msk.bf16.gmra.mxu2 %vm1694_vm14, %v1783_v31  ;;  %v582_v11 = vcvt.s32.f32 %v6126_v10  ;;  %v3161_v31 = vld [vmem:[#allocation2 + $0x5c] sm:$0xff]  ;;  %vm961_vm10 = vmand %vm877_vm7, %vm919_vm8 }
 0x13c   : > { %v707_v37 = vfloor.f32 %v665_v24 }
 0x13d   : > { %v1631_v32 = vmax.f32 %v1589_v22, 0.0 }
 0x13e   : > { %v2077_v25 = vpop.f32.mrf.mxu2  ;;  %vm878_vm5 = vcmp.gt.f32.partialorder %v707_v37, 0.5  ;;  %vm920_vm12 = vcmp.lt.f32.partialorder %v707_v37, 16.5 }
 0x13f   : > { %v1673_v54 = vmul.f32 %v4867_v27, %v1631_v32  ;;  %v2286_v34 = vpop.f32.mrf.mxu3  ;;  %vm962_vm9 = vmand %vm878_vm5, %vm920_vm12 }
 0x140   : > { %v6095_v46 = vadd.f32 %v2286_v34, %v2075_v26  ;;  %v1468_v47 = vpop.f32.mrf.mxu0  ;;  %v1921_v9 = vpop.f32.mrf.mxu1  ;;  %v1812_v48 = vld [vmem:[#allocation2 + $0x99] sm:$0xff] }
 0x141   : > { %v2181_v50 = vld [vmem:[#allocation2 + $0x9a] sm:$0xff]  ;;  %1716 = vst.msk [vmem:[#allocation2 + $0xa8] sm:$0xff] %vm1694_vm14, %v1673_v54  ;;  %v1544_v40 = vmul.f32 %v5940_v60, %v1468_v47  ;;  %v2078_v28 = vadd.f32 %v2077_v25, %v1921_v9  ;;  %v1838_v56 = vpack.c.bf16 %v1812_v48, %v1811_v38  ;;  %v790_v25 = vsub.f32 %v580_v29, %v748_v21  ;;  %v3163_v21 = vld [vmem:[#allocation2 + $0x6c] sm:$0xff] }
 0x142   : > { %v2207_v58 = vpack.c.bf16 %v2181_v50, %v2180_v49  ;;  %v1758_v16 = vld [vmem:[#allocation2 + $0xa0] sm:$0xff]  ;;  %v624_v54 = vadd.f32 0.5, %v582_v11  ;;  %v3193_v47 = vpack.c.bf16 %v3161_v31, %v3160_v33  ;;  %v6148_v49 = vadd.s32 224, %v5446_v18 }
 0x143   : > { %v1590_v59 = vadd.f32 %v5911_v43, %v1544_v40  ;;  %5003 = vmatmul.msk.bf16.gmra.mxu1 %vm1694_vm14, %v1838_v56  ;;  %5109 = vmatmul.msk.bf16.gmra.mxu0 %vm1694_vm14, %v3192_v53  ;;  %vm1003_vm15 = vcmp.gt.f32.partialorder %v790_v25, 0.5  ;;  %v749_v53 = vmul.f32 18.0, %v707_v37  ;;  %vm1087_vm4 = vcmp.lt.f32.partialorder %v790_v25, 16.5 }
 0x144   : > { %5040 = vmatmul.msk.bf16.gmra.mxu3 %vm1694_vm14, %v2207_v58  ;;  %v666_v40 = vmul.f32 0.055555556, %v624_v54  ;;  %v583_v56 = vcvt.s32.f32 %v6148_v49  ;;  %vm6156_vm3 = vmand %vm961_vm10, %vm1003_vm15 }
 0x145   : > { %v1632_v51 = vmax.f32 %v1590_v59, 0.0  ;;  %vm1129_vm0 = vmand %vm6156_vm3, %vm1087_vm4 }
 0x146   : > { %v2079_v1 = vpop.f32.mrf.mxu2  ;;  %v625_v0 = vadd.f32 0.5, %v583_v56 }
 0x147   : > { %v1674_v6 = vmul.f32 %v4868_v61, %v1632_v51  ;;  %v2289_v8 = vpop.f32.mrf.mxu3  ;;  %v791_v51 = vsub.f32 %v581_v42, %v749_v53 }
 0x148   : > { %v6119_v3 = vadd.f32 %v2289_v8, %v2078_v28  ;;  %v1470_v52 = vpop.f32.mrf.mxu0  ;;  %v1923_v15 = vpop.f32.mrf.mxu1  ;;  %v1759_v17 = vld [vmem:[#allocation2 + $0xa8] sm:$0xff]  ;;  %v4870_v28 = vsel %vm1128_vm2, 1.0, %v5316_v57 }
 0x149   : > { %1717 = vst.msk [vmem:[#allocation2 + $0xb0] sm:$0xff] %vm1694_vm14, %v1674_v6  ;;  %v1545_v5 = vmul.f32 %v5940_v60, %v1470_v52  ;;  %v2080_v23 = vadd.f32 %v2079_v1, %v1923_v15  ;;  %v1784_v12 = vpack.c.bf16 %v1759_v17, %v1758_v16  ;;  %v1813_v32 = vld [vmem:[#allocation2 + $0xa1] sm:$0xff]  ;;  %v708_v1 = vfloor.f32 %v666_v40 }
 0x14a   : > { %v2182_v41 = vld [vmem:[#allocation2 + $0xa2] sm:$0xff]  ;;  %v6171_v15 = vadd.s32 232, %v5446_v18  ;;  %vm1004_vm6 = vcmp.gt.f32.partialorder %v791_v51, 0.5  ;;  %vm1088_vm1 = vcmp.lt.f32.partialorder %v791_v51, 16.5 }
 0x14b   : > { %v1591_v20 = vadd.f32 %v5911_v43, %v1545_v5  ;;  %5022 = vmatmul.msk.bf16.gmra.mxu2 %vm1694_vm14, %v1784_v12  ;;  %v750_v17 = vmul.f32 18.0, %v708_v1  ;;  %v667_v5 = vmul.f32 0.055555556, %v625_v0  ;;  %vm6177_vm11 = vmand %vm962_vm9, %vm1004_vm6  ;;  %vm879_vm13 = vcmp.gt.f32.partialorder %v708_v1, 0.5 }
 0x14c   : > { %v584_v12 = vcvt.s32.f32 %v6171_v15  ;;  %vm921_vm7 = vcmp.lt.f32.partialorder %v708_v1, 16.5  ;;  %vm1130_vm8 = vmand %vm6177_vm11, %vm1088_vm1 }
 0x14d   : > { %v1633_v26 = vmax.f32 %v1591_v20, 0.0  ;;  %vm963_vm2 = vmand %vm879_vm13, %vm921_vm7 }
 0x14e   : > { %v2082_v22 = vpop.f32.mrf.mxu2 }
 0x14f   : > { %v1675_v55 = vmul.f32 %v4869_v30, %v1633_v26  ;;  %v2291_v27 = vpop.f32.mrf.mxu3 }
 0x150   : > { %v6140_v34 = vadd.f32 %v2291_v27, %v2080_v23  ;;  %v1473_v38 = vpop.f32.mrf.mxu0  ;;  %v1926_v36 = vpop.f32.mrf.mxu1  ;;  %v1814_v39 = vld [vmem:[#allocation2 + $0xa9] sm:$0xff]  ;;  %v4871_v23 = vsel %vm1129_vm0, 1.0, %v5316_v57  ;;  %v709_v27 = vfloor.f32 %v667_v5 }
 0x151   : > { %v2183_v44 = vld [vmem:[#allocation2 + $0xaa] sm:$0xff]  ;;  %1718 = vst.msk [vmem:[#allocation2 + $0xb8] sm:$0xff] %vm1694_vm14, %v1675_v55  ;;  %v1546_v14 = vmul.f32 %v5940_v60, %v1473_v38  ;;  %v2083_v29 = vadd.f32 %v2082_v22, %v1926_v36  ;;  %v1839_v9 = vpack.c.bf16 %v1814_v39, %v1813_v32  ;;  %v792_v55 = vsub.f32 %v582_v11, %v750_v17 }
 0x152   : > { %v2208_v48 = vpack.c.bf16 %v2183_v44, %v2182_v41  ;;  %v1760_v4 = vld [vmem:[#allocation2 + $0xb0] sm:$0xff]  ;;  %v626_v32 = vadd.f32 0.5, %v584_v12  ;;  %v6187_v39 = vpack.c.bf16 %v3163_v21, %v3162_v2  ;;  %vm880_vm4 = vcmp.gt.f32.partialorder %v709_v27, 0.5 }
 0x153   : > { %v1592_v50 = vadd.f32 %v5911_v43, %v1546_v14  ;;  %5004 = vmatmul.msk.bf16.gmra.mxu1 %vm1694_vm14, %v1839_v9  ;;  %5110 = vmatmul.msk.bf16.gmra.mxu0 %vm1694_vm14, %v3193_v47  ;;  %v6195_v47 = vadd.s32 240, %v5446_v18  ;;  %vm1005_vm10 = vcmp.gt.f32.partialorder %v792_v55, 0.5  ;;  %vm1089_vm3 = vcmp.lt.f32.partialorder %v792_v55, 16.5 }
 0x154   : > { %5041 = vmatmul.msk.bf16.gmra.mxu3 %vm1694_vm14, %v2208_v48  ;;  %v668_v9 = vmul.f32 0.055555556, %v626_v32  ;;  %v4872_v48 = vsel %vm1130_vm8, 1.0, %v5316_v57  ;;  %vm6204_vm15 = vmand %vm963_vm2, %vm1005_vm10  ;;  %vm922_vm5 = vcmp.lt.f32.partialorder %v709_v27, 16.5 }
 0x155   : > { %v1634_v58 = vmax.f32 %v1592_v50, 0.0  ;;  %v585_v50 = vcvt.s32.f32 %v6195_v47  ;;  %vm1131_vm12 = vmand %vm6204_vm15, %vm1089_vm3 }
 0x156   : > { %v2084_v59 = vpop.f32.mrf.mxu2  ;;  %vm964_vm0 = vmand %vm880_vm4, %vm922_vm5 }
 0x157   : > { %v1676_v63 = vmul.f32 %v4870_v28, %v1634_v58  ;;  %v2294_v61 = vpop.f32.mrf.mxu3 }
 0x158   : > { %v6164_v6 = vadd.f32 %v2294_v61, %v2083_v29  ;;  %v1475_v8 = vpop.f32.mrf.mxu0  ;;  %v1928_v7 = vpop.f32.mrf.mxu1  ;;  %v1761_v35 = vld [vmem:[#allocation2 + $0xb8] sm:$0xff]  ;;  %v751_v29 = vmul.f32 18.0, %v709_v27  ;;  %v627_v61 = vadd.f32 0.5, %v585_v50 }
 0x159   : > { %1719 = vst.msk [vmem:[#allocation2 + $0xc0] sm:$0xff] %vm1694_vm14, %v1676_v63  ;;  %v1547_v45 = vmul.f32 %v5940_v60, %v1475_v8  ;;  %v2085_v42 = vadd.f32 %v2084_v59, %v1928_v7  ;;  %v1785_v52 = vpack.c.bf16 %v1761_v35, %v1760_v4  ;;  %v1815_v22 = vld [vmem:[#allocation2 + $0xb1] sm:$0xff]  ;;  %v710_v63 = vfloor.f32 %v668_v9 }
 0x15a   : > { %v2184_v38 = vld [vmem:[#allocation2 + $0xb2] sm:$0xff]  ;;  %v793_v62 = vsub.f32 %v583_v56, %v751_v29  ;;  %v6219_v35 = vadd.s32 248, %v5446_v18 }
 0x15b   : > { %v1593_v16 = vadd.f32 %v5911_v43, %v1547_v45  ;;  %5023 = vmatmul.msk.bf16.gmra.mxu2 %vm1694_vm14, %v1785_v52  ;;  %v669_v52 = vmul.f32 0.055555556, %v627_v61  ;;  %vm881_vm1 = vcmp.gt.f32.partialorder %v710_v63, 0.5  ;;  %vm923_vm13 = vcmp.lt.f32.partialorder %v710_v63, 16.5 }
 0x15c   : > { %vm1006_vm9 = vcmp.gt.f32.partialorder %v793_v62, 0.5  ;;  %v586_v17 = vcvt.s32.f32 %v6219_v35  ;;  %vm1090_vm11 = vcmp.lt.f32.partialorder %v793_v62, 16.5  ;;  %vm965_vm8 = vmand %vm881_vm1, %vm923_vm13  ;;  %v6297_v35 = vld [vmem:[%s7435_s5] ss:$0 sm:$0xff] }
 0x15d   : > { %v1635_v20 = vmax.f32 %v1593_v16, 0.0  ;;  %v4873_v16 = vsel %vm1131_vm12, 1.0, %v5316_v57  ;;  %vm6225_vm6 = vmand %vm964_vm0, %vm1006_vm9  ;;  %v711_v2 = vfloor.f32 %v669_v52 }
 0x15e   : > { %v2087_v24 = vpop.f32.mrf.mxu2  ;;  %v628_v55 = vadd.f32 0.5, %v586_v17  ;;  %vm1132_vm7 = vmand %vm6225_vm6, %vm1090_vm11 }
 0x15f   : > { %v1677_v26 = vmul.f32 %v4871_v23, %v1635_v20  ;;  %v2296_v31 = vpop.f32.mrf.mxu3  ;;  %v3165_v23 = vld [vmem:[#allocation2 + $0x7c] sm:$0xff]  ;;  %v4874_v9 = vsel %vm1132_vm7, 1.0, %v5316_v57  ;;  %vm882_vm3 = vcmp.gt.f32.partialorder %v711_v2, 0.5  ;;  %vm924_vm4 = vcmp.lt.f32.partialorder %v711_v2, 16.5 }
 0x160   : > { %v6185_v33 = vadd.f32 %v2296_v31, %v2085_v42  ;;  %v1478_v25 = vpop.f32.mrf.mxu0  ;;  %v1931_v37 = vpop.f32.mrf.mxu1  ;;  %v1816_v54 = vld [vmem:[#allocation2 + $0xb9] sm:$0xff]  ;;  %v752_v42 = vmul.f32 18.0, %v710_v63  ;;  %v670_v29 = vmul.f32 0.055555556, %v628_v55  ;;  %vm966_vm12 = vmand %vm882_vm3, %vm924_vm4 }
 0x161   : > { %v2185_v36 = vld [vmem:[#allocation2 + $0xba] sm:$0xff]  ;;  %1720 = vst.msk [vmem:[#allocation2 + $0xc8] sm:$0xff] %vm1694_vm14, %v1677_v26  ;;  %v1548_v10 = vmul.f32 %v5940_v60, %v1478_v25  ;;  %v2088_v11 = vadd.f32 %v2087_v24, %v1931_v37  ;;  %v1840_v41 = vpack.c.bf16 %v1816_v54, %v1815_v22 }
 0x162   : > { %v2209_v44 = vpack.c.bf16 %v2185_v36, %v2184_v38  ;;  %v1762_v8 = vld [vmem:[#allocation2 + $0xc0] sm:$0xff]  ;;  %v3164_v31 = vld [vmem:[#allocation2 + $0x74] sm:$0xff]  ;;  %v794_v22 = vsub.f32 %v584_v12, %v752_v42  ;;  %v712_v62 = vfloor.f32 %v670_v29 }
 0x163   : > { %v1594_v14 = vadd.f32 %v5911_v43, %v1548_v10  ;;  %5005 = vmatmul.msk.bf16.gmra.mxu1 %vm1694_vm14, %v1840_v41  ;;  %5111 = vmatmul.msk.bf16.gmra.mxu0 %vm1694_vm14, %v6187_v39  ;;  %v6235_v36 = vpack.c.bf16 %v3165_v23, %v3164_v31  ;;  %v6243_v41 = vadd.s32 256, %v5446_v18 }
 0x164   : > { %5042 = vmatmul.msk.bf16.gmra.mxu3 %vm1694_vm14, %v2209_v44  ;;  %vm1007_vm2 = vcmp.gt.f32.partialorder %v794_v22, 0.5  ;;  %vm1091_vm15 = vcmp.lt.f32.partialorder %v794_v22, 16.5  ;;  %v754_v42 = vmul.f32 18.0, %v712_v62  ;;  %vm883_vm11 = vcmp.gt.f32.partialorder %v712_v62, 0.5 }
 0x165   : > { %v1636_v53 = vmax.f32 %v1594_v14, 0.0  ;;  %v753_v14 = vmul.f32 18.0, %v711_v2  ;;  %vm6252_vm10 = vmand %vm965_vm8, %vm1007_vm2  ;;  %vm925_vm1 = vcmp.lt.f32.partialorder %v712_v62, 16.5 }
 0x166   : > { %v2089_v40 = vpop.f32.mrf.mxu2  ;;  %vm1133_vm5 = vmand %vm6252_vm10, %vm1091_vm15  ;;  %v796_v31 = vsub.f32 %v586_v17, %v754_v42  ;;  %v3169_v42 = vld [vmem:[#allocation2 + $0x9c] sm:$0xff] }
 0x167   : > { %v1678_v58 = vmul.f32 %v4872_v48, %v1636_v53  ;;  %v2299_v59 = vpop.f32.mrf.mxu3  ;;  %v587_v48 = vcvt.s32.f32 %v6243_v41  ;;  %vm967_vm7 = vmand %vm883_vm11, %vm925_vm1 }
 0x168   : > { %v6212_v51 = vadd.f32 %v2299_v59, %v2088_v11  ;;  %v1480_v1 = vpop.f32.mrf.mxu0  ;;  %v1933_v0 = vpop.f32.mrf.mxu1  ;;  %v1763_v7 = vld [vmem:[#allocation2 + $0xc8] sm:$0xff]  ;;  %v795_v59 = vsub.f32 %v585_v50, %v753_v14  ;;  %vm1009_vm8 = vcmp.gt.f32.partialorder %v796_v31, 0.5  ;;  %vm1093_vm10 = vcmp.lt.f32.partialorder %v796_v31, 16.5 }
 0x169   : > { %1721 = vst.msk [vmem:[#allocation2 + $0xd0] sm:$0xff] %vm1694_vm14, %v1678_v58  ;;  %v1549_v49 = vmul.f32 %v5940_v60, %v1480_v1  ;;  %v2090_v56 = vadd.f32 %v2089_v40, %v1933_v0  ;;  %v1786_v4 = vpack.c.bf16 %v1763_v7, %v1762_v8  ;;  %v1817_v26 = vld [vmem:[#allocation2 + $0xc1] sm:$0xff]  ;;  %v629_v63 = vadd.f32 0.5, %v587_v48  ;;  %vm1051_vm2 = vmand %vm967_vm7, %vm1009_vm8 }
 0x16a   : > { %v2186_v54 = vld [vmem:[#allocation2 + $0xc2] sm:$0xff]  ;;  %vm1008_vm0 = vcmp.gt.f32.partialorder %v795_v59, 0.5  ;;  %vm1092_vm6 = vcmp.lt.f32.partialorder %v795_v59, 16.5  ;;  %vm1135_vm4 = vmand %vm1051_vm2, %vm1093_vm10 }
 0x16b   : > { %v1595_v45 = vadd.f32 %v5911_v43, %v1549_v49  ;;  %5024 = vmatmul.msk.bf16.gmra.mxu2 %vm1694_vm14, %v1786_v4  ;;  %v6272_v4 = vld [vmem:[%s7436_s6] ss:$0 sm:$0xff]  ;;  %v671_v52 = vmul.f32 0.055555556, %v629_v63  ;;  %vm6278_vm9 = vmand %vm966_vm12, %vm1008_vm0 }
 0x16c   : > { %vm1134_vm13 = vmand %vm6278_vm9, %vm1092_vm6 }
 0x16d   : > { %v1637_v5 = vmax.f32 %v1595_v45, 0.0  ;;  %v713_v22 = vfloor.f32 %v671_v52 }
 0x16e   : > { %v2092_v20 = vpop.f32.mrf.mxu2 }
 0x16f   : > { %v1679_v24 = vmul.f32 %v4873_v16, %v1637_v5  ;;  %v2301_v30 = vpop.f32.mrf.mxu3  ;;  %v755_v14 = vmul.f32 18.0, %v713_v22  ;;  %vm884_vm15 = vcmp.gt.f32.partialorder %v713_v22, 0.5  ;;  %vm926_vm3 = vcmp.lt.f32.partialorder %v713_v22, 16.5 }
 0x170   : > { %v6233_v27 = vadd.f32 %v2301_v30, %v2090_v56  ;;  %v1483_v32 = vpop.f32.mrf.mxu0  ;;  %v1936_v25 = vpop.f32.mrf.mxu1  ;;  %v1818_v37 = vld [vmem:[#allocation2 + $0xc9] sm:$0xff]  ;;  %v6267_v56 = vadd.s32 264, %v5446_v18 }
 0x171   : > { %v2187_v38 = vld [vmem:[#allocation2 + $0xca] sm:$0xff]  ;;  %1722 = vst.msk [vmem:[#allocation2 + $0xd8] sm:$0xff] %vm1694_vm14, %v1679_v24  ;;  %v1550_v15 = vmul.f32 %v5940_v60, %v1483_v32  ;;  %v2093_v12 = vadd.f32 %v2092_v20, %v1936_v25  ;;  %v1841_v10 = vpack.c.bf16 %v1818_v37, %v1817_v26  ;;  %v3168_v20 = vld [vmem:[#allocation2 + $0x94] sm:$0xff] }
 0x172   : > { %v2210_v11 = vpack.c.bf16 %v2187_v38, %v2186_v54  ;;  %v1764_v8 = vld [vmem:[#allocation2 + $0xd0] sm:$0xff]  ;;  %v588_v16 = vcvt.s32.f32 %v6267_v56  ;;  %v3166_v26 = vld [vmem:[#allocation2 + $0x84] sm:$0xff] }
 0x173   : > { %v1596_v44 = vadd.f32 %v5911_v43, %v1550_v15  ;;  %5006 = vmatmul.msk.bf16.gmra.mxu1 %vm1694_vm14, %v1841_v10  ;;  %5112 = vmatmul.msk.bf16.gmra.mxu0 %vm1694_vm14, %v6235_v36  ;;  %v3167_v18 = vld [vmem:[#allocation2 + $0x8c] sm:$0xff] }
 0x174   : > { %5043 = vmatmul.msk.bf16.gmra.mxu3 %vm1694_vm14, %v2210_v11  ;;  %v630_v2 = vadd.f32 0.5, %v588_v16  ;;  %v6288_v15 = vpack.c.bf16 %v3167_v18, %v3166_v26 }
 0x175   : > { %v1638_v53 = vmax.f32 %v1596_v44, 0.0 }
 0x176   : > { %v2094_v40 = vpop.f32.mrf.mxu2  ;;  %v672_v29 = vmul.f32 0.055555556, %v630_v2 }
 0x177   : > { %v1680_v43 = vmul.f32 %v4874_v9, %v1638_v53  ;;  %v2304_v58 = vpop.f32.mrf.mxu3  ;;  %v4876_v9 = vsel %vm1134_vm13, 1.0, %v5316_v57 }
 0x178   : > { %v6260_v61 = vadd.f32 %v2304_v58, %v2093_v12  ;;  %v1485_v1 = vpop.f32.mrf.mxu0  ;;  %v1938_v0 = vpop.f32.mrf.mxu1  ;;  %v1765_v7 = vld [vmem:[#allocation2 + $0xd8] sm:$0xff]  ;;  %v797_v58 = vsub.f32 %v587_v48, %v755_v14  ;;  %v714_v59 = vfloor.f32 %v672_v29  ;;  %v4877_v48 = vsel %vm1135_vm4, 1.0, %v5316_v57 }
 0x179   : > { %1723 = vst.msk [vmem:[#allocation2 + $0xe0] sm:$0xff] %vm1694_vm14, %v1680_v43  ;;  %v1551_v47 = vmul.f32 %v5940_v60, %v1485_v1  ;;  %v2095_v50 = vadd.f32 %v2094_v40, %v1938_v0  ;;  %v1787_v49 = vpack.c.bf16 %v1765_v7, %v1764_v8  ;;  %v4875_v60 = vsel %vm1133_vm5, 1.0, %v5316_v57  ;;  %v1819_v30 = vld [vmem:[#allocation2 + $0xd1] sm:$0xff]  ;;  %vm968_vm5 = vmand %vm884_vm15, %vm926_vm3 }
 0x17a   : > { %v2188_v54 = vld [vmem:[#allocation2 + $0xd2] sm:$0xff]  ;;  %vm1010_vm12 = vcmp.gt.f32.partialorder %v797_v58, 0.5  ;;  %v756_v41 = vmul.f32 18.0, %v714_v59  ;;  %vm1094_vm9 = vcmp.lt.f32.partialorder %v797_v58, 16.5  ;;  %vm885_vm6 = vcmp.gt.f32.partialorder %v714_v59, 0.5 }
 0x17b   : > { %v1597_v45 = vadd.f32 %v6272_v4, %v1551_v47  ;;  %5025 = vmatmul.msk.bf16.gmra.mxu2 %vm1694_vm14, %v1787_v49  ;;  %vm6315_vm0 = vmand %vm968_vm5, %vm1010_vm12  ;;  %vm927_vm11 = vcmp.lt.f32.partialorder %v714_v59, 16.5  ;;  %vm7526_vm15 = vcmask 1041408   ;;  %vm7545_vm4 = vcmask 1043456  }
 0x17c   : > { %vm1136_vm1 = vmand %vm6315_vm0, %vm1094_vm9  ;;  %vm7549_vm5 = vcmask 64512  }
 0x17d   : > { %v1639_v5 = vmax.f32 %v1597_v45, 0.0  ;;  %vm969_vm13 = vmand %vm885_vm6, %vm927_vm11 }
 0x17e   : > { %v2097_v23 = vpop.f32.mrf.mxu2  ;;  %vm7527_vm3 = vmmov %vm7526_vm15 }
 0x17f   : > { %v1681_v21 = vmul.f32 %v4875_v60, %v1639_v5  ;;  %v2306_v24 = vpop.f32.mrf.mxu3  ;;  %vm7550_vm12 = vmmov %vm7527_vm3 }
 0x180   : > { %v6286_v55 = vadd.f32 %v2306_v24, %v2095_v50  ;;  %v1488_v32 = vpop.f32.mrf.mxu0  ;;  %v1941_v25 = vpop.f32.mrf.mxu1  ;;  %v1820_v37 = vld [vmem:[#allocation2 + $0xd9] sm:$0xff]  ;;  %vm7553_vm0 = vmmov %vm7549_vm5 }
 0x181   : > { %v2189_v38 = vld [vmem:[#allocation2 + $0xda] sm:$0xff]  ;;  %1724 = vst.msk [vmem:[#allocation2 + $0xe8] sm:$0xff] %vm1694_vm14, %v1681_v21  ;;  %v1552_v17 = vmul.f32 %v6297_v35, %v1488_v32  ;;  %v2098_v12 = vadd.f32 %v2097_v23, %v1941_v25  ;;  %v1842_v10 = vpack.c.bf16 %v1820_v37, %v1819_v30  ;;  %v798_v21 = vsub.f32 %v588_v16, %v756_v41  ;;  %vm7555_vm9 = vmmov %vm7553_vm0 }
 0x182   : > { %v2211_v11 = vpack.c.bf16 %v2189_v38, %v2188_v54  ;;  %v1766_v0 = vld [vmem:[#allocation2 + $0xe0] sm:$0xff]  ;;  %v6323_v32 = vpack.c.bf16 %v3169_v42, %v3168_v20  ;;  %v4878_v38 = vsel %vm1136_vm1, 1.0, %v5316_v57  ;;  %vm7557_vm6 = vmmov %vm7553_vm0 }
 0x183   : > { %v1598_v44 = vadd.f32 %v6272_v4, %v1552_v17  ;;  %5007 = vmatmul.msk.bf16.gmra.mxu1 %vm1694_vm14, %v1842_v10  ;;  %5113 = vmatmul.msk.bf16.gmra.mxu0 %vm1694_vm14, %v6288_v15  ;;  %vm1011_vm7 = vcmp.gt.f32.partialorder %v798_v21, 0.5  ;;  %vm1095_vm2 = vcmp.lt.f32.partialorder %v798_v21, 16.5  ;;  %vm7559_vm11 = vmmov %vm7553_vm0 }
 0x184   : > { %5044 = vmatmul.msk.bf16.gmra.mxu3 %vm1694_vm14, %v2211_v11  ;;  %vm1053_vm8 = vmand %vm969_vm13, %vm1011_vm7 }
 0x185   : > { %v1640_v53 = vmax.f32 %v1598_v44, 0.0  ;;  %vm1137_vm10 = vmand %vm1053_vm8, %vm1095_vm2 }
 0x186   : > { %v2099_v40 = vpop.f32.mrf.mxu2  ;;  %v4879_v59 = vsel %vm1137_vm10, 1.0, %v5316_v57  ;;  %vm7562_vm1 = vmmov %vm7553_vm0 }
 0x187   : > { %v1682_v28 = vmul.f32 %v4876_v9, %v1640_v53  ;;  %v2309_v43 = vpop.f32.mrf.mxu3  ;;  %vm7565_vm13 = vmmov %vm7553_vm0 }
 0x188   : > { %v6308_v62 = vadd.f32 %v2309_v43, %v2098_v12  ;;  %v1490_v63 = vpop.f32.mrf.mxu0  ;;  %v1943_v1 = vpop.f32.mrf.mxu1  ;;  %v1767_v8 = vld [vmem:[#allocation2 + $0xe8] sm:$0xff]  ;;  %vm7568_vm7 = vmmov %vm7553_vm0 }
 0x189   : > { %1725 = vst.msk [vmem:[#allocation2 + $0xf0] sm:$0xff] %vm1694_vm14, %v1682_v28  ;;  %v1553_v7 = vmul.f32 %v6297_v35, %v1490_v63  ;;  %v2100_v47 = vadd.f32 %v2099_v40, %v1943_v1  ;;  %v1788_v50 = vpack.c.bf16 %v1767_v8, %v1766_v0  ;;  %v1821_v23 = vld [vmem:[#allocation2 + $0xe1] sm:$0xff]  ;;  %v3171_v0 = vld [vmem:[#allocation2 + $0xac] sm:$0xff]  ;;  %vm7570_vm8 = vmmov %vm7553_vm0 }
 0x18a   : > { %v2190_v22 = vld [vmem:[#allocation2 + $0xe2] sm:$0xff]  ;;  %vm7571_vm2 = vmmov %vm7553_vm0 }
 0x18b   : > { %v1599_v49 = vadd.f32 %v6272_v4, %v1553_v7  ;;  %5026 = vmatmul.msk.bf16.gmra.mxu2 %vm1694_vm14, %v1788_v50  ;;  %v3170_v50 = vld [vmem:[#allocation2 + $0xa4] sm:$0xff]  ;;  %vm7572_vm10 = vmmov %vm7553_vm0 }
 0x18c   : > { %v6353_v60 = vpack.c.bf16 %v3171_v0, %v3170_v50  ;;  %v1773_v0 = vld [vmem:[#allocation2 + $0x118] sm:$0xff] }
 0x18d   : > { %v1641_v45 = vmax.f32 %v1599_v49, 0.0 }
 0x18e   : > { %v2102_v52 = vpop.f32.mrf.mxu2 }
 0x18f   : > { %v1683_v5 = vmul.f32 %v4877_v48, %v1641_v45  ;;  %v2311_v18 = vpop.f32.mrf.mxu3 }
 0x190   : > { %v6321_v24 = vadd.f32 %v2311_v18, %v2100_v47  ;;  %v1493_v30 = vpop.f32.mrf.mxu0  ;;  %v1946_v26 = vpop.f32.mrf.mxu1  ;;  %v1822_v31 = vld [vmem:[#allocation2 + $0xe9] sm:$0xff] }
 0x191   : > { %v2191_v2 = vld [vmem:[#allocation2 + $0xea] sm:$0xff]  ;;  %1726 = vst.msk [vmem:[#allocation2 + $0xf8] sm:$0xff] %vm1694_vm14, %v1683_v5  ;;  %v1554_v56 = vmul.f32 %v6297_v35, %v1493_v30  ;;  %v2103_v16 = vadd.f32 %v2102_v52, %v1946_v26  ;;  %v1843_v25 = vpack.c.bf16 %v1822_v31, %v1821_v23 }
 0x192   : > { %v6330_v37 = vpack.c.bf16 %v2191_v2, %v2190_v22  ;;  %v1768_v9 = vld [vmem:[#allocation2 + $0xf0] sm:$0xff] }
 0x193   : > { %v1600_v54 = vadd.f32 %v6272_v4, %v1554_v56  ;;  %5008 = vmatmul.msk.bf16.gmra.mxu1 %vm1694_vm14, %v1843_v25  ;;  %5114 = vmatmul.msk.bf16.gmra.mxu0 %vm1694_vm14, %v6323_v32  ;;  %v3173_v25 = vld [vmem:[#allocation2 + $0xbc] sm:$0xff] }
 0x194   : > { %5045 = vmatmul.msk.bf16.gmra.mxu3 %vm1694_vm14, %v6330_v37 }
 0x195   : > { %v1642_v17 = vmax.f32 %v1600_v54, 0.0 }
 0x196   : > { %v2104_v12 = vpop.f32.mrf.mxu2 }
 0x197   : > { %v1684_v10 = vmul.f32 %v4878_v38, %v1642_v17  ;;  %v2314_v11 = vpop.f32.mrf.mxu3 }
 0x198   : > { %v6339_v44 = vadd.f32 %v2314_v11, %v2103_v16  ;;  %v1495_v14 = vpop.f32.mrf.mxu0  ;;  %v1948_v29 = vpop.f32.mrf.mxu1  ;;  %v1769_v53 = vld [vmem:[#allocation2 + $0xf8] sm:$0xff] }
 0x199   : > { %1727 = vst.msk [vmem:[#allocation2 + $0x100] sm:$0xff] %vm1694_vm14, %v1684_v10  ;;  %v1555_v40 = vmul.f32 %v6297_v35, %v1495_v14  ;;  %v2105_v28 = vadd.f32 %v2104_v12, %v1948_v29  ;;  %v1789_v43 = vpack.c.bf16 %v1769_v53, %v1768_v9  ;;  %v1823_v47 = vld [vmem:[#allocation2 + $0xf1] sm:$0xff] }
 0x19a   : > { %v2192_v45 = vld [vmem:[#allocation2 + $0xf2] sm:$0xff]  ;;  %v5144_v29 = vld [vmem:[%s7432_s2 + $0x10] sm:$0x3] }
 0x19b   : > { %v1601_v58 = vadd.f32 %v6272_v4, %v1555_v40  ;;  %5027 = vmatmul.msk.bf16.gmra.mxu2 %vm1694_vm14, %v1789_v43  ;;  %v3172_v14 = vld [vmem:[#allocation2 + $0xb4] sm:$0xff] }
 0x19c   : > { %v6372_v40 = vpack.c.bf16 %v3173_v25, %v3172_v14 }
 0x19d   : > { %v1643_v63 = vmax.f32 %v1601_v58, 0.0  ;;  %v5125_v58 = vld [vmem:[%s7432_s2 + $0xe] sm:$0x3] }
 0x19e   : > { %v2107_v1 = vpop.f32.mrf.mxu2 }
 0x19f   : > { %v1685_v8 = vmul.f32 %v4879_v59, %v1643_v63  ;;  %v2316_v7 = vpop.f32.mrf.mxu3  ;;  %v3513_v59 = vsel %vm7527_vm3, %v5125_v58, 0  ;;  %vm7574_vm3 = vmmov %vm7553_vm0 }
 0x1a0   : > { %v6346_v49 = vadd.f32 %v2316_v7, %v2105_v28  ;;  %v1951_v41 = vpop.f32.mrf.mxu1  ;;  %v6348_v48 = vpop.f32.mrf.mxu0  ;;  %v1824_v35 = vld [vmem:[#allocation2 + $0xf9] sm:$0xff]  ;;  %v3761_v28 = vsel %vm7526_vm15, %v5144_v29, 0  ;;  %3522 = vmatpush.bf16.msrb.mxu1 %v3513_v59  ;;  %vm7573_vm15 = vmmov %vm7553_vm0 }
 0x1a1   : > { %7523 = vst [vmem:[#allocation4_spill] sm:$0xff] %v6348_v48  ;;  %v2193_v42 = vld [vmem:[#allocation2 + $0xfa] sm:$0xff]  ;;  %v2108_v4 = vadd.f32 %v2107_v1, %v1951_v41  ;;  %v1844_v52 = vpack.c.bf16 %v1824_v35, %v1823_v47  ;;  %3770 = vmatpush.bf16.msrb.mxu2 %v3761_v28  ;;  %v1772_v1 = vld [vmem:[#allocation2 + $0x110] sm:$0xff] }
 0x1a2   : > { %1728 = vst.msk [vmem:[#allocation2 + $0x108] sm:$0xff] %vm1694_vm14, %v1685_v8  ;;  %v6351_v57 = vpack.c.bf16 %v2193_v42, %v2192_v45  ;;  %v1770_v30 = vld [vmem:[#allocation2 + $0x100] sm:$0xff]  ;;  %v1791_v35 = vpack.c.bf16 %v1773_v0, %v1772_v1  ;;  %v1827_v42 = vld [vmem:[#allocation2 + $0x111] sm:$0xff] }
 0x1a3   : > { %5009 = vmatmul.msk.bf16.gmra.mxu1 %vm1694_vm14, %v1844_v52  ;;  %5115 = vmatmul.msk.bf16.gmra.mxu0 %vm1694_vm14, %v6353_v60  ;;  %v3175_v52 = vld [vmem:[#allocation2 + $0xcc] sm:$0xff]  ;;  %v2411_v59 = vld [vmem:[#allocation2 + $0x1a] sm:$0xff] }
 0x1a4   : > { %5046 = vmatmul.msk.bf16.gmra.mxu3 %vm1694_vm14, %v6351_v57  ;;  %v2907_v0 = vld [vmem:[#allocation2 + $0x1c] sm:$0xff] }
 0x1a6   : > { %v2109_v5 = vpop.f32.mrf.mxu2 }
 0x1a7   : > { %v2319_v18 = vpop.f32.mrf.mxu3 }
 0x1a8   : > { %v6360_v23 = vadd.f32 %v2319_v18, %v2108_v4  ;;  %v1953_v20 = vpop.f32.mrf.mxu1  ;;  %v6362_v21 = vpop.f32.mrf.mxu0  ;;  %v1828_v4 = vld [vmem:[#allocation2 + $0x119] sm:$0xff] }
 0x1a9   : > { %7524 = vst [vmem:[#allocation5_spill] sm:$0xff] %v6362_v21  ;;  %v1771_v26 = vld [vmem:[#allocation2 + $0x108] sm:$0xff]  ;;  %v2110_v31 = vadd.f32 %v2109_v5, %v1953_v20  ;;  %v2196_v18 = vld [vmem:[#allocation2 + $0x112] sm:$0xff]  ;;  %v2197_v20 = vld [vmem:[#allocation2 + $0x11a] sm:$0xff] }
 0x1aa   : > { %v1790_v22 = vpack.c.bf16 %v1771_v26, %v1770_v30  ;;  %v1825_v56 = vld [vmem:[#allocation2 + $0x101] sm:$0xff]  ;;  %v1826_v16 = vld [vmem:[#allocation2 + $0x109] sm:$0xff]  ;;  %v6397_v25 = vpack.c.bf16 %v2197_v20, %v2196_v18 }
 0x1ab   : > { %v2194_v38 = vld [vmem:[#allocation2 + $0x102] sm:$0xff]  ;;  %v2195_v17 = vld [vmem:[#allocation2 + $0x10a] sm:$0xff]  ;;  %v1845_v53 = vpack.c.bf16 %v1826_v16, %v1825_v56  ;;  %v1846_v56 = vpack.c.bf16 %v1828_v4, %v1827_v42 }
 0x1ac   : > { %5028 = vmatmul.msk.bf16.gmra.mxu2 %vm1694_vm14, %v1790_v22  ;;  %v6375_v43 = vpack.c.bf16 %v2195_v17, %v2194_v38  ;;  %v3174_v22 = vld [vmem:[#allocation2 + $0xc4] sm:$0xff]  ;;  %v2659_v38 = vld [vmem:[#allocation2 + $0x1b] sm:$0xff] }
 0x1ad   : > { %v6395_v16 = vpack.c.bf16 %v3175_v52, %v3174_v22  ;;  %v2906_v52 = vld [vmem:[#allocation2 + $0x14] sm:$0xff] }
 0x1ae   : > { %v2112_v2 = vpop.f32.mrf.mxu2  ;;  %v2942_v18 = vpack.c.bf16 %v2907_v0, %v2906_v52 }
 0x1af   : > { %v2321_v54 = vpop.f32.mrf.mxu3 }
 0x1b0   : > { %v6365_v12 = vadd.f32 %v2321_v54, %v2110_v31  ;;  %v1956_v10 = vpop.f32.mrf.mxu1  ;;  %v6367_v11 = vpop.f32.mrf.mxu0 }
 0x1b1   : > { %7525 = vst [vmem:[#allocation6_spill] sm:$0xff] %v6367_v11  ;;  %v2113_v9 = vadd.f32 %v2112_v2, %v1956_v10 }
 0x1b3   : > { %5010 = vmatmul.msk.bf16.gmra.mxu1 %vm1694_vm14, %v1845_v53  ;;  %5116 = vmatmul.msk.bf16.gmra.mxu0 %vm1694_vm14, %v6372_v40 }
 0x1b4   : > { %5047 = vmatmul.msk.bf16.gmra.mxu3 %vm1694_vm14, %v6375_v43 }
 0x1b6   : > { %v2114_v63 = vpop.f32.mrf.mxu2 }
 0x1b7   : > { %v2324_v8 = vpop.f32.mrf.mxu3 }
 0x1b8   : > { %v6386_v7 = vadd.f32 %v2324_v8, %v2113_v9  ;;  %v1958_v47 = vpop.f32.mrf.mxu1  ;;  %v6388_v50 = vpop.f32.mrf.mxu0  ;;  %v2658_v9 = vld [vmem:[#allocation2 + $0x13] sm:$0xff] }
 0x1b9   : > { %7528 = vst [vmem:[#allocation7_spill] sm:$0xff] %v6388_v50  ;;  %v2115_v41 = vadd.f32 %v2114_v63, %v1958_v47  ;;  %v2694_v28 = vpack.c.bf16 %v2659_v38, %v2658_v9  ;;  %v3177_v63 = vld [vmem:[#allocation2 + $0xdc] sm:$0xff] }
 0x1ba   : > { %v2660_v38 = vld [vmem:[#allocation2 + $0x23] sm:$0xff] }
 0x1bc   : > { %5029 = vmatmul.msk.bf16.gmra.mxu2 %vm1694_vm14, %v1791_v35  ;;  %v2410_v35 = vld [vmem:[#allocation2 + $0x12] sm:$0xff] }
 0x1bd   : > { %v2446_v4 = vpack.c.bf16 %v2411_v59, %v2410_v35  ;;  %v2909_v59 = vld [vmem:[#allocation2 + $0x2c] sm:$0xff]  ;;  %v3178_v35 = vld [vmem:[#allocation2 + $0xe4] sm:$0xff] }
 0x1be   : > { %v2117_v45 = vpop.f32.mrf.mxu2 }
 0x1bf   : > { %v2326_v5 = vpop.f32.mrf.mxu3 }
 0x1c0   : > { %v6391_v30 = vadd.f32 %v2326_v5, %v2115_v41  ;;  %v1961_v26 = vpop.f32.mrf.mxu1  ;;  %v6393_v31 = vpop.f32.mrf.mxu0 }
 0x1c1   : > { %7529 = vst [vmem:[#allocation8_spill] sm:$0xff] %v6393_v31  ;;  %v2118_v2 = vadd.f32 %v2117_v45, %v1961_v26  ;;  %v3176_v45 = vld [vmem:[#allocation2 + $0xd4] sm:$0xff]  ;;  %v2661_v26 = vld [vmem:[#allocation2 + $0x2b] sm:$0xff] }
 0x1c2   : > { %v6413_v5 = vpack.c.bf16 %v3177_v63, %v3176_v45 }
 0x1c3   : > { %5011 = vmatmul.msk.bf16.gmra.mxu1 %vm1694_vm14, %v1846_v56  ;;  %5117 = vmatmul.msk.bf16.gmra.mxu0 %vm1694_vm14, %v6395_v16 }
 0x1c4   : > { %5048 = vmatmul.msk.bf16.gmra.mxu3 %vm1694_vm14, %v6397_v25 }
 0x1c6   : > { %v2119_v54 = vpop.f32.mrf.mxu2 }
 0x1c7   : > { %v2329_v17 = vpop.f32.mrf.mxu3 }
 0x1c8   : > { %v6404_v10 = vadd.f32 %v2329_v17, %v2118_v2  ;;  %v1963_v14 = vpop.f32.mrf.mxu1  ;;  %v6406_v29 = vpop.f32.mrf.mxu0 }
 0x1c9   : > { %7530 = vst [vmem:[#allocation9_spill] sm:$0xff] %v6406_v29  ;;  %v2120_v53 = vadd.f32 %v2119_v54, %v1963_v14  ;;  %v2695_v14 = vpack.c.bf16 %v2661_v26, %v2660_v38  ;;  %v2663_v26 = vld [vmem:[#allocation2 + $0x3b] sm:$0xff] }
 0x1cc   : > { %5069 = vmatmul.msk.bf16.vlgmr.msra.gmra.mxu2 %vm1694_vm14, %v2694_v28  ;;  %v3179_v28 = vld [vmem:[#allocation2 + $0xec] sm:$0xff] }
 0x1cd   : > { %v6428_v52 = vpack.c.bf16 %v3179_v28, %v3178_v35 }
 0x1ce   : > { %v2122_v58 = vpop.f32.mrf.mxu2 }
 0x1cf   : > { %v2331_v1 = vpop.f32.mrf.mxu3 }
 0x1d0   : > { %v6409_v8 = vadd.f32 %v2331_v1, %v2120_v53  ;;  %v1966_v47 = vpop.f32.mrf.mxu1  ;;  %v6411_v41 = vpop.f32.mrf.mxu0  ;;  %v2413_v53 = vld [vmem:[#allocation2 + $0x2a] sm:$0xff] }
 0x1d1   : > { %7531 = vst [vmem:[#allocation10_spill] sm:$0xff] %v6411_v41  ;;  %v2123_v42 = vadd.f32 %v2122_v58, %v1966_v47  ;;  %v2412_v47 = vld [vmem:[#allocation2 + $0x22] sm:$0xff] }
 0x1d3   : > { %5050 = vmatmul.msk.bf16.vlgmr.msra.gmra.mxu1 %vm1694_vm14, %v2446_v4  ;;  %5118 = vmatmul.msk.bf16.gmra.mxu0 %vm1694_vm14, %v6413_v5  ;;  %v2908_v4 = vld [vmem:[#allocation2 + $0x24] sm:$0xff] }
 0x1d4   : > { %5088 = vmatmul.msk.bf16.vlgmr.msrb.gmra.mxu3 %vm1694_vm14, %v2942_v18  ;;  %v2943_v18 = vpack.c.bf16 %v2909_v59, %v2908_v4  ;;  %v3181_v59 = vld [vmem:[#allocation2 + $0xfc] sm:$0xff] }
 0x1d6   : > { %v2124_v20 = vpop.f32.mrf.mxu2 }
 0x1d7   : > { %v2334_v22 = vpop.f32.mrf.mxu3 }
 0x1d8   : > { %v6419_v2 = vadd.f32 %v2334_v22, %v2123_v42  ;;  %v1968_v56 = vpop.f32.mrf.mxu1  ;;  %v6421_v54 = vpop.f32.mrf.mxu0  ;;  %v2447_v42 = vpack.c.bf16 %v2413_v53, %v2412_v47  ;;  %v2911_v47 = vld [vmem:[#allocation2 + $0x3c] sm:$0xff] }
 0x1d9   : > { %7532 = vst [vmem:[#allocation11_spill] sm:$0xff] %v6421_v54  ;;  %v2125_v17 = vadd.f32 %v2124_v20, %v1968_v56 }
 0x1dc   : > { %5070 = vmatmul.msk.bf16.gmra.mxu2 %vm1694_vm14, %v2695_v14  ;;  %v2662_v14 = vld [vmem:[#allocation2 + $0x33] sm:$0xff] }
 0x1dd   : > { %v2696_v53 = vpack.c.bf16 %v2663_v26, %v2662_v14 }
 0x1de   : > { %v2127_v9 = vpop.f32.mrf.mxu2 }
 0x1df   : > { %v2336_v58 = vpop.f32.mrf.mxu3 }
 0x1e0   : > { %v6424_v63 = vadd.f32 %v2336_v58, %v2125_v17  ;;  %v1971_v1 = vpop.f32.mrf.mxu1  ;;  %v6426_v0 = vpop.f32.mrf.mxu0  ;;  %v2415_v58 = vld [vmem:[#allocation2 + $0x3a] sm:$0xff] }
 0x1e1   : > { %7533 = vst [vmem:[#allocation12_spill] sm:$0xff] %v6426_v0  ;;  %v2128_v45 = vadd.f32 %v2127_v9, %v1971_v1 }
 0x1e3   : > { %5051 = vmatmul.msk.bf16.gmra.mxu1 %vm1694_vm14, %v2447_v42  ;;  %5119 = vmatmul.msk.bf16.gmra.mxu0 %vm1694_vm14, %v6428_v52 }
 0x1e4   : > { %5089 = vmatmul.msk.bf16.gmra.mxu3 %vm1694_vm14, %v2943_v18  ;;  %v3180_v18 = vld [vmem:[#allocation2 + $0xf4] sm:$0xff] }
 0x1e5   : > { %v6443_v0 = vpack.c.bf16 %v3181_v59, %v3180_v18  ;;  %v2913_v18 = vld [vmem:[#allocation2 + $0x4c] sm:$0xff] }
 0x1e6   : > { %v2129_v20 = vpop.f32.mrf.mxu2 }
 0x1e7   : > { %v2339_v22 = vpop.f32.mrf.mxu3 }
 0x1e8   : > { %v6434_v56 = vadd.f32 %v2339_v22, %v2128_v45  ;;  %v1973_v38 = vpop.f32.mrf.mxu1  ;;  %v6436_v17 = vpop.f32.mrf.mxu0  ;;  %v2414_v45 = vld [vmem:[#allocation2 + $0x32] sm:$0xff] }
 0x1e9   : > { %7534 = vst [vmem:[#allocation13_spill] sm:$0xff] %v6436_v17  ;;  %v2130_v9 = vadd.f32 %v2129_v20, %v1973_v38  ;;  %v2448_v13 = vpack.c.bf16 %v2415_v58, %v2414_v45  ;;  %v2910_v17 = vld [vmem:[#allocation2 + $0x34] sm:$0xff]  ;;  %v2665_v38 = vld [vmem:[#allocation2 + $0x4b] sm:$0xff] }
 0x1ea   : > { %v2944_v20 = vpack.c.bf16 %v2911_v47, %v2910_v17  ;;  %v3182_v47 = vld [vmem:[#allocation2 + $0x104] sm:$0xff] }
 0x1ec   : > { %5071 = vmatmul.msk.bf16.gmra.mxu2 %vm1694_vm14, %v2696_v53 }
 0x1ee   : > { %v2132_v28 = vpop.f32.mrf.mxu2 }
 0x1ef   : > { %v2341_v1 = vpop.f32.mrf.mxu3 }
 0x1f0   : > { %v6439_v35 = vadd.f32 %v2341_v1, %v2130_v9  ;;  %v1976_v42 = vpop.f32.mrf.mxu1  ;;  %v6441_v4 = vpop.f32.mrf.mxu0 }
 0x1f1   : > { %7535 = vst [vmem:[#allocation14_spill] sm:$0xff] %v6441_v4  ;;  %v2133_v22 = vadd.f32 %v2132_v28, %v1976_v42  ;;  %v2664_v28 = vld [vmem:[#allocation2 + $0x43] sm:$0xff]  ;;  %v3183_v42 = vld [vmem:[#allocation2 + $0x10c] sm:$0xff] }
 0x1f2   : > { %v2697_v59 = vpack.c.bf16 %v2665_v38, %v2664_v28  ;;  %v6458_v29 = vpack.c.bf16 %v3183_v42, %v3182_v47  ;;  %v3184_v47 = vld [vmem:[#allocation2 + $0x114] sm:$0xff]  ;;  %v3185_v42 = vld [vmem:[#allocation2 + $0x11c] sm:$0xff] }
 0x1f3   : > { %5052 = vmatmul.msk.bf16.gmra.mxu1 %vm1694_vm14, %v2448_v13  ;;  %5120 = vmatmul.msk.bf16.gmra.mxu0 %vm1694_vm14, %v6443_v0  ;;  %v2417_v13 = vld [vmem:[#allocation2 + $0x4a] sm:$0xff]  ;;  %v6473_v11 = vpack.c.bf16 %v3185_v42, %v3184_v47 }
 0x1f4   : > { %5090 = vmatmul.msk.bf16.gmra.mxu3 %vm1694_vm14, %v2944_v20  ;;  %v3186_v47 = vld [vmem:[#allocation2 + $0x124] sm:$0xff]  ;;  %v3187_v42 = vld [vmem:[#allocation2 + $0x12c] sm:$0xff] }
 0x1f5   : > { %v6488_v48 = vpack.c.bf16 %v3187_v42, %v3186_v47 }
 0x1f6   : > { %v2134_v26 = vpop.f32.mrf.mxu2 }
 0x1f7   : > { %v2344_v14 = vpop.f32.mrf.mxu3 }
 0x1f8   : > { %v6449_v9 = vadd.f32 %v2344_v14, %v2133_v22  ;;  %v1978_v53 = vpop.f32.mrf.mxu1  ;;  %v6451_v1 = vpop.f32.mrf.mxu0  ;;  %v2416_v22 = vld [vmem:[#allocation2 + $0x42] sm:$0xff] }
 0x1f9   : > { %7536 = vst [vmem:[#allocation15_spill] sm:$0xff] %v6451_v1  ;;  %v2135_v58 = vadd.f32 %v2134_v26, %v1978_v53  ;;  %v2449_v41 = vpack.c.bf16 %v2417_v13, %v2416_v22  ;;  %v2912_v1 = vld [vmem:[#allocation2 + $0x44] sm:$0xff]  ;;  %v2667_v53 = vld [vmem:[#allocation2 + $0x5b] sm:$0xff] }
 0x1fa   : > { %v2945_v26 = vpack.c.bf16 %v2913_v18, %v2912_v1  ;;  %v2915_v22 = vld [vmem:[#allocation2 + $0x5c] sm:$0xff] }
 0x1fc   : > { %5072 = vmatmul.msk.bf16.gmra.mxu2 %vm1694_vm14, %v2697_v59 }
 0x1fe   : > { %v2137_v17 = vpop.f32.mrf.mxu2 }
 0x1ff   : > { %v2346_v45 = vpop.f32.mrf.mxu3 }
 0x200   : > { %v6454_v20 = vadd.f32 %v2346_v45, %v2135_v58  ;;  %v1981_v4 = vpop.f32.mrf.mxu1  ;;  %v6456_v54 = vpop.f32.mrf.mxu0 }
 0x201   : > { %7537 = vst [vmem:[#allocation16_spill] sm:$0xff] %v6456_v54  ;;  %v2138_v14 = vadd.f32 %v2137_v17, %v1981_v4  ;;  %v2666_v4 = vld [vmem:[#allocation2 + $0x53] sm:$0xff] }
 0x202   : > { %v2698_v13 = vpack.c.bf16 %v2667_v53, %v2666_v4 }
 0x203   : > { %5053 = vmatmul.msk.bf16.gmra.mxu1 %vm1694_vm14, %v2449_v41  ;;  %5121 = vmatmul.msk.bf16.gmra.mxu0 %vm1694_vm14, %v6458_v29  ;;  %v2419_v41 = vld [vmem:[#allocation2 + $0x5a] sm:$0xff] }
 0x204   : > { %5091 = vmatmul.msk.bf16.gmra.mxu3 %vm1694_vm14, %v2945_v26 }
 0x206   : > { %v2139_v38 = vpop.f32.mrf.mxu2 }
 0x207   : > { %v2349_v28 = vpop.f32.mrf.mxu3 }
 0x208   : > { %v6464_v58 = vadd.f32 %v2349_v28, %v2138_v14  ;;  %v1983_v59 = vpop.f32.mrf.mxu1  ;;  %v6466_v45 = vpop.f32.mrf.mxu0  ;;  %v2418_v14 = vld [vmem:[#allocation2 + $0x52] sm:$0xff] }
 0x209   : > { %7538 = vst [vmem:[#allocation17_spill] sm:$0xff] %v6466_v45  ;;  %v2140_v17 = vadd.f32 %v2139_v38, %v1983_v59  ;;  %v2450_v50 = vpack.c.bf16 %v2419_v41, %v2418_v14  ;;  %v2914_v45 = vld [vmem:[#allocation2 + $0x54] sm:$0xff]  ;;  %v2669_v59 = vld [vmem:[#allocation2 + $0x6b] sm:$0xff] }
 0x20a   : > { %v2946_v38 = vpack.c.bf16 %v2915_v22, %v2914_v45 }
 0x20c   : > { %5073 = vmatmul.msk.bf16.gmra.mxu2 %vm1694_vm14, %v2698_v13 }
 0x20e   : > { %v2142_v1 = vpop.f32.mrf.mxu2 }
 0x20f   : > { %v2351_v18 = vpop.f32.mrf.mxu3 }
 0x210   : > { %v6469_v26 = vadd.f32 %v2351_v18, %v2140_v17  ;;  %v1986_v54 = vpop.f32.mrf.mxu1  ;;  %v6471_v31 = vpop.f32.mrf.mxu0 }
 0x211   : > { %7539 = vst [vmem:[#allocation18_spill] sm:$0xff] %v6471_v31  ;;  %v2143_v28 = vadd.f32 %v2142_v1, %v1986_v54  ;;  %v2668_v54 = vld [vmem:[#allocation2 + $0x63] sm:$0xff] }
 0x212   : > { %v2699_v41 = vpack.c.bf16 %v2669_v59, %v2668_v54  ;;  %v2671_v59 = vld [vmem:[#allocation2 + $0x7b] sm:$0xff] }
 0x213   : > { %5054 = vmatmul.msk.bf16.gmra.mxu1 %vm1694_vm14, %v2450_v50  ;;  %5122 = vmatmul.msk.bf16.gmra.mxu0 %vm1694_vm14, %v6473_v11  ;;  %v2421_v50 = vld [vmem:[#allocation2 + $0x6a] sm:$0xff] }
 0x214   : > { %5092 = vmatmul.msk.bf16.gmra.mxu3 %vm1694_vm14, %v2946_v38 }
 0x216   : > { %v2144_v53 = vpop.f32.mrf.mxu2 }
 0x217   : > { %v2354_v4 = vpop.f32.mrf.mxu3 }
 0x218   : > { %v6479_v17 = vadd.f32 %v2354_v4, %v2143_v28  ;;  %v1988_v13 = vpop.f32.mrf.mxu1  ;;  %v6481_v18 = vpop.f32.mrf.mxu0  ;;  %v2420_v28 = vld [vmem:[#allocation2 + $0x62] sm:$0xff] }
 0x219   : > { %7540 = vst [vmem:[#allocation19_spill] sm:$0xff] %v6481_v18  ;;  %v2145_v1 = vadd.f32 %v2144_v53, %v1988_v13  ;;  %v2451_v21 = vpack.c.bf16 %v2421_v50, %v2420_v28  ;;  %v4269_v50 = vld [vmem:[%s7434_s4] sm:$0xf]  ;;  %v2422_v18 = vld [vmem:[#allocation2 + $0x72] sm:$0xff] }
 0x21a   : > { %v4271_v42 = vsel %vm7545_vm4, %v4269_v50, 0  ;;  %v3189_v28 = vld [vmem:[#allocation2 + $0x13c] sm:$0xff]  ;;  %vm7596_vm4 = vmmov %vm7553_vm0 }
 0x21b   : > { %4280 = vmatpush.bf16.msra.mxu0 %v4271_v42  ;;  %v2672_v42 = vld [vmem:[#allocation2 + $0x83] sm:$0xff] }
 0x21c   : > { %5074 = vmatmul.msk.bf16.gmra.mxu2 %vm1694_vm14, %v2699_v41 }
 0x21e   : > { %v2147_v45 = vpop.f32.mrf.mxu2 }
 0x21f   : > { %v2356_v22 = vpop.f32.mrf.mxu3 }
 0x220   : > { %v6484_v14 = vadd.f32 %v2356_v22, %v2145_v1  ;;  %v1991_v38 = vpop.f32.mrf.mxu1  ;;  %v6486_v31 = vpop.f32.mrf.mxu0  ;;  %v2423_v22 = vld [vmem:[#allocation2 + $0x7a] sm:$0xff] }
 0x221   : > { %7542 = vst [vmem:[#allocation21_spill] sm:$0xff] %v6486_v31  ;;  %v2148_v4 = vadd.f32 %v2147_v45, %v1991_v38  ;;  %v2670_v45 = vld [vmem:[#allocation2 + $0x73] sm:$0xff] }
 0x222   : > { %7541 = vst [vmem:[#allocation20_spill] sm:$0xff] %v6484_v14  ;;  %v2700_v47 = vpack.c.bf16 %v2671_v59, %v2670_v45  ;;  %v3188_v38 = vld [vmem:[#allocation2 + $0x134] sm:$0xff]  ;;  %v2452_v14 = vpack.c.bf16 %v2423_v22, %v2422_v18 }
 0x223   : > { %5055 = vmatmul.msk.bf16.gmra.mxu1 %vm1694_vm14, %v2451_v21  ;;  %5123 = vmatmul.msk.bf16.gmra.mxu0 %vm1694_vm14, %v6488_v48 }
 0x224   : > { %5093 = vmatmul.msk.bf16.gmra.mxu3 %vm1694_vm14, %v6187_v39 }
 0x226   : > { %v2149_v53 = vpop.f32.mrf.mxu2 }
 0x227   : > { %v2359_v13 = vpop.f32.mrf.mxu3 }
 0x228   : > { %v6495_v54 = vadd.f32 %v2359_v13, %v2148_v4  ;;  %v1993_v1 = vpop.f32.mrf.mxu1  ;;  %v6497_v41 = vpop.f32.mrf.mxu0 }
 0x229   : > { %7544 = vst [vmem:[#allocation23_spill] sm:$0xff] %v6497_v41  ;;  %v2150_v21 = vadd.f32 %v2149_v53, %v1993_v1  ;;  %v3207_v53 = vpack.c.bf16 %v3189_v28, %v3188_v38  ;;  %v2673_v1 = vld [vmem:[#allocation2 + $0x8b] sm:$0xff] }
 0x22a   : > { %7543 = vst [vmem:[#allocation22_spill] sm:$0xff] %v6495_v54  ;;  %v2701_v18 = vpack.c.bf16 %v2673_v1, %v2672_v42  ;;  %v2675_v42 = vld [vmem:[#allocation2 + $0x9b] sm:$0xff] }
 0x22c   : > { %5075 = vmatmul.msk.bf16.gmra.mxu2 %vm1694_vm14, %v2700_v47 }
 0x22f   : > { %v2152_v39 = vpop.f32.mrf.mxu2  ;;  %v2361_v4 = vpop.f32.mrf.mxu3 }
 0x230   : > { %v6504_v13 = vadd.f32 %v2361_v4, %v2150_v21  ;;  %v1996_v41 = vpop.f32.mrf.mxu1  ;;  %v6506_v31 = vpop.f32.mrf.mxu0  ;;  %v2424_v4 = vld [vmem:[#allocation2 + $0x82] sm:$0xff] }
 0x231   : > { %7546 = vst [vmem:[#allocation24_spill] sm:$0xff] %v6506_v31  ;;  %v2153_v54 = vadd.f32 %v2152_v39, %v1996_v41  ;;  %v2425_v39 = vld [vmem:[#allocation2 + $0x8a] sm:$0xff] }
 0x232   : > { %v5267_v31 = vld [vmem:[%s5415_s17 + $0x8] sm:$0xff] }
 0x233   : > { %5056 = vmatmul.msk.bf16.gmra.mxu1 %vm1694_vm14, %v2452_v14  ;;  %5124 = vmatmul.msk.bf16.gmra.mxu0 %vm1694_vm14, %v3207_v53  ;;  %v2453_v53 = vpack.c.bf16 %v2425_v39, %v2424_v4 }
 0x234   : > { %5094 = vmatmul.msk.bf16.gmra.mxu3 %vm1694_vm14, %v6235_v36 }
 0x237   : > { %v2154_v59 = vpop.f32.mrf.mxu2  ;;  %v2364_v45 = vpop.f32.mrf.mxu3 }
 0x238   : > { %v6512_v50 = vadd.f32 %v2364_v45, %v2153_v54  ;;  %v1998_v21 = vpop.f32.mrf.mxu1  ;;  %v6514_v47 = vpop.f32.mrf.mxu0  ;;  %v5266_v45 = vld [vmem:[%s5415_s17] sm:$0xff] }
 0x239   : > { %7547 = vst [vmem:[#allocation25_spill] sm:$0xff] %v6514_v47  ;;  %v2155_v41 = vadd.f32 %v2154_v59, %v1998_v21  ;;  %v4032_v59 = vld [vmem:[%s7433_s3] sm:$0x3] }
 0x23a   : > { %v4088_v1 = vsel %vm7550_vm12, %v4032_v59, 0  ;;  %vm7602_vm12 = vmmov %vm7553_vm0 }
 0x23b   : > { %4097 = vmatpush.bf16.msra.mxu3 %v4088_v1  ;;  %v2426_v1 = vld [vmem:[#allocation2 + $0x92] sm:$0xff] }
 0x23c   : > { %5076 = vmatmul.msk.bf16.gmra.mxu2 %vm1694_vm14, %v2701_v18 }
 0x23f   : > { %v2157_v14 = vpop.f32.mrf.mxu2  ;;  %v2366_v22 = vpop.f32.mrf.mxu3 }
 0x240   : > { %v6517_v38 = vadd.f32 %v2366_v22, %v2155_v41  ;;  %v2001_v36 = vpop.f32.mrf.mxu1  ;;  %v6519_v28 = vpop.f32.mrf.mxu0  ;;  %v2674_v22 = vld [vmem:[#allocation2 + $0x93] sm:$0xff] }
 0x241   : > { %7548 = vst [vmem:[#allocation26_spill] sm:$0xff] %v6519_v28  ;;  %v2158_v54 = vadd.f32 %v2157_v14, %v2001_v36  ;;  %v2702_v4 = vpack.c.bf16 %v2675_v42, %v2674_v22  ;;  %v2677_v42 = vld [vmem:[#allocation2 + $0xab] sm:$0xff] }
 0x243   : > { %5057 = vmatmul.msk.bf16.gmra.mxu1 %vm1694_vm14, %v2453_v53  ;;  %5181 = vmatmul.msk.bf16.vlgmr.msra.gmra.mxu0 %vm7549_vm5, %v5266_v45  ;;  %v2427_v53 = vld [vmem:[#allocation2 + $0x9a] sm:$0xff]  ;;  %vm7599_vm5 = vmmov %vm7553_vm0 }
 0x244   : > { %5095 = vmatmul.msk.bf16.gmra.mxu3 %vm1694_vm14, %v6288_v15 }
 0x247   : > { %v2159_v21 = vpop.f32.mrf.mxu2  ;;  %v2369_v41 = vpop.f32.mrf.mxu3 }
 0x248   : > { %v6530_v18 = vadd.f32 %v2369_v41, %v2158_v54  ;;  %v2003_v14 = vpop.f32.mrf.mxu1  ;;  %v6532_v39 = vpop.f32.mrf.mxu0  ;;  %v2454_v41 = vpack.c.bf16 %v2427_v53, %v2426_v1 }
 0x249   : > { %7551 = vst [vmem:[#allocation27_spill] sm:$0xff] %v6532_v39  ;;  %v2160_v36 = vadd.f32 %v2159_v21, %v2003_v14 }
 0x24c   : > { %5077 = vmatmul.msk.bf16.gmra.mxu2 %vm1694_vm14, %v2702_v4 }
 0x24f   : > { %v2780_v15 = vpop.f32.mrf.mxu2  ;;  %v2371_v45 = vpop.f32.mrf.mxu3 }
 0x250   : > { %v6535_v28 = vadd.f32 %v2371_v45, %v2160_v36  ;;  %v2532_v59 = vpop.f32.mrf.mxu1  ;;  %v6537_v47 = vpop.f32.mrf.mxu0  ;;  %v2676_v45 = vld [vmem:[#allocation2 + $0xa3] sm:$0xff] }
 0x251   : > { %7552 = vst [vmem:[#allocation28_spill] sm:$0xff] %v6537_v47  ;;  %v2622_v54 = vadd.f32 %v2532_v59, %v6074_v19  ;;  %v2703_v53 = vpack.c.bf16 %v2677_v42, %v2676_v45  ;;  %v2429_v59 = vld [vmem:[#allocation2 + $0xaa] sm:$0xff]  ;;  %v2679_v42 = vld [vmem:[#allocation2 + $0xbb] sm:$0xff] }
 0x253   : > { %5058 = vmatmul.msk.bf16.gmra.mxu1 %vm1694_vm14, %v2454_v41  ;;  %v2870_v39 = vadd.f32 %v2780_v15, %v2622_v54  ;;  %5182 = vmatmul.msk.bf16.gmra.mxu0 %vm7553_vm0, %v5267_v31 }
 0x254   : > { %5096 = vmatmul.msk.bf16.gmra.mxu3 %vm1694_vm14, %v6323_v32 }
 0x257   : > { %v2782_v21 = vpop.f32.mrf.mxu2  ;;  %v3028_v14 = vpop.f32.mrf.mxu3 }
 0x258   : > { %v6545_v22 = vadd.f32 %v3028_v14, %v2870_v39  ;;  %v2534_v36 = vpop.f32.mrf.mxu1  ;;  %v6547_v4 = vpop.f32.mrf.mxu0  ;;  %v2428_v39 = vld [vmem:[#allocation2 + $0xa2] sm:$0xff] }
 0x259   : > { %7554 = vst [vmem:[#allocation29_spill] sm:$0xff] %v6547_v4  ;;  %v2623_v19 = vadd.f32 %v2534_v36, %v6095_v46  ;;  %v2455_v4 = vpack.c.bf16 %v2429_v59, %v2428_v39  ;;  %v5268_v46 = vld [vmem:[%s5415_s17 + $0x10] sm:$0xff] }
 0x25b   : > { %v2871_v15 = vadd.f32 %v2782_v21, %v2623_v19 }
 0x25c   : > { %5078 = vmatmul.msk.bf16.gmra.mxu2 %vm1694_vm14, %v2703_v53 }
 0x25f   : > { %v2785_v31 = vpop.f32.mrf.mxu2  ;;  %v3030_v1 = vpop.f32.mrf.mxu3 }
 0x260   : > { %v6551_v32 = vadd.f32 %v3030_v1, %v2871_v15  ;;  %v2537_v54 = vpop.f32.mrf.mxu1  ;;  %v6553_v41 = vpop.f32.mrf.mxu0  ;;  %v2678_v15 = vld [vmem:[#allocation2 + $0xb3] sm:$0xff] }
 0x261   : > { %v2624_v14 = vadd.f32 %v2537_v54, %v6119_v3  ;;  %v2431_v1 = vld [vmem:[#allocation2 + $0xba] sm:$0xff] }
 0x263   : > { %5059 = vmatmul.msk.bf16.gmra.mxu1 %vm1694_vm14, %v2455_v4  ;;  %v2872_v47 = vadd.f32 %v2785_v31, %v2624_v14  ;;  %5183 = vmatmul.msk.bf16.gmra.mxu0 %vm7555_vm9, %v5268_v46  ;;  %v2704_v4 = vpack.c.bf16 %v2679_v42, %v2678_v15  ;;  %v2681_v42 = vld [vmem:[#allocation2 + $0xcb] sm:$0xff]  ;;  %vm4501_vm9 = vcmask 1044480  }
 0x264   : > { %5097 = vmatmul.msk.bf16.gmra.mxu3 %vm1694_vm14, %v6353_v60 }
 0x267   : > { %v2787_v21 = vpop.f32.mrf.mxu2  ;;  %v3033_v36 = vpop.f32.mrf.mxu3 }
 0x268   : > { %v6561_v45 = vadd.f32 %v3033_v36, %v2872_v47  ;;  %v2539_v19 = vpop.f32.mrf.mxu1  ;;  %v6563_v53 = vpop.f32.mrf.mxu0  ;;  %v2430_v47 = vld [vmem:[#allocation2 + $0xb2] sm:$0xff] }
 0x269   : > { %7556 = vst [vmem:[#allocation30_spill] sm:$0xff] %v6563_v53  ;;  %v2625_v3 = vadd.f32 %v2539_v19, %v6140_v34  ;;  %v2456_v36 = vpack.c.bf16 %v2431_v1, %v2430_v47  ;;  %v5269_v34 = vld [vmem:[%s5415_s17 + $0x18] sm:$0xff] }
 0x26b   : > { %v2873_v31 = vadd.f32 %v2787_v21, %v2625_v3 }
 0x26c   : > { %5079 = vmatmul.msk.bf16.gmra.mxu2 %vm1694_vm14, %v2704_v4 }
 0x26f   : > { %v2790_v59 = vpop.f32.mrf.mxu2  ;;  %v3035_v54 = vpop.f32.mrf.mxu3 }
 0x270   : > { %v6567_v60 = vadd.f32 %v3035_v54, %v2873_v31  ;;  %v2542_v39 = vpop.f32.mrf.mxu1  ;;  %v6569_v14 = vpop.f32.mrf.mxu0  ;;  %v2680_v31 = vld [vmem:[#allocation2 + $0xc3] sm:$0xff] }
 0x271   : > { %v2626_v46 = vadd.f32 %v2542_v39, %v6164_v6  ;;  %v2705_v1 = vpack.c.bf16 %v2681_v42, %v2680_v31  ;;  %v2433_v39 = vld [vmem:[#allocation2 + $0xca] sm:$0xff]  ;;  %v2683_v42 = vld [vmem:[#allocation2 + $0xdb] sm:$0xff] }
 0x273   : > { %5060 = vmatmul.msk.bf16.gmra.mxu1 %vm1694_vm14, %v2456_v36  ;;  %v2874_v53 = vadd.f32 %v2790_v59, %v2626_v46  ;;  %5184 = vmatmul.msk.bf16.gmra.mxu0 %vm7557_vm6, %v5269_v34  ;;  %vm4719_vm6 = vcmask 125952  }
 0x274   : > { %5098 = vmatmul.msk.bf16.gmra.mxu3 %vm1694_vm14, %v6372_v40 }
 0x277   : > { %v2792_v21 = vpop.f32.mrf.mxu2  ;;  %v3038_v19 = vpop.f32.mrf.mxu3 }
 0x278   : > { %v6577_v15 = vadd.f32 %v3038_v19, %v2874_v53  ;;  %v2544_v3 = vpop.f32.mrf.mxu1  ;;  %v6579_v4 = vpop.f32.mrf.mxu0  ;;  %v2432_v53 = vld [vmem:[#allocation2 + $0xc2] sm:$0xff] }
 0x279   : > { %7558 = vst [vmem:[#allocation31_spill] sm:$0xff] %v6579_v4  ;;  %v2627_v6 = vadd.f32 %v2544_v3, %v6185_v33  ;;  %v2457_v19 = vpack.c.bf16 %v2433_v39, %v2432_v53  ;;  %v5270_v33 = vld [vmem:[%s5415_s17 + $0x20] sm:$0xff] }
 0x27b   : > { %v2875_v59 = vadd.f32 %v2792_v21, %v2627_v6 }
 0x27c   : > { %5080 = vmatmul.msk.bf16.gmra.mxu2 %vm1694_vm14, %v2705_v1 }
 0x27f   : > { %v2795_v54 = vpop.f32.mrf.mxu2  ;;  %v3040_v47 = vpop.f32.mrf.mxu3 }
 0x280   : > { %v6583_v40 = vadd.f32 %v3040_v47, %v2875_v59  ;;  %v2547_v46 = vpop.f32.mrf.mxu1  ;;  %v6585_v36 = vpop.f32.mrf.mxu0  ;;  %v2682_v59 = vld [vmem:[#allocation2 + $0xd3] sm:$0xff] }
 0x281   : > { %v2628_v34 = vadd.f32 %v2547_v46, %v6212_v51  ;;  %v2706_v39 = vpack.c.bf16 %v2683_v42, %v2682_v59  ;;  %v2435_v46 = vld [vmem:[#allocation2 + $0xda] sm:$0xff]  ;;  %v2685_v42 = vld [vmem:[#allocation2 + $0xeb] sm:$0xff] }
 0x283   : > { %5061 = vmatmul.msk.bf16.gmra.mxu1 %vm1694_vm14, %v2457_v19  ;;  %v2876_v4 = vadd.f32 %v2795_v54, %v2628_v34  ;;  %5185 = vmatmul.msk.bf16.gmra.mxu0 %vm7559_vm11, %v5270_v33  ;;  %vm7607_vm11 = vmmov %vm7553_vm0 }
 0x284   : > { %5099 = vmatmul.msk.bf16.gmra.mxu3 %vm1694_vm14, %v6395_v16 }
 0x287   : > { %v2797_v21 = vpop.f32.mrf.mxu2  ;;  %v3043_v3 = vpop.f32.mrf.mxu3 }
 0x288   : > { %v6593_v31 = vadd.f32 %v3043_v3, %v2876_v4  ;;  %v2549_v6 = vpop.f32.mrf.mxu1  ;;  %v6595_v1 = vpop.f32.mrf.mxu0  ;;  %v2434_v4 = vld [vmem:[#allocation2 + $0xd2] sm:$0xff] }
 0x289   : > { %7560 = vst [vmem:[#allocation32_spill] sm:$0xff] %v6595_v1  ;;  %v2629_v51 = vadd.f32 %v2549_v6, %v6233_v27  ;;  %v2458_v3 = vpack.c.bf16 %v2435_v46, %v2434_v4  ;;  %v5271_v27 = vld [vmem:[%s5415_s17 + $0x28] sm:$0xff] }
 0x28b   : > { %v2877_v54 = vadd.f32 %v2797_v21, %v2629_v51 }
 0x28c   : > { %5081 = vmatmul.msk.bf16.gmra.mxu2 %vm1694_vm14, %v2706_v39 }
 0x28f   : > { %v2800_v47 = vpop.f32.mrf.mxu2  ;;  %v3045_v53 = vpop.f32.mrf.mxu3 }
 0x290   : > { %v6599_v16 = vadd.f32 %v3045_v53, %v2877_v54  ;;  %v2552_v34 = vpop.f32.mrf.mxu1  ;;  %v6601_v19 = vpop.f32.mrf.mxu0 }
 0x291   : > { %7561 = vst [vmem:[#allocation33_spill] sm:$0xff] %v6601_v19  ;;  %v2630_v33 = vadd.f32 %v2552_v34, %v6260_v61  ;;  %v2684_v61 = vld [vmem:[#allocation2 + $0xe3] sm:$0xff]  ;;  %v3663_v19 = vld [vmem:[#allocation2 + $0x8e] sm:$0xff] }
 0x292   : > { %v2707_v46 = vpack.c.bf16 %v2685_v42, %v2684_v61 }
 0x293   : > { %5062 = vmatmul.msk.bf16.gmra.mxu1 %vm1694_vm14, %v2458_v3  ;;  %v2878_v1 = vadd.f32 %v2800_v47, %v2630_v33  ;;  %5186 = vmatmul.msk.bf16.gmra.mxu0 %vm7562_vm1, %v5271_v27  ;;  %v5272_v27 = vld [vmem:[%s5415_s17 + $0x30] sm:$0xff]  ;;  %vm7610_vm1 = vmmov %vm7553_vm0 }
 0x294   : > { %5100 = vmatmul.msk.bf16.gmra.mxu3 %vm1694_vm14, %v6413_v5 }
 0x297   : > { %v2802_v21 = vpop.f32.mrf.mxu2  ;;  %v3048_v6 = vpop.f32.mrf.mxu3 }
 0x298   : > { %v6609_v59 = vadd.f32 %v3048_v6, %v2878_v1  ;;  %v2554_v51 = vpop.f32.mrf.mxu1  ;;  %v6611_v39 = vpop.f32.mrf.mxu0 }
 0x299   : > { %7563 = vst [vmem:[#allocation34_spill] sm:$0xff] %v6611_v39  ;;  %v2631_v54 = vadd.f32 %v2554_v51, %v6286_v55 }
 0x29b   : > { %v2879_v47 = vadd.f32 %v2802_v21, %v2631_v54  ;;  %v2687_v21 = vld [vmem:[#allocation2 + $0xfb] sm:$0xff] }
 0x29c   : > { %5082 = vmatmul.msk.bf16.gmra.mxu2 %vm1694_vm14, %v2707_v46 }
 0x29f   : > { %v2805_v53 = vpop.f32.mrf.mxu2  ;;  %v3050_v34 = vpop.f32.mrf.mxu3 }
 0x2a0   : > { %v6615_v4 = vadd.f32 %v3050_v34, %v2879_v47  ;;  %v2557_v5 = vpop.f32.mrf.mxu1  ;;  %v6617_v33 = vpop.f32.mrf.mxu0 }
 0x2a1   : > { %7564 = vst [vmem:[#allocation35_spill] sm:$0xff] %v6617_v33  ;;  %v2632_v1 = vadd.f32 %v2557_v5, %v6308_v62  ;;  %v2686_v62 = vld [vmem:[#allocation2 + $0xf3] sm:$0xff] }
 0x2a3   : > { %5063 = vmatmul.msk.bf16.gmra.mxu1 %vm1694_vm14, %v6330_v37  ;;  %v2880_v3 = vadd.f32 %v2805_v53, %v2632_v1  ;;  %5187 = vmatmul.msk.bf16.gmra.mxu0 %vm7565_vm13, %v5272_v27  ;;  %v2708_v37 = vpack.c.bf16 %v2687_v21, %v2686_v62  ;;  %v5273_v27 = vld [vmem:[%s5415_s17 + $0x38] sm:$0xff]  ;;  %v2689_v21 = vld [vmem:[#allocation2 + $0x10b] sm:$0xff]  ;;  %vm7612_vm13 = vmmov %vm7553_vm0 }
 0x2a4   : > { %5101 = vmatmul.msk.bf16.gmra.mxu3 %vm1694_vm14, %v6428_v52 }
 0x2a7   : > { %v2807_v55 = vpop.f32.mrf.mxu2  ;;  %v3053_v42 = vpop.f32.mrf.mxu3 }
 0x2a8   : > { %v6626_v6 = vadd.f32 %v3053_v42, %v2880_v3  ;;  %v2559_v51 = vpop.f32.mrf.mxu1  ;;  %v6628_v61 = vpop.f32.mrf.mxu0 }
 0x2a9   : > { %7566 = vst [vmem:[#allocation36_spill] sm:$0xff] %v6628_v61  ;;  %v2633_v54 = vadd.f32 %v2559_v51, %v6321_v24 }
 0x2ab   : > { %v2881_v46 = vadd.f32 %v2807_v55, %v2633_v54  ;;  %v2688_v55 = vld [vmem:[#allocation2 + $0x103] sm:$0xff] }
 0x2ac   : > { %5083 = vmatmul.msk.bf16.gmra.mxu2 %vm1694_vm14, %v2708_v37 }
 0x2af   : > { %v2810_v47 = vpop.f32.mrf.mxu2  ;;  %v3055_v53 = vpop.f32.mrf.mxu3 }
 0x2b0   : > { %v6632_v34 = vadd.f32 %v3055_v53, %v2881_v46  ;;  %v2562_v52 = vpop.f32.mrf.mxu1  ;;  %v6634_v5 = vpop.f32.mrf.mxu0 }
 0x2b1   : > { %7567 = vst [vmem:[#allocation37_spill] sm:$0xff] %v6634_v5  ;;  %v2634_v1 = vadd.f32 %v2562_v52, %v6339_v44 }
 0x2b3   : > { %5064 = vmatmul.msk.bf16.gmra.mxu1 %vm1694_vm14, %v6351_v57  ;;  %v2882_v3 = vadd.f32 %v2810_v47, %v2634_v1  ;;  %5188 = vmatmul.msk.bf16.gmra.mxu0 %vm7568_vm7, %v5273_v27  ;;  %v2709_v57 = vpack.c.bf16 %v2689_v21, %v2688_v55  ;;  %v2690_v27 = vld [vmem:[#allocation2 + $0x113] sm:$0xff]  ;;  %vm7615_vm7 = vmmov %vm7553_vm0 }
 0x2b4   : > { %5102 = vmatmul.msk.bf16.gmra.mxu3 %vm1694_vm14, %v6443_v0 }
 0x2b7   : > { %v2812_v24 = vpop.f32.mrf.mxu2  ;;  %v3058_v42 = vpop.f32.mrf.mxu3 }
 0x2b8   : > { %v6643_v51 = vadd.f32 %v3058_v42, %v2882_v3  ;;  %v2564_v62 = vpop.f32.mrf.mxu1  ;;  %v6645_v54 = vpop.f32.mrf.mxu0  ;;  %v5274_v3 = vld [vmem:[%s5415_s17 + $0x40] sm:$0xff] }
 0x2b9   : > { %7569 = vst [vmem:[#allocation38_spill] sm:$0xff] %v6645_v54  ;;  %v2635_v44 = vadd.f32 %v2564_v62, %v6346_v49  ;;  %v3657_v54 = vld [vmem:[#allocation2 + $0x5e] sm:$0xff] }
 0x2bb   : > { %v6649_v37 = vadd.f32 %v2812_v24, %v2635_v44  ;;  %v2691_v24 = vld [vmem:[#allocation2 + $0x11b] sm:$0xff] }
 0x2bc   : > { %5084 = vmatmul.msk.bf16.gmra.mxu2 %vm1694_vm14, %v2709_v57  ;;  %v2710_v44 = vpack.c.bf16 %v2691_v24, %v2690_v27 }
 0x2bf   : > { %v2815_v46 = vpop.f32.mrf.mxu2  ;;  %v6651_v47 = vpop.f32.mrf.mxu3 }
 0x2c0   : > { %v2567_v0 = vpop.f32.mrf.mxu1  ;;  %v4282_v53 = vpop.f32.mrf.mxu0 }
 0x2c1   : > { %v2636_v52 = vadd.f32 %v2567_v0, %v6360_v23 }
 0x2c3   : > { %5065 = vmatmul.msk.bf16.gmra.mxu1 %vm1694_vm14, %v6375_v43  ;;  %v2884_v1 = vadd.f32 %v2815_v46, %v2636_v52  ;;  %5189 = vmatmul.msk.bf16.gmra.mxu0 %vm7570_vm8, %v5274_v3  ;;  %v5275_v52 = vld [vmem:[%s5415_s17 + $0x48] sm:$0xff] }
 0x2c4   : > { %5103 = vmatmul.msk.bf16.gmra.mxu3 %vm1694_vm14, %v6458_v29  ;;  %v2693_v3 = vld [vmem:[#allocation2 + $0x12b] sm:$0xff] }
 0x2c7   : > { %v2817_v49 = vpop.f32.mrf.mxu2  ;;  %v3063_v55 = vpop.f32.mrf.mxu3 }
 0x2c8   : > { %v6660_v21 = vadd.f32 %v3063_v55, %v2884_v1  ;;  %v2569_v42 = vpop.f32.mrf.mxu1  ;;  %v4283_v62 = vpop.f32.mrf.mxu0  ;;  %v2692_v1 = vld [vmem:[#allocation2 + $0x123] sm:$0xff] }
 0x2c9   : > { %v2637_v23 = vadd.f32 %v2569_v42, %v6365_v12  ;;  %v2711_v55 = vpack.c.bf16 %v2693_v3, %v2692_v1  ;;  %v2444_v62 = vld [vmem:[#allocation2 + $0x122] sm:$0xff] }
 0x2cb   : > { %v6664_v43 = vadd.f32 %v2817_v49, %v2637_v23  ;;  %v2445_v23 = vld [vmem:[#allocation2 + $0x12a] sm:$0xff] }
 0x2cc   : > { %5085 = vmatmul.msk.bf16.gmra.mxu2 %vm1694_vm14, %v2710_v44 }
 0x2cf   : > { %v2820_v57 = vpop.f32.mrf.mxu2  ;;  %v6666_v46 = vpop.f32.mrf.mxu3 }
 0x2d0   : > { %v2572_v29 = vpop.f32.mrf.mxu1 }
 0x2d1   : > { %v2638_v0 = vadd.f32 %v2572_v29, %v6386_v7  ;;  %v2463_v29 = vpack.c.bf16 %v2445_v23, %v2444_v62  ;;  %v3402_v23 = vld [vmem:[#allocation2 + $0x25] sm:$0xff] }
 0x2d3   : > { %5066 = vmatmul.msk.bf16.gmra.mxu1 %vm1694_vm14, %v6397_v25  ;;  %v2886_v53 = vadd.f32 %v2820_v57, %v2638_v0  ;;  %5190 = vmatmul.msk.bf16.gmra.mxu0 %vm7571_vm2, %v5275_v52  ;;  %v3651_v52 = vld [vmem:[#allocation2 + $0x2e] sm:$0xff] }
 0x2d4   : > { %5104 = vmatmul.msk.bf16.gmra.mxu3 %vm1694_vm14, %v6473_v11 }
 0x2d7   : > { %v2822_v12 = vpop.f32.mrf.mxu2  ;;  %v3068_v49 = vpop.f32.mrf.mxu3 }
 0x2d8   : > { %v6675_v27 = vadd.f32 %v3068_v49, %v2886_v53  ;;  %v2574_v24 = vpop.f32.mrf.mxu1  ;;  %v5276_v53 = vld [vmem:[%s5415_s17 + $0x50] sm:$0xff]  ;;  %v3650_v49 = vld [vmem:[#allocation2 + $0x26] sm:$0xff] }
 0x2d9   : > { %v2639_v7 = vadd.f32 %v2574_v24, %v6391_v30  ;;  %v3686_v24 = vpack.c.bf16 %v3651_v52, %v3650_v49 }
 0x2db   : > { %v6679_v25 = vadd.f32 %v2822_v12, %v2639_v7 }
 0x2dc   : > { %5086 = vmatmul.msk.bf16.gmra.mxu2 %vm1694_vm14, %v2711_v55 }
 0x2df   : > { %v2825_v42 = vpop.f32.mrf.mxu2  ;;  %v6681_v44 = vpop.f32.mrf.mxu3 }
 0x2e0   : > { %v2577_v11 = vpop.f32.mrf.mxu1 }
 0x2e1   : > { %v2640_v57 = vadd.f32 %v2577_v11, %v6404_v10 }
 0x2e3   : > { %5067 = vmatmul.msk.bf16.gmra.mxu1 %vm1694_vm14, %v2463_v29  ;;  %v2888_v0 = vadd.f32 %v2825_v42, %v2640_v57  ;;  %5191 = vmatmul.msk.bf16.gmra.mxu0 %vm7572_vm10, %v5276_v53  ;;  %v3403_v42 = vld [vmem:[#allocation2 + $0x2d] sm:$0xff]  ;;  %v3653_v53 = vld [vmem:[#allocation2 + $0x3e] sm:$0xff] }
 0x2e4   : > { %5105 = vmatmul.msk.bf16.gmra.mxu3 %vm1694_vm14, %v6488_v48  ;;  %v3438_v57 = vpack.c.bf16 %v3403_v42, %v3402_v23  ;;  %v3404_v23 = vld [vmem:[#allocation2 + $0x35] sm:$0xff] }
 0x2e7   : > { %v2827_v30 = vpop.f32.mrf.mxu2  ;;  %v3073_v12 = vpop.f32.mrf.mxu3 }
 0x2e8   : > { %v6689_v1 = vadd.f32 %v3073_v12, %v2888_v0  ;;  %v2579_v3 = vpop.f32.mrf.mxu1  ;;  %v5277_v0 = vld [vmem:[%s5415_s17 + $0x58] sm:$0xff] }
 0x2e9   : > { %v2641_v10 = vadd.f32 %v2579_v3, %v6409_v8  ;;  %v3652_v3 = vld [vmem:[#allocation2 + $0x36] sm:$0xff] }
 0x2eb   : > { %v6693_v7 = vadd.f32 %v2827_v30, %v2641_v10  ;;  %v3687_v10 = vpack.c.bf16 %v3653_v53, %v3652_v3  ;;  %v3655_v53 = vld [vmem:[#allocation2 + $0x4e] sm:$0xff]  ;;  %v3654_v3 = vld [vmem:[#allocation2 + $0x46] sm:$0xff] }
 0x2ec   : > { %5145 = vmatmul.msk.bf16.vlgmr.msrb.gmra.mxu2 %vm1694_vm14, %v3686_v24 }
 0x2ef   : > { %v2830_v55 = vpop.f32.mrf.mxu2  ;;  %v6695_v62 = vpop.f32.mrf.mxu3 }
 0x2f0   : > { %v2582_v48 = vpop.f32.mrf.mxu1 }
 0x2f1   : > { %v2642_v11 = vadd.f32 %v2582_v48, %v6419_v2 }
 0x2f3   : > { %5126 = vmatmul.msk.bf16.vlgmr.msrb.gmra.mxu1 %vm1694_vm14, %v3438_v57  ;;  %v2890_v29 = vadd.f32 %v2830_v55, %v2642_v11  ;;  %5192 = vmatmul.msk.bf16.gmra.mxu0 %vm7573_vm15, %v5277_v0  ;;  %v3405_v55 = vld [vmem:[#allocation2 + $0x3d] sm:$0xff] }
 0x2f4   : > { %v3439_v57 = vpack.c.bf16 %v3405_v55, %v3404_v23  ;;  %v5278_v0 = vld [vmem:[%s5415_s17 + $0x60] sm:$0xff] }
 0x2f7   : > { %v2832_v8 = vpop.f32.mrf.mxu2  ;;  %v3078_v52 = vpop.f32.mrf.mxu3 }
 0x2f8   : > { %v6701_v30 = vadd.f32 %v3078_v52, %v2890_v29  ;;  %v2584_v12 = vpop.f32.mrf.mxu1 }
 0x2f9   : > { %v2643_v49 = vadd.f32 %v2584_v12, %v6424_v63 }
 0x2fb   : > { %v6705_v2 = vadd.f32 %v2832_v8, %v2643_v49 }
 0x2fc   : > { %5146 = vmatmul.msk.bf16.gmra.mxu2 %vm1694_vm14, %v3687_v10  ;;  %v3688_v10 = vpack.c.bf16 %v3655_v53, %v3654_v3 }
 0x2ff   : > { %v2835_v24 = vpop.f32.mrf.mxu2  ;;  %v6707_v42 = vpop.f32.mrf.mxu3 }
 0x300   : > { %v2587_v48 = vpop.f32.mrf.mxu1 }
 0x301   : > { %v2644_v11 = vadd.f32 %v2587_v48, %v6434_v56  ;;  %v3407_v48 = vld [vmem:[#allocation2 + $0x4d] sm:$0xff] }
 0x303   : > { %5127 = vmatmul.msk.bf16.gmra.mxu1 %vm1694_vm14, %v3439_v57  ;;  %v2892_v29 = vadd.f32 %v2835_v24, %v2644_v11  ;;  %5193 = vmatmul.msk.bf16.gmra.mxu0 %vm7574_vm3, %v5278_v0  ;;  %v3406_v11 = vld [vmem:[#allocation2 + $0x45] sm:$0xff] }
 0x304   : > { %v3440_v0 = vpack.c.bf16 %v3407_v48, %v3406_v11 }
 0x307   : > { %v2837_v63 = vpop.f32.mrf.mxu2  ;;  %v3083_v52 = vpop.f32.mrf.mxu3 }
 0x308   : > { %v6713_v8 = vadd.f32 %v3083_v52, %v2892_v29  ;;  %v2589_v12 = vpop.f32.mrf.mxu1 }
 0x309   : > { %v2645_v49 = vadd.f32 %v2589_v12, %v6439_v35 }
 0x30b   : > { %v6717_v56 = vadd.f32 %v2837_v63, %v2645_v49  ;;  %v3656_v63 = vld [vmem:[#allocation2 + $0x56] sm:$0xff] }
 0x30c   : > { %5147 = vmatmul.msk.bf16.gmra.mxu2 %vm1694_vm14, %v3688_v10  ;;  %v3689_v49 = vpack.c.bf16 %v3657_v54, %v3656_v63 }
 0x30f   : > { %v2840_v55 = vpop.f32.mrf.mxu2  ;;  %v6719_v24 = vpop.f32.mrf.mxu3 }
 0x310   : > { %v2592_v23 = vpop.f32.mrf.mxu1 }
 0x311   : > { %v2646_v57 = vadd.f32 %v2592_v23, %v6449_v9  ;;  %v3409_v9 = vld [vmem:[#allocation2 + $0x5d] sm:$0xff] }
 0x313   : > { %5128 = vmatmul.msk.bf16.gmra.mxu1 %vm1694_vm14, %v3440_v0  ;;  %v2894_v29 = vadd.f32 %v2840_v55, %v2646_v57  ;;  %v3408_v55 = vld [vmem:[#allocation2 + $0x55] sm:$0xff] }
 0x314   : > { %v3441_v57 = vpack.c.bf16 %v3409_v9, %v3408_v55 }
 0x317   : > { %v2842_v52 = vpop.f32.mrf.mxu2  ;;  %v3088_v35 = vpop.f32.mrf.mxu3 }
 0x318   : > { %v6723_v53 = vadd.f32 %v3088_v35, %v2894_v29  ;;  %v2594_v12 = vpop.f32.mrf.mxu1  ;;  %v3659_v35 = vld [vmem:[#allocation2 + $0x6e] sm:$0xff] }
 0x319   : > { %v2647_v3 = vadd.f32 %v2594_v12, %v6454_v20 }
 0x31b   : > { %v6727_v10 = vadd.f32 %v2842_v52, %v2647_v3  ;;  %v3658_v52 = vld [vmem:[#allocation2 + $0x66] sm:$0xff] }
 0x31c   : > { %5148 = vmatmul.msk.bf16.gmra.mxu2 %vm1694_vm14, %v3689_v49  ;;  %v3690_v3 = vpack.c.bf16 %v3659_v35, %v3658_v52  ;;  %v7575_v52 = vld [vmem:[#allocation20_spill] sm:$0xff] }
 0x31f   : > { %v2845_v5 = vpop.f32.mrf.mxu2  ;;  %v6729_v48 = vpop.f32.mrf.mxu3 }
 0x320   : > { %v2597_v23 = vpop.f32.mrf.mxu1 }
 0x321   : > { %v2648_v11 = vadd.f32 %v2597_v23, %v6464_v58  ;;  %v3411_v58 = vld [vmem:[#allocation2 + $0x6d] sm:$0xff] }
 0x323   : > { %5129 = vmatmul.msk.bf16.gmra.mxu1 %vm1694_vm14, %v3441_v57  ;;  %v2896_v0 = vadd.f32 %v2845_v5, %v2648_v11  ;;  %v3410_v5 = vld [vmem:[#allocation2 + $0x65] sm:$0xff] }
 0x324   : > { %v3442_v11 = vpack.c.bf16 %v3411_v58, %v3410_v5  ;;  %v7577_v5 = vld [vmem:[#allocation22_spill] sm:$0xff] }
 0x327   : > { %v2847_v29 = vpop.f32.mrf.mxu2  ;;  %v3093_v20 = vpop.f32.mrf.mxu3 }
 0x328   : > { %v6733_v54 = vadd.f32 %v3093_v20, %v2896_v0  ;;  %v2599_v12 = vpop.f32.mrf.mxu1  ;;  %v3661_v20 = vld [vmem:[#allocation2 + $0x7e] sm:$0xff] }
 0x329   : > { %v2649_v63 = vadd.f32 %v2599_v12, %v6469_v26 }
 0x32b   : > { %v6737_v49 = vadd.f32 %v2847_v29, %v2649_v63  ;;  %v3660_v29 = vld [vmem:[#allocation2 + $0x76] sm:$0xff] }
 0x32c   : > { %5149 = vmatmul.msk.bf16.gmra.mxu2 %vm1694_vm14, %v3690_v3  ;;  %v3691_v3 = vpack.c.bf16 %v3661_v20, %v3660_v29 }
 0x32f   : > { %v2850_v61 = vpop.f32.mrf.mxu2  ;;  %v6739_v9 = vpop.f32.mrf.mxu3 }
 0x330   : > { %v2602_v23 = vpop.f32.mrf.mxu1 }
 0x331   : > { %v2650_v55 = vadd.f32 %v2602_v23, %v6479_v17  ;;  %v3413_v17 = vld [vmem:[#allocation2 + $0x7d] sm:$0xff] }
 0x333   : > { %5130 = vmatmul.msk.bf16.gmra.mxu1 %vm1694_vm14, %v3442_v11  ;;  %v2898_v57 = vadd.f32 %v2850_v61, %v2650_v55  ;;  %v3412_v61 = vld [vmem:[#allocation2 + $0x75] sm:$0xff] }
 0x334   : > { %v3443_v11 = vpack.c.bf16 %v3413_v17, %v3412_v61 }
 0x337   : > { %v2852_v0 = vpop.f32.mrf.mxu2  ;;  %v3098_v26 = vpop.f32.mrf.mxu3 }
 0x338   : > { %v6743_v35 = vadd.f32 %v3098_v26, %v2898_v57  ;;  %v2604_v12 = vpop.f32.mrf.mxu1 }
 0x339   : > { %v2651_v63 = vadd.f32 %v2604_v12, %v7575_v52 }
 0x33b   : > { %v6747_v33 = vadd.f32 %v2852_v0, %v2651_v63  ;;  %v3662_v0 = vld [vmem:[#allocation2 + $0x86] sm:$0xff] }
 0x33c   : > { %5150 = vmatmul.msk.bf16.gmra.mxu2 %vm1694_vm14, %v3691_v3  ;;  %v3692_v63 = vpack.c.bf16 %v3663_v19, %v3662_v0 }
 0x33f   : > { %v2855_v39 = vpop.f32.mrf.mxu2  ;;  %v6749_v58 = vpop.f32.mrf.mxu3 }
 0x340   : > { %7576 = vst [vmem:[#allocation20_spill] sm:$0xff] %v6749_v58  ;;  %v2607_v23 = vpop.f32.mrf.mxu1 }
 0x341   : > { %v2652_v55 = vadd.f32 %v2607_v23, %v7577_v5  ;;  %v3415_v23 = vld [vmem:[#allocation2 + $0x8d] sm:$0xff] }
 0x343   : > { %5131 = vmatmul.msk.bf16.gmra.mxu1 %vm1694_vm14, %v3443_v11  ;;  %v2900_v57 = vadd.f32 %v2855_v39, %v2652_v55  ;;  %v3414_v39 = vld [vmem:[#allocation2 + $0x85] sm:$0xff] }
 0x344   : > { %v3444_v55 = vpack.c.bf16 %v3415_v23, %v3414_v39 }
 0x347   : > { %v2857_v26 = vpop.f32.mrf.mxu2  ;;  %v3103_v12 = vpop.f32.mrf.mxu3 }
 0x348   : > { %v6753_v20 = vadd.f32 %v3103_v12, %v2900_v57  ;;  %v2609_v29 = vpop.f32.mrf.mxu1  ;;  %v3665_v12 = vld [vmem:[#allocation2 + $0x9e] sm:$0xff] }
 0x349   : > { %v2653_v52 = vadd.f32 %v2609_v29, %v6504_v13 }
 0x34b   : > { %v6757_v3 = vadd.f32 %v2857_v26, %v2653_v52  ;;  %v3664_v26 = vld [vmem:[#allocation2 + $0x96] sm:$0xff] }
 0x34c   : > { %5151 = vmatmul.msk.bf16.gmra.mxu2 %vm1694_vm14, %v3692_v63  ;;  %v3693_v52 = vpack.c.bf16 %v3665_v12, %v3664_v26 }
 0x34f   : > { %v2860_v58 = vpop.f32.mrf.mxu2  ;;  %v6759_v17 = vpop.f32.mrf.mxu3 }
 0x350   : > { %7578 = vst [vmem:[#allocation22_spill] sm:$0xff] %v6759_v17  ;;  %v2612_v61 = vpop.f32.mrf.mxu1 }
 0x351   : > { %v2654_v5 = vadd.f32 %v2612_v61, %v6512_v50  ;;  %v3417_v50 = vld [vmem:[#allocation2 + $0x9d] sm:$0xff] }
 0x353   : > { %5132 = vmatmul.msk.bf16.gmra.mxu1 %vm1694_vm14, %v3444_v55  ;;  %v2902_v11 = vadd.f32 %v2860_v58, %v2654_v5  ;;  %v3416_v58 = vld [vmem:[#allocation2 + $0x95] sm:$0xff] }
 0x354   : > { %v3445_v5 = vpack.c.bf16 %v3417_v50, %v3416_v58  ;;  %v7583_v50 = vld [vmem:[#allocation4_spill] sm:$0xff]  ;;  %v3418_v58 = vld [vmem:[#allocation2 + $0xa5] sm:$0xff] }
 0x357   : > { %v2862_v57 = vpop.f32.mrf.mxu2  ;;  %v3108_v13 = vpop.f32.mrf.mxu3 }
 0x358   : > { %v6763_v19 = vadd.f32 %v3108_v13, %v2902_v11  ;;  %v2614_v29 = vpop.f32.mrf.mxu1  ;;  %v3667_v13 = vld [vmem:[#allocation2 + $0xae] sm:$0xff] }
 0x359   : > { %v2655_v0 = vadd.f32 %v2614_v29, %v6517_v38 }
 0x35b   : > { %v6767_v63 = vadd.f32 %v2862_v57, %v2655_v0  ;;  %v3666_v57 = vld [vmem:[#allocation2 + $0xa6] sm:$0xff] }
 0x35c   : > { %5152 = vmatmul.msk.bf16.gmra.mxu2 %vm1694_vm14, %v3693_v52  ;;  %v3694_v0 = vpack.c.bf16 %v3667_v13, %v3666_v57 }
 0x35d   : > { %7579 = vst [vmem:[#allocation39_spill] sm:$0xff] %v6767_v63 }
 0x35f   : > { %v2865_v17 = vpop.f32.mrf.mxu2  ;;  %v6769_v23 = vpop.f32.mrf.mxu3 }
 0x360   : > { %7580 = vst [vmem:[#allocation40_spill] sm:$0xff] %v6769_v23  ;;  %v2617_v61 = vpop.f32.mrf.mxu1 }
 0x361   : > { %v2656_v39 = vadd.f32 %v2617_v61, %v6530_v18  ;;  %v3419_v18 = vld [vmem:[#allocation2 + $0xad] sm:$0xff]  ;;  %v3366_v61 = vadd.f32 %v7583_v50, %v6545_v22 }
 0x363   : > { %5133 = vmatmul.msk.bf16.gmra.mxu1 %vm1694_vm14, %v3445_v5  ;;  %v2904_v55 = vadd.f32 %v2865_v17, %v2656_v39  ;;  %v3446_v5 = vpack.c.bf16 %v3419_v18, %v3418_v58 }
 0x367   : > { %v2867_v11 = vpop.f32.mrf.mxu2  ;;  %v3113_v38 = vpop.f32.mrf.mxu3 }
 0x368   : > { %v6773_v12 = vadd.f32 %v3113_v38, %v2904_v55  ;;  %v2619_v29 = vpop.f32.mrf.mxu1  ;;  %v7584_v38 = vld [vmem:[#allocation5_spill] sm:$0xff] }
 0x369   : > { %v2657_v26 = vadd.f32 %v2619_v29, %v6535_v28  ;;  %v6785_v28 = vld [vmem:[%s7437_s7] ss:$0 sm:$0xff]  ;;  %v3367_v29 = vadd.f32 %v7584_v38, %v6551_v32 }
 0x36a   : > { %7581 = vst [vmem:[#allocation41_spill] sm:$0xff] %v6773_v12  ;;  %v3421_v32 = vld [vmem:[#allocation2 + $0xbd] sm:$0xff] }
 0x36b   : > { %v6777_v52 = vadd.f32 %v2867_v11, %v2657_v26  ;;  %v3669_v11 = vld [vmem:[#allocation2 + $0xbe] sm:$0xff]  ;;  %v3668_v26 = vld [vmem:[#allocation2 + $0xb6] sm:$0xff] }
 0x36c   : > { %5153 = vmatmul.msk.bf16.gmra.mxu2 %vm1694_vm14, %v3694_v0  ;;  %v6793_v0 = vld [vmem:[%s7438_s8] ss:$0 sm:$0xff]  ;;  %v3695_v18 = vpack.c.bf16 %v3669_v11, %v3668_v26 }
 0x36d   : > { %7582 = vst [vmem:[#allocation42_spill] sm:$0xff] %v6777_v52  ;;  %v3420_v52 = vld [vmem:[#allocation2 + $0xb5] sm:$0xff] }
 0x36e   : > { %v3447_v11 = vpack.c.bf16 %v3421_v32, %v3420_v52 }
 0x36f   : > { %v3772_v23 = vpop.f32.mrf.mxu2 }
 0x370   : > { %v3524_v17 = vpop.f32.mrf.mxu1 }
 0x371   : > { %v3614_v39 = vadd.f32 %v3524_v17, %v3366_v61 }
 0x373   : > { %5134 = vmatmul.msk.bf16.gmra.mxu1 %vm1694_vm14, %v3446_v5  ;;  %v3862_v55 = vadd.f32 %v3772_v23, %v3614_v39  ;;  %v7585_v5 = vld [vmem:[#allocation6_spill] sm:$0xff] }
 0x375   : > { %v3902_v22 = vmul.f32 %v6785_v28, %v3862_v55  ;;  %v3368_v55 = vadd.f32 %v7585_v5, %v6561_v45 }
 0x377   : > { %v3774_v13 = vpop.f32.mrf.mxu2  ;;  %v3942_v61 = vadd.f32 %v6793_v0, %v3902_v22  ;;  %v3671_v22 = vld [vmem:[#allocation2 + $0xce] sm:$0xff] }
 0x378   : > { %v3526_v57 = vpop.f32.mrf.mxu1 }
 0x379   : > { %v3615_v23 = vadd.f32 %v3526_v57, %v3367_v29  ;;  %v3978_v12 = vmax.f32 %v3942_v61, 0.0 }
 0x37b   : > { %v3863_v50 = vadd.f32 %v3774_v13, %v3615_v23  ;;  %v7586_v23 = vld [vmem:[#allocation7_spill] sm:$0xff] }
 0x37c   : > { %5154 = vmatmul.msk.bf16.gmra.mxu2 %vm1694_vm14, %v3695_v18  ;;  %v3369_v18 = vadd.f32 %v7586_v23, %v6567_v60 }
 0x37d   : > { %v3903_v17 = vmul.f32 %v6785_v28, %v3863_v50 }
 0x37f   : > { %v3777_v58 = vpop.f32.mrf.mxu2  ;;  %v3943_v39 = vadd.f32 %v6793_v0, %v3903_v17  ;;  %v3670_v17 = vld [vmem:[#allocation2 + $0xc6] sm:$0xff] }
 0x380   : > { %v3529_v38 = vpop.f32.mrf.mxu1  ;;  %v3696_v61 = vpack.c.bf16 %v3671_v22, %v3670_v17  ;;  %v7588_v17 = vld [vmem:[#allocation9_spill] sm:$0xff] }
 0x381   : > { %v3979_v63 = vmax.f32 %v3943_v39, 0.0  ;;  %v3616_v29 = vadd.f32 %v3529_v38, %v3368_v55  ;;  %v7587_v55 = vld [vmem:[#allocation8_spill] sm:$0xff] }
 0x382   : > { %v3370_v60 = vadd.f32 %v7587_v55, %v6577_v15  ;;  %v3425_v55 = vld [vmem:[#allocation2 + $0xdd] sm:$0xff] }
 0x383   : > { %v4014_v13 = vpack.c.bf16 %v3979_v63, %v3978_v12  ;;  %5135 = vmatmul.msk.bf16.gmra.mxu1 %vm1694_vm14, %v3447_v11  ;;  %v3864_v57 = vadd.f32 %v3777_v58, %v3616_v29  ;;  %v3423_v58 = vld [vmem:[#allocation2 + $0xcd] sm:$0xff]  ;;  %v3422_v29 = vld [vmem:[#allocation2 + $0xc5] sm:$0xff] }
 0x384   : > { %v3448_v22 = vpack.c.bf16 %v3423_v58, %v3422_v29 }
 0x385   : > { %5163 = vmatmul.msk.bf16.vlgmr.msra.gmra.mxu3 %vm1694_vm14, %v4014_v13  ;;  %v3904_v45 = vmul.f32 %v6785_v28, %v3864_v57 }
 0x387   : > { %v3779_v26 = vpop.f32.mrf.mxu2  ;;  %v3944_v63 = vadd.f32 %v6793_v0, %v3904_v45  ;;  %v3371_v45 = vadd.f32 %v7588_v17, %v6583_v40  ;;  %v3675_v17 = vld [vmem:[#allocation2 + $0xee] sm:$0xff] }
 0x388   : > { %v3531_v50 = vpop.f32.mrf.mxu1 }
 0x389   : > { %v3617_v5 = vadd.f32 %v3531_v50, %v3369_v18  ;;  %v3980_v11 = vmax.f32 %v3944_v63, 0.0  ;;  %v3673_v50 = vld [vmem:[#allocation2 + $0xde] sm:$0xff] }
 0x38b   : > { %v3865_v39 = vadd.f32 %v3779_v26, %v3617_v5 }
 0x38c   : > { %5155 = vmatmul.msk.bf16.gmra.mxu2 %vm1694_vm14, %v3696_v61  ;;  %v3672_v61 = vld [vmem:[#allocation2 + $0xd6] sm:$0xff] }
 0x38d   : > { %v3905_v12 = vmul.f32 %v6785_v28, %v3865_v39  ;;  %v3697_v63 = vpack.c.bf16 %v3673_v50, %v3672_v61 }
 0x38f   : > { %v3782_v52 = vpop.f32.mrf.mxu2  ;;  %v3945_v32 = vadd.f32 %v6793_v0, %v3905_v12 }
 0x390   : > { %v3534_v38 = vpop.f32.mrf.mxu1 }
 0x391   : > { %v3981_v13 = vmax.f32 %v3945_v32, 0.0  ;;  %v3618_v57 = vadd.f32 %v3534_v38, %v3370_v60  ;;  %v7589_v38 = vld [vmem:[#allocation10_spill] sm:$0xff] }
 0x392   : > { %v3372_v40 = vadd.f32 %v7589_v38, %v6593_v31  ;;  %v7591_v38 = vld [vmem:[#allocation12_spill] sm:$0xff] }
 0x393   : > { %5136 = vmatmul.msk.bf16.gmra.mxu1 %vm1694_vm14, %v3448_v22  ;;  %v4015_v26 = vpack.c.bf16 %v3981_v13, %v3980_v11  ;;  %v3866_v23 = vadd.f32 %v3782_v52, %v3618_v57  ;;  %v3424_v11 = vld [vmem:[#allocation2 + $0xd5] sm:$0xff] }
 0x395   : > { %5164 = vmatmul.msk.bf16.gmra.mxu3 %vm1694_vm14, %v4015_v26  ;;  %v3906_v15 = vmul.f32 %v6785_v28, %v3866_v23  ;;  %v3449_v26 = vpack.c.bf16 %v3425_v55, %v3424_v11  ;;  %v3427_v55 = vld [vmem:[#allocation2 + $0xed] sm:$0xff] }
 0x397   : > { %v3784_v18 = vpop.f32.mrf.mxu2  ;;  %v3946_v58 = vadd.f32 %v6793_v0, %v3906_v15  ;;  %v3674_v15 = vld [vmem:[#allocation2 + $0xe6] sm:$0xff] }
 0x398   : > { %v3536_v5 = vpop.f32.mrf.mxu1 }
 0x399   : > { %v3619_v39 = vadd.f32 %v3536_v5, %v3371_v45  ;;  %v3982_v13 = vmax.f32 %v3946_v58, 0.0  ;;  %v7590_v45 = vld [vmem:[#allocation11_spill] sm:$0xff] }
 0x39a   : > { %v3373_v5 = vadd.f32 %v7590_v45, %v6599_v16  ;;  %v3374_v16 = vadd.f32 %v7591_v38, %v6609_v59  ;;  %v3428_v38 = vld [vmem:[#allocation2 + $0xf5] sm:$0xff] }
 0x39b   : > { %v3867_v12 = vadd.f32 %v3784_v18, %v3619_v39 }
 0x39c   : > { %5156 = vmatmul.msk.bf16.gmra.mxu2 %vm1694_vm14, %v3697_v63  ;;  %v3698_v63 = vpack.c.bf16 %v3675_v17, %v3674_v15  ;;  %v7592_v17 = vld [vmem:[#allocation13_spill] sm:$0xff] }
 0x39d   : > { %v3907_v52 = vmul.f32 %v6785_v28, %v3867_v12  ;;  %v3375_v45 = vadd.f32 %v7592_v17, %v6615_v4 }
 0x39f   : > { %v3787_v32 = vpop.f32.mrf.mxu2  ;;  %v3947_v60 = vadd.f32 %v6793_v0, %v3907_v52 }
 0x3a0   : > { %v3539_v29 = vpop.f32.mrf.mxu1 }
 0x3a1   : > { %v3983_v57 = vmax.f32 %v3947_v60, 0.0  ;;  %v3620_v22 = vadd.f32 %v3539_v29, %v3372_v40  ;;  %v3426_v29 = vld [vmem:[#allocation2 + $0xe5] sm:$0xff] }
 0x3a3   : > { %5137 = vmatmul.msk.bf16.gmra.mxu1 %vm1694_vm14, %v3449_v26  ;;  %v4016_v23 = vpack.c.bf16 %v3983_v57, %v3982_v13  ;;  %v3868_v18 = vadd.f32 %v3787_v32, %v3620_v22  ;;  %v3450_v22 = vpack.c.bf16 %v3427_v55, %v3426_v29  ;;  %v7593_v55 = vld [vmem:[#allocation14_spill] sm:$0xff] }
 0x3a4   : > { %v3376_v4 = vadd.f32 %v7593_v55, %v6626_v6 }
 0x3a5   : > { %5165 = vmatmul.msk.bf16.gmra.mxu3 %vm1694_vm14, %v4016_v23  ;;  %v3908_v31 = vmul.f32 %v6785_v28, %v3868_v18 }
 0x3a7   : > { %v3789_v50 = vpop.f32.mrf.mxu2  ;;  %v3948_v58 = vadd.f32 %v6793_v0, %v3908_v31 }
 0x3a8   : > { %v3541_v61 = vpop.f32.mrf.mxu1 }
 0x3a9   : > { %v3621_v39 = vadd.f32 %v3541_v61, %v3373_v5  ;;  %v3984_v11 = vmax.f32 %v3948_v58, 0.0  ;;  %v3676_v61 = vld [vmem:[#allocation2 + $0xf6] sm:$0xff] }
 0x3ab   : > { %v3869_v12 = vadd.f32 %v3789_v50, %v3621_v39  ;;  %v3677_v50 = vld [vmem:[#allocation2 + $0xfe] sm:$0xff] }
 0x3ac   : > { %5157 = vmatmul.msk.bf16.gmra.mxu2 %vm1694_vm14, %v3698_v63  ;;  %v3699_v31 = vpack.c.bf16 %v3677_v50, %v3676_v61  ;;  %v6850_v61 = vpop.f32.mrf.mxu0 }
 0x3ad   : > { %v3909_v52 = vmul.f32 %v6785_v28, %v3869_v12 }
 0x3af   : > { %v3792_v32 = vpop.f32.mrf.mxu2  ;;  %v3949_v60 = vadd.f32 %v6793_v0, %v3909_v52  ;;  %v3429_v52 = vld [vmem:[#allocation2 + $0xfd] sm:$0xff] }
 0x3b0   : > { %v3544_v40 = vpop.f32.mrf.mxu1 }
 0x3b1   : > { %v3985_v13 = vmax.f32 %v3949_v60, 0.0  ;;  %v3622_v57 = vadd.f32 %v3544_v40, %v3374_v16 }
 0x3b3   : > { %5138 = vmatmul.msk.bf16.gmra.mxu1 %vm1694_vm14, %v3450_v22  ;;  %v4017_v26 = vpack.c.bf16 %v3985_v13, %v3984_v11  ;;  %v3870_v23 = vadd.f32 %v3792_v32, %v3622_v57  ;;  %v3451_v11 = vpack.c.bf16 %v3429_v52, %v3428_v38 }
 0x3b5   : > { %5166 = vmatmul.msk.bf16.gmra.mxu3 %vm1694_vm14, %v4017_v26  ;;  %v3910_v59 = vmul.f32 %v6785_v28, %v3870_v23  ;;  %v3678_v26 = vld [vmem:[#allocation2 + $0x106] sm:$0xff]  ;;  %v3679_v23 = vld [vmem:[#allocation2 + $0x10e] sm:$0xff] }
 0x3b7   : > { %v3794_v18 = vpop.f32.mrf.mxu2  ;;  %v3950_v63 = vadd.f32 %v6793_v0, %v3910_v59 }
 0x3b8   : > { %v3546_v5 = vpop.f32.mrf.mxu1 }
 0x3b9   : > { %v3623_v15 = vadd.f32 %v3546_v5, %v3375_v45  ;;  %v3986_v16 = vmax.f32 %v3950_v63, 0.0  ;;  %v3700_v5 = vpack.c.bf16 %v3679_v23, %v3678_v26  ;;  %v3430_v63 = vld [vmem:[#allocation2 + $0x105] sm:$0xff] }
 0x3ba   : > { %v7597_v26 = vld [vmem:[#allocation17_spill] sm:$0xff] }
 0x3bb   : > { %v3871_v39 = vadd.f32 %v3794_v18, %v3623_v15  ;;  %v7594_v18 = vld [vmem:[#allocation15_spill] sm:$0xff] }
 0x3bc   : > { %5158 = vmatmul.msk.bf16.gmra.mxu2 %vm1694_vm14, %v3699_v31  ;;  %v3377_v50 = vadd.f32 %v7594_v18, %v6632_v34 }
 0x3bd   : > { %v3911_v12 = vmul.f32 %v6785_v28, %v3871_v39 }
 0x3bf   : > { %v3797_v58 = vpop.f32.mrf.mxu2  ;;  %v3951_v32 = vadd.f32 %v6793_v0, %v3911_v12  ;;  %v3431_v12 = vld [vmem:[#allocation2 + $0x10d] sm:$0xff] }
 0x3c0   : > { %v3549_v60 = vpop.f32.mrf.mxu1  ;;  %v3452_v38 = vpack.c.bf16 %v3431_v12, %v3430_v63  ;;  %v7598_v63 = vld [vmem:[#allocation18_spill] sm:$0xff] }
 0x3c1   : > { %v3987_v40 = vmax.f32 %v3951_v32, 0.0  ;;  %v3624_v29 = vadd.f32 %v3549_v60, %v3376_v4  ;;  %v3380_v12 = vadd.f32 %v7598_v63, %v6660_v21 }
 0x3c3   : > { %5139 = vmatmul.msk.bf16.gmra.mxu1 %vm1694_vm14, %v3451_v11  ;;  %v4018_v13 = vpack.c.bf16 %v3987_v40, %v3986_v16  ;;  %v3872_v57 = vadd.f32 %v3797_v58, %v3624_v29  ;;  %v7595_v58 = vld [vmem:[#allocation16_spill] sm:$0xff]  ;;  %v6858_v16 = vpop.f32.mrf.mxu0  ;;  %v5279_v40 = vld [vmem:[%s5415_s17 + $0x68] sm:$0xff]  ;;  %v3131_v29 = vadd.f32 %v6651_v47, %v6649_v37 }
 0x3c4   : > { %v3378_v52 = vadd.f32 %v7595_v58, %v6643_v51  ;;  %5194 = vmatmul.msk.bf16.gmra.mxu0 %vm7596_vm4, %v5279_v40 }
 0x3c5   : > { %5167 = vmatmul.msk.bf16.gmra.mxu3 %vm1694_vm14, %v4018_v13  ;;  %v3912_v6 = vmul.f32 %v6785_v28, %v3872_v57  ;;  %v3680_v57 = vld [vmem:[#allocation2 + $0x116] sm:$0xff]  ;;  %v3379_v23 = vadd.f32 %v7597_v26, %v3131_v29 }
 0x3c7   : > { %v3799_v22 = vpop.f32.mrf.mxu2  ;;  %v3952_v15 = vadd.f32 %v6793_v0, %v3912_v6 }
 0x3c8   : > { %v3551_v17 = vpop.f32.mrf.mxu1 }
 0x3c9   : > { %v3625_v45 = vadd.f32 %v3551_v17, %v3377_v50  ;;  %v3988_v55 = vmax.f32 %v3952_v15, 0.0  ;;  %v3432_v15 = vld [vmem:[#allocation2 + $0x115] sm:$0xff] }
 0x3cb   : > { %v3873_v59 = vadd.f32 %v3799_v22, %v3625_v45  ;;  %v3681_v22 = vld [vmem:[#allocation2 + $0x11e] sm:$0xff]  ;;  %v6868_v45 = vpop.f32.mrf.mxu0 }
 0x3cc   : > { %5159 = vmatmul.msk.bf16.gmra.mxu2 %vm1694_vm14, %v3700_v5  ;;  %v3701_v6 = vpack.c.bf16 %v3681_v22, %v3680_v57 }
 0x3cd   : > { %v3913_v31 = vmul.f32 %v6785_v28, %v3873_v59 }
 0x3cf   : > { %v3802_v39 = vpop.f32.mrf.mxu2  ;;  %v3953_v34 = vadd.f32 %v6793_v0, %v3913_v31  ;;  %v3433_v31 = vld [vmem:[#allocation2 + $0x11d] sm:$0xff] }
 0x3d0   : > { %v3554_v32 = vpop.f32.mrf.mxu1 }
 0x3d1   : > { %v3989_v4 = vmax.f32 %v3953_v34, 0.0  ;;  %v3626_v60 = vadd.f32 %v3554_v32, %v3378_v52 }
 0x3d3   : > { %5140 = vmatmul.msk.bf16.gmra.mxu1 %vm1694_vm14, %v3452_v38  ;;  %v4019_v11 = vpack.c.bf16 %v3989_v4, %v3988_v55  ;;  %v3874_v13 = vadd.f32 %v3802_v39, %v3626_v60  ;;  %v3453_v55 = vpack.c.bf16 %v3433_v31, %v3432_v15  ;;  %v6876_v4 = vpop.f32.mrf.mxu0  ;;  %v5280_v60 = vld [vmem:[%s5415_s17 + $0x70] sm:$0xff]  ;;  %v3133_v38 = vadd.f32 %v6666_v46, %v6664_v43 }
 0x3d4   : > { %5195 = vmatmul.msk.bf16.gmra.mxu0 %vm7599_vm5, %v5280_v60 }
 0x3d5   : > { %5168 = vmatmul.msk.bf16.gmra.mxu3 %vm1694_vm14, %v4019_v11  ;;  %v3914_v50 = vmul.f32 %v6785_v28, %v3874_v13  ;;  %v3682_v11 = vld [vmem:[#allocation2 + $0x126] sm:$0xff]  ;;  %v3683_v13 = vld [vmem:[#allocation2 + $0x12e] sm:$0xff] }
 0x3d7   : > { %v3804_v51 = vpop.f32.mrf.mxu2  ;;  %v3954_v47 = vadd.f32 %v6793_v0, %v3914_v50 }
 0x3d8   : > { %v3556_v18 = vpop.f32.mrf.mxu1 }
 0x3d9   : > { %v3627_v17 = vadd.f32 %v3556_v18, %v3379_v23  ;;  %v3990_v58 = vmax.f32 %v3954_v47, 0.0  ;;  %v3702_v18 = vpack.c.bf16 %v3683_v13, %v3682_v11  ;;  %v3435_v47 = vld [vmem:[#allocation2 + $0x12d] sm:$0xff] }
 0x3db   : > { %v3875_v37 = vadd.f32 %v3804_v51, %v3627_v17  ;;  %v7600_v51 = vld [vmem:[#allocation19_spill] sm:$0xff]  ;;  %v6886_v50 = vpop.f32.mrf.mxu0 }
 0x3dc   : > { %5160 = vmatmul.msk.bf16.gmra.mxu2 %vm1694_vm14, %v3701_v6  ;;  %v3381_v57 = vadd.f32 %v7600_v51, %v3133_v38  ;;  %v3684_v38 = vld [vmem:[#allocation2 + $0x136] sm:$0xff] }
 0x3dd   : > { %v3915_v5 = vmul.f32 %v6785_v28, %v3875_v37  ;;  %v3434_v37 = vld [vmem:[#allocation2 + $0x125] sm:$0xff] }
 0x3df   : > { %v3807_v59 = vpop.f32.mrf.mxu2  ;;  %v3955_v39 = vadd.f32 %v6793_v0, %v3915_v5 }
 0x3e0   : > { %v3559_v34 = vpop.f32.mrf.mxu1 }
 0x3e1   : > { %v3991_v52 = vmax.f32 %v3955_v39, 0.0  ;;  %v3628_v32 = vadd.f32 %v3559_v34, %v3380_v12  ;;  %v3454_v34 = vpack.c.bf16 %v3435_v47, %v3434_v37  ;;  %v6917_v47 = vpop.f32.mrf.mxu3 }
 0x3e3   : > { %5141 = vmatmul.msk.bf16.gmra.mxu1 %vm1694_vm14, %v3453_v55  ;;  %v4020_v40 = vpack.c.bf16 %v3991_v52, %v3990_v58  ;;  %v3876_v29 = vadd.f32 %v3807_v59, %v3628_v32  ;;  %v7601_v59 = vld [vmem:[#allocation21_spill] sm:$0xff]  ;;  %v3135_v58 = vadd.f32 %v6681_v44, %v6679_v25  ;;  %v6897_v32 = vpop.f32.mrf.mxu0  ;;  %v5281_v55 = vld [vmem:[%s5415_s17 + $0x78] sm:$0xff] }
 0x3e4   : > { %v3382_v15 = vadd.f32 %v7601_v59, %v6675_v27  ;;  %5196 = vmatmul.msk.bf16.gmra.mxu0 %vm7602_vm12, %v5281_v55  ;;  %v6924_v59 = vld [vmem:[%s7442_s12] ss:$0 sm:$0xff] }
 0x3e5   : > { %5169 = vmatmul.msk.bf16.gmra.mxu3 %vm1694_vm14, %v4020_v40  ;;  %v3916_v26 = vmul.f32 %v6785_v28, %v3876_v29  ;;  %v3685_v40 = vld [vmem:[#allocation2 + $0x13e] sm:$0xff]  ;;  %v7603_v29 = vld [vmem:[#allocation23_spill] sm:$0xff] }
 0x3e6   : > { %v3703_v44 = vpack.c.bf16 %v3685_v40, %v3684_v38  ;;  %v6947_v40 = vld [vmem:[%s7440_s10] ss:$0 sm:$0xff] }
 0x3e7   : > { %v3809_v21 = vpop.f32.mrf.mxu2  ;;  %v3956_v43 = vadd.f32 %v6793_v0, %v3916_v26 }
 0x3e8   : > { %v3561_v22 = vpop.f32.mrf.mxu1 }
 0x3e9   : > { %v3629_v23 = vadd.f32 %v3561_v22, %v3381_v57  ;;  %v3992_v39 = vmax.f32 %v3956_v43, 0.0  ;;  %v6910_v22 = vld [vmem:[%s7441_s11] ss:$0 sm:$0xff] }
 0x3ea   : > { %v3437_v43 = vld [vmem:[#allocation2 + $0x13d] sm:$0xff] }
 0x3eb   : > { %v3877_v17 = vadd.f32 %v3809_v21, %v3629_v23  ;;  %v3383_v21 = vadd.f32 %v7603_v29, %v3135_v58  ;;  %v6905_v57 = vpop.f32.mrf.mxu0 }
 0x3ec   : > { %5161 = vmatmul.msk.bf16.gmra.mxu2 %vm1694_vm14, %v3702_v18 }
 0x3ed   : > { %v3917_v46 = vmul.f32 %v6785_v28, %v3877_v17  ;;  %v3436_v17 = vld [vmem:[#allocation2 + $0x135] sm:$0xff] }
 0x3ef   : > { %v3812_v6 = vpop.f32.mrf.mxu2  ;;  %v3957_v5 = vadd.f32 %v6793_v0, %v3917_v46 }
 0x3f0   : > { %v3564_v31 = vpop.f32.mrf.mxu1 }
 0x3f1   : > { %v3993_v63 = vmax.f32 %v3957_v5, 0.0  ;;  %v3630_v12 = vadd.f32 %v3564_v31, %v3382_v15  ;;  %v4386_v5 = vmul.f32 %v6910_v22, %v6850_v61  ;;  %v4387_v15 = vmul.f32 %v6910_v22, %v6858_v16 }
 0x3f3   : > { %5142 = vmatmul.msk.bf16.gmra.mxu1 %vm1694_vm14, %v3454_v34  ;;  %v4021_v52 = vpack.c.bf16 %v3993_v63, %v3992_v39  ;;  %v3878_v60 = vadd.f32 %v3812_v6, %v3630_v12  ;;  %v7604_v6 = vld [vmem:[#allocation24_spill] sm:$0xff]  ;;  %v3455_v34 = vpack.c.bf16 %v3437_v43, %v3436_v17  ;;  %v6931_v61 = vpop.f32.mrf.mxu0  ;;  %v4427_v55 = vadd.f32 %v6924_v59, %v4386_v5 }
 0x3f4   : > { %v3384_v37 = vadd.f32 %v7604_v6, %v6689_v1  ;;  %v3137_v1 = vadd.f32 %v6695_v62, %v6693_v7  ;;  %v4428_v16 = vadd.f32 %v6924_v59, %v4387_v15  ;;  %v7605_v62 = vld [vmem:[#allocation25_spill] sm:$0xff] }
 0x3f5   : > { %5170 = vmatmul.msk.bf16.gmra.mxu3 %vm1694_vm14, %v4021_v52  ;;  %v3918_v13 = vmul.f32 %v6785_v28, %v3878_v60  ;;  %v5282_v52 = vld [vmem:[%s5415_s17 + $0x80] sm:$0xff]  ;;  %v4502_v29 = vrot.slane %v4427_v55, 3 }
 0x3f6   : > { %5197 = vmatmul.msk.bf16.gmra.mxu0 %vm7553_vm0, %v5282_v52  ;;  %v3385_v38 = vadd.f32 %v7605_v62, %v3137_v1 }
 0x3f7   : > { %v3814_v27 = vpop.f32.mrf.mxu2  ;;  %v3958_v26 = vadd.f32 %v6793_v0, %v3918_v13 }
 0x3f8   : > { %v3566_v11 = vpop.f32.mrf.mxu1 }
 0x3f9   : > { %v3631_v25 = vadd.f32 %v3566_v11, %v3383_v21  ;;  %v3994_v39 = vmax.f32 %v3958_v26, 0.0  ;;  %v4503_v21 = vrot.slane %v4428_v16, 3  ;;  %v4388_v11 = vmul.f32 %v6910_v22, %v6868_v45 }
 0x3fb   : > { %v3879_v51 = vadd.f32 %v3814_v27, %v3631_v25  ;;  %v6941_v27 = vld [vmem:[%s7439_s9] ss:$0 sm:$0xff]  ;;  %v6954_v17 = vpop.f32.mrf.mxu0  ;;  %v4429_v43 = vadd.f32 %v6924_v59, %v4388_v11  ;;  %v4504_v45 = vsel %vm4501_vm9, %v4502_v29, %v4503_v21  ;;  %v5283_v29 = vld [vmem:[%s5415_s17 + $0x88] sm:$0xff] }
 0x3fc   : > { %5162 = vmatmul.msk.bf16.gmra.mxu2 %vm1694_vm14, %v3703_v44 }
 0x3fd   : > { %v3919_v23 = vmul.f32 %v6785_v28, %v3879_v51 }
 0x3ff   : > { %v3817_v18 = vpop.f32.mrf.mxu2  ;;  %v3959_v46 = vadd.f32 %v6793_v0, %v3919_v23 }
 0x400   : > { %v3569_v31 = vpop.f32.mrf.mxu1 }
 0x401   : > { %v3995_v63 = vmax.f32 %v3959_v46, 0.0  ;;  %v3632_v12 = vadd.f32 %v3569_v31, %v3384_v37 }
 0x403   : > { %5143 = vmatmul.msk.bf16.gmra.mxu1 %vm1694_vm14, %v3455_v34  ;;  %v4022_v58 = vpack.c.bf16 %v3995_v63, %v3994_v39  ;;  %v3880_v60 = vadd.f32 %v3817_v18, %v3632_v12  ;;  %v7606_v39 = vld [vmem:[#allocation26_spill] sm:$0xff]  ;;  %v4505_v12 = vrot.slane %v4429_v43, 3  ;;  %v4389_v34 = vmul.f32 %v6910_v22, %v6876_v4 }
 0x404   : > { %v3386_v63 = vadd.f32 %v7606_v39, %v6701_v30 }
 0x405   : > { %5171 = vmatmul.msk.bf16.gmra.mxu3 %vm1694_vm14, %v4022_v58  ;;  %v3920_v13 = vmul.f32 %v6785_v28, %v3880_v60  ;;  %v4430_v11 = vadd.f32 %v6924_v59, %v4389_v34 }
 0x407   : > { %v3819_v7 = vpop.f32.mrf.mxu2  ;;  %v3960_v46 = vadd.f32 %v6793_v0, %v3920_v13 }
 0x408   : > { %v3571_v25 = vpop.f32.mrf.mxu1  ;;  %v4099_v44 = vpop.f32.mrf.mxu3 }
 0x409   : > { %v3633_v51 = vadd.f32 %v3571_v25, %v3385_v38  ;;  %v4193_v26 = vmul.f32 %v6941_v27, %v4099_v44  ;;  %v3996_v1 = vmax.f32 %v3960_v46, 0.0  ;;  %v6977_v38 = vpop.f32.mrf.mxu0  ;;  %5198 = vmatmul.msk.bf16.gmra.mxu0 %vm7607_vm11, %v5283_v29  ;;  %v4506_v25 = vsel %vm4501_vm9, %v4503_v21, %v4505_v12 }
 0x40b   : > { %v3881_v23 = vadd.f32 %v3819_v7, %v3633_v51  ;;  %v4233_v18 = vadd.f32 %v6947_v40, %v4193_v26  ;;  %v3139_v7 = vadd.f32 %v6707_v42, %v6705_v2  ;;  %v7608_v51 = vld [vmem:[#allocation27_spill] sm:$0xff] }
 0x40d   : > { %v3921_v6 = vmul.f32 %v6785_v28, %v3881_v23  ;;  %v4611_v37 = vadd.f32 %v4504_v45, %v4233_v18  ;;  %v3387_v26 = vadd.f32 %v7608_v51, %v3139_v7  ;;  %v4507_v23 = vrot.slane %v4430_v11, 3  ;;  %v5284_v51 = vld [vmem:[%s5415_s17 + $0x90] sm:$0xff] }
 0x40e   : > { %v4390_v18 = vmul.f32 %v6910_v22, %v6886_v50  ;;  %v4391_v7 = vmul.f32 %v6910_v22, %v6897_v32 }
 0x40f   : > { %v3822_v5 = vpop.f32.mrf.mxu2  ;;  %v3961_v15 = vadd.f32 %v6793_v0, %v3921_v6  ;;  %v4647_v31 = vmax.f32 %v4611_v37, 0.0  ;;  %v4508_v50 = vsel %vm4501_vm9, %v4505_v12, %v4507_v23 }
 0x410   : > { %v3574_v58 = vpop.f32.mrf.mxu1  ;;  %v4101_v52 = vpop.f32.mrf.mxu3  ;;  %v4431_v39 = vadd.f32 %v6924_v59, %v4390_v18  ;;  %v4432_v32 = vadd.f32 %v6924_v59, %v4391_v7 }
 0x411   : > { %v3997_v55 = vmax.f32 %v3961_v15, 0.0  ;;  %v4683_v16 = vpack.c.bf16 %v4647_v31, %v4647_v31  ;;  %v3634_v60 = vadd.f32 %v3574_v58, %v3386_v63  ;;  %v4194_v30 = vmul.f32 %v6941_v27, %v4101_v52  ;;  %v6992_v31 = vpop.f32.mrf.mxu0 }
 0x413   : > { %4720 = vst.msk [vmem:[%s6969_s18] sm:$0xf] %vm4719_vm6, %v4683_v16  ;;  %v4234_v4 = vadd.f32 %v6947_v40, %v4194_v30  ;;  %v4023_v62 = vpack.c.bf16 %v3997_v55, %v3996_v1  ;;  %v3882_v13 = vadd.f32 %v3822_v5, %v3634_v60  ;;  %v7609_v16 = vld [vmem:[#allocation28_spill] sm:$0xff]  ;;  %v4509_v30 = vrot.slane %v4431_v39, 3 }
 0x414   : > { %v3388_v60 = vadd.f32 %v7609_v16, %v6713_v8 }
 0x415   : > { %v4612_v44 = vadd.f32 %v4506_v25, %v4234_v4  ;;  %5172 = vmatmul.msk.bf16.gmra.mxu3 %vm1694_vm14, %v4023_v62  ;;  %v3922_v43 = vmul.f32 %v6785_v28, %v3882_v13  ;;  %v4510_v18 = vsel %vm4501_vm9, %v4507_v23, %v4509_v30 }
 0x417   : > { %v3824_v2 = vpop.f32.mrf.mxu2  ;;  %v4648_v42 = vmax.f32 %v4612_v44, 0.0  ;;  %v3962_v63 = vadd.f32 %v6793_v0, %v3922_v43  ;;  %v3141_v44 = vadd.f32 %v6719_v24, %v6717_v56 }
 0x418   : > { %v3576_v46 = vpop.f32.mrf.mxu1  ;;  %v4104_v45 = vpop.f32.mrf.mxu3 }
 0x419   : > { %v4684_v6 = vpack.c.bf16 %v4648_v42, %v4648_v42  ;;  %v3635_v37 = vadd.f32 %v3576_v46, %v3387_v26  ;;  %v4195_v5 = vmul.f32 %v6941_v27, %v4104_v45  ;;  %v3998_v4 = vmax.f32 %v3962_v63, 0.0  ;;  %v7009_v42 = vpop.f32.mrf.mxu0  ;;  %5199 = vmatmul.msk.bf16.gmra.mxu0 %vm7610_vm1, %v5284_v51  ;;  %v7611_v46 = vld [vmem:[#allocation29_spill] sm:$0xff] }
 0x41a   : > { %v3389_v45 = vadd.f32 %v7611_v46, %v3141_v44  ;;  %v3143_v51 = vadd.f32 %v6729_v48, %v6727_v10 }
 0x41b   : > { %4721 = vst.msk [vmem:[%s6969_s18 + $0x4] sm:$0xf] %vm4719_vm6, %v4684_v6  ;;  %v3883_v21 = vadd.f32 %v3824_v2, %v3635_v37  ;;  %v4235_v15 = vadd.f32 %v6947_v40, %v4195_v5  ;;  %v4511_v6 = vrot.slane %v4432_v32, 3  ;;  %v4392_v37 = vmul.f32 %v6910_v22, %v6905_v57 }
 0x41d   : > { %v3923_v34 = vmul.f32 %v6785_v28, %v3883_v21  ;;  %v4613_v1 = vadd.f32 %v4508_v50, %v4235_v15  ;;  %v4512_v57 = vsel %vm4501_vm9, %v4509_v30, %v4511_v6 }
 0x41f   : > { %v3827_v58 = vpop.f32.mrf.mxu2  ;;  %v3963_v52 = vadd.f32 %v6793_v0, %v3923_v34  ;;  %v4649_v55 = vmax.f32 %v4613_v1, 0.0 }
 0x420   : > { %v3579_v62 = vpop.f32.mrf.mxu1  ;;  %v4106_v29 = vpop.f32.mrf.mxu3 }
 0x421   : > { %v3999_v12 = vmax.f32 %v3963_v52, 0.0  ;;  %v4685_v11 = vpack.c.bf16 %v4649_v55, %v4649_v55  ;;  %v3636_v13 = vadd.f32 %v3579_v62, %v3388_v60  ;;  %v4196_v25 = vmul.f32 %v6941_v27, %v4106_v29  ;;  %v7024_v1 = vpop.f32.mrf.mxu0 }
 0x422   : > { %v3390_v62 = vadd.f32 %v6553_v41, %v6723_v53 }
 0x423   : > { %4722 = vst.msk [vmem:[%s6969_s18 + $0x8] sm:$0xf] %vm4719_vm6, %v4685_v11  ;;  %v4236_v2 = vadd.f32 %v6947_v40, %v4196_v25  ;;  %v4024_v8 = vpack.c.bf16 %v3999_v12, %v3998_v4  ;;  %v3884_v26 = vadd.f32 %v3827_v58, %v3636_v13  ;;  %v4433_v58 = vadd.f32 %v6924_v59, %v4392_v37 }
 0x424   : > { %v4393_v12 = vmul.f32 %v6910_v22, %v6931_v61  ;;  %v4394_v37 = vmul.f32 %v6910_v22, %v6954_v17 }
 0x425   : > { %v4614_v43 = vadd.f32 %v4510_v18, %v4236_v2  ;;  %5173 = vmatmul.msk.bf16.gmra.mxu3 %vm1694_vm14, %v4024_v8  ;;  %v3924_v5 = vmul.f32 %v6785_v28, %v3884_v26  ;;  %v4513_v29 = vrot.slane %v4433_v58, 3  ;;  %v5285_v26 = vld [vmem:[%s5415_s17 + $0x98] sm:$0xff] }
 0x426   : > { %v4434_v61 = vadd.f32 %v6924_v59, %v4393_v12  ;;  %v4435_v58 = vadd.f32 %v6924_v59, %v4394_v37  ;;  %v4395_v12 = vmul.f32 %v6910_v22, %v6977_v38 }
 0x427   : > { %v3829_v56 = vpop.f32.mrf.mxu2  ;;  %v4650_v24 = vmax.f32 %v4614_v43, 0.0  ;;  %v3964_v52 = vadd.f32 %v6793_v0, %v3924_v5  ;;  %v4514_v43 = vsel %vm4501_vm9, %v4511_v6, %v4513_v29 }
 0x428   : > { %v3581_v21 = vpop.f32.mrf.mxu1  ;;  %v4109_v15 = vpop.f32.mrf.mxu3  ;;  %v4436_v38 = vadd.f32 %v6924_v59, %v4395_v12 }
 0x429   : > { %v4686_v39 = vpack.c.bf16 %v4650_v24, %v4650_v24  ;;  %v3637_v63 = vadd.f32 %v3581_v21, %v3389_v45  ;;  %v4197_v50 = vmul.f32 %v6941_v27, %v4109_v15  ;;  %v4000_v11 = vmax.f32 %v3964_v52, 0.0  ;;  %v7041_v53 = vpop.f32.mrf.mxu0  ;;  %5200 = vmatmul.msk.bf16.gmra.mxu0 %vm7612_vm13, %v5285_v26  ;;  %v7613_v24 = vld [vmem:[#allocation30_spill] sm:$0xff] }
 0x42a   : > { %v3391_v46 = vadd.f32 %v7613_v24, %v3143_v51  ;;  %v4515_v45 = vrot.slane %v4434_v61, 3 }
 0x42b   : > { %4723 = vst.msk [vmem:[%s6969_s18 + $0xc] sm:$0xf] %vm4719_vm6, %v4686_v39  ;;  %v3885_v23 = vadd.f32 %v3829_v56, %v3637_v63  ;;  %v4237_v34 = vadd.f32 %v6947_v40, %v4197_v50 }
 0x42c   : > { %v4516_v17 = vsel %vm4501_vm9, %v4513_v29, %v4515_v45 }
 0x42d   : > { %v3925_v55 = vmul.f32 %v6785_v28, %v3885_v23  ;;  %v4615_v16 = vadd.f32 %v4512_v57, %v4237_v34 }
 0x42f   : > { %v3832_v60 = vpop.f32.mrf.mxu2  ;;  %v3965_v7 = vadd.f32 %v6793_v0, %v3925_v55  ;;  %v4651_v4 = vmax.f32 %v4615_v16, 0.0 }
 0x430   : > { %v3584_v13 = vpop.f32.mrf.mxu1  ;;  %v4111_v25 = vpop.f32.mrf.mxu3 }
 0x431   : > { %v4001_v30 = vmax.f32 %v3965_v7, 0.0  ;;  %v4687_v44 = vpack.c.bf16 %v4651_v4, %v4651_v4  ;;  %v3638_v2 = vadd.f32 %v3584_v13, %v3390_v62  ;;  %v4198_v8 = vmul.f32 %v6941_v27, %v4111_v25  ;;  %v7056_v34 = vpop.f32.mrf.mxu0 }
 0x432   : > { %v3392_v4 = vadd.f32 %v6569_v14, %v6733_v54  ;;  %v4517_v62 = vrot.slane %v4435_v58, 3 }
 0x433   : > { %4724 = vst.msk [vmem:[%s6969_s18 + $0x10] sm:$0xf] %vm4719_vm6, %v4687_v44  ;;  %v4238_v32 = vadd.f32 %v6947_v40, %v4198_v8  ;;  %v4025_v41 = vpack.c.bf16 %v4001_v30, %v4000_v11  ;;  %v3886_v18 = vadd.f32 %v3832_v60, %v3638_v2  ;;  %v3145_v8 = vadd.f32 %v6739_v9, %v6737_v49 }
 0x434   : > { %v4518_v26 = vsel %vm4501_vm9, %v4515_v45, %v4517_v62 }
 0x435   : > { %v4616_v56 = vadd.f32 %v4514_v43, %v4238_v32  ;;  %5174 = vmatmul.msk.bf16.gmra.mxu3 %vm1694_vm14, %v4025_v41  ;;  %v3926_v5 = vmul.f32 %v6785_v28, %v3886_v18  ;;  %v7614_v32 = vld [vmem:[#allocation3_spill] sm:$0xff] }
 0x436   : > { %v7616_v18 = vld [vmem:[#allocation31_spill] sm:$0xff] }
 0x437   : > { %v3834_v10 = vpop.f32.mrf.mxu2  ;;  %v4652_v48 = vmax.f32 %v4616_v56, 0.0  ;;  %v3966_v52 = vadd.f32 %v6793_v0, %v3926_v5  ;;  %v3393_v43 = vadd.f32 %v7616_v18, %v3145_v8  ;;  %v4519_v56 = vrot.slane %v4436_v38, 3 }
 0x438   : > { %v3586_v21 = vpop.f32.mrf.mxu1  ;;  %v4114_v15 = vpop.f32.mrf.mxu3 }
 0x439   : > { %v4688_v39 = vpack.c.bf16 %v4652_v48, %v4652_v48  ;;  %v3639_v63 = vadd.f32 %v3586_v21, %v3391_v46  ;;  %v4199_v50 = vmul.f32 %v6941_v27, %v4114_v15  ;;  %v4002_v11 = vmax.f32 %v3966_v52, 0.0  ;;  %v7073_v54 = vpop.f32.mrf.mxu0  ;;  %5201 = vmatmul.msk.bf16.gmra.mxu0 %vm7615_vm7, %v7614_v32  ;;  %v7618_v32 = vld [vmem:[#allocation32_spill] sm:$0xff] }
 0x43b   : > { %4725 = vst.msk [vmem:[%s6969_s18 + $0x14] sm:$0xf] %vm4719_vm6, %v4688_v39  ;;  %v3887_v6 = vadd.f32 %v3834_v10, %v3639_v63  ;;  %v4239_v23 = vadd.f32 %v6947_v40, %v4199_v50  ;;  %v4396_v10 = vmul.f32 %v6910_v22, %v6992_v31  ;;  %v4520_v31 = vsel %vm4501_vm9, %v4517_v62, %v4519_v56 }
 0x43d   : > { %v3927_v57 = vmul.f32 %v6785_v28, %v3887_v6  ;;  %v4617_v55 = vadd.f32 %v4516_v17, %v4239_v23  ;;  %v4437_v63 = vadd.f32 %v6924_v59, %v4396_v10 }
 0x43f   : > { %v3837_v16 = vpop.f32.mrf.mxu2  ;;  %v3967_v60 = vadd.f32 %v6793_v0, %v3927_v57  ;;  %v4653_v7 = vmax.f32 %v4617_v55, 0.0  ;;  %v3394_v57 = vadd.f32 %v6585_v36, %v6743_v35  ;;  %v4521_v55 = vrot.slane %v4437_v63, 3  ;;  %v7619_v63 = vld [vmem:[#allocation33_spill] sm:$0xff] }
 0x440   : > { %v3589_v13 = vpop.f32.mrf.mxu1  ;;  %v4116_v25 = vpop.f32.mrf.mxu3 }
 0x441   : > { %v4003_v30 = vmax.f32 %v3967_v60, 0.0  ;;  %v4689_v29 = vpack.c.bf16 %v4653_v7, %v4653_v7  ;;  %v3640_v44 = vadd.f32 %v3589_v13, %v3392_v4  ;;  %v4200_v2 = vmul.f32 %v6941_v27, %v4116_v25  ;;  %v7088_v39 = vpop.f32.mrf.mxu0  ;;  %v7617_v25 = vld [vmem:[#allocation20_spill] sm:$0xff] }
 0x443   : > { %4726 = vst.msk [vmem:[%s6969_s18 + $0x18] sm:$0xf] %vm4719_vm6, %v4689_v29  ;;  %v4240_v51 = vadd.f32 %v6947_v40, %v4200_v2  ;;  %v4026_v14 = vpack.c.bf16 %v4003_v30, %v4002_v11  ;;  %v3888_v41 = vadd.f32 %v3837_v16, %v3640_v44  ;;  %v4397_v16 = vmul.f32 %v6910_v22, %v7009_v42 }
 0x444   : > { %v3147_v30 = vadd.f32 %v7617_v25, %v6747_v33  ;;  %v4522_v2 = vsel %vm4501_vm9, %v4519_v56, %v4521_v55  ;;  %v7621_v25 = vld [vmem:[#allocation34_spill] sm:$0xff] }
 0x445   : > { %v4618_v61 = vadd.f32 %v4518_v26, %v4240_v51  ;;  %5175 = vmatmul.msk.bf16.gmra.mxu3 %vm1694_vm14, %v4026_v14  ;;  %v3928_v48 = vmul.f32 %v6785_v28, %v3888_v41  ;;  %v4438_v42 = vadd.f32 %v6924_v59, %v4397_v16  ;;  %v4398_v41 = vmul.f32 %v6910_v22, %v7024_v1  ;;  %v7620_v16 = vld [vmem:[#allocation22_spill] sm:$0xff] }
 0x446   : > { %v3395_v33 = vadd.f32 %v7618_v32, %v3147_v30 }
 0x447   : > { %v3839_v49 = vpop.f32.mrf.mxu2  ;;  %v4654_v9 = vmax.f32 %v4618_v61, 0.0  ;;  %v3968_v50 = vadd.f32 %v6793_v0, %v3928_v48  ;;  %v4523_v38 = vrot.slane %v4438_v42, 3 }
 0x448   : > { %v3591_v24 = vpop.f32.mrf.mxu1  ;;  %v4119_v46 = vpop.f32.mrf.mxu3 }
 0x449   : > { %v4690_v37 = vpack.c.bf16 %v4654_v9, %v4654_v9  ;;  %v3641_v5 = vadd.f32 %v3591_v24, %v3393_v43  ;;  %v4201_v21 = vmul.f32 %v6941_v27, %v4119_v46  ;;  %v4004_v60 = vmax.f32 %v3968_v50, 0.0  ;;  %v7105_v35 = vpop.f32.mrf.mxu0 }
 0x44a   : > { %v4439_v24 = vadd.f32 %v6924_v59, %v4398_v41  ;;  %v4524_v1 = vsel %vm4501_vm9, %v4521_v55, %v4523_v38  ;;  %v3396_v50 = vadd.f32 %v7619_v63, %v6753_v20  ;;  %v7159_v41 = vld [vmem:[%s7438_s8] ss:$0 sm:$0xff] }
 0x44b   : > { %4727 = vst.msk [vmem:[%s6969_s18 + $0x1c] sm:$0xf] %vm4719_vm6, %v4690_v37  ;;  %v3889_v45 = vadd.f32 %v3839_v49, %v3641_v5  ;;  %v4241_v15 = vadd.f32 %v6947_v40, %v4201_v21 }
 0x44d   : > { %v3929_v6 = vmul.f32 %v6785_v28, %v3889_v45  ;;  %v4619_v23 = vadd.f32 %v4520_v31, %v4241_v15  ;;  %v4525_v31 = vrot.slane %v4439_v24, 3 }
 0x44f   : > { %v3842_v58 = vpop.f32.mrf.mxu2  ;;  %v3969_v52 = vadd.f32 %v6793_v0, %v3929_v6  ;;  %v4655_v17 = vmax.f32 %v4619_v23, 0.0  ;;  %v4399_v6 = vmul.f32 %v6910_v22, %v7041_v53 }
 0x450   : > { %v3594_v7 = vpop.f32.mrf.mxu1  ;;  %v4121_v4 = vpop.f32.mrf.mxu3 }
 0x451   : > { %v4005_v12 = vmax.f32 %v3969_v52, 0.0  ;;  %v4691_v62 = vpack.c.bf16 %v4655_v17, %v4655_v17  ;;  %v3642_v11 = vadd.f32 %v3594_v7, %v3394_v57  ;;  %v4202_v13 = vmul.f32 %v6941_v27, %v4121_v4  ;;  %v7118_v48 = vpop.f32.mrf.mxu0 }
 0x452   : > { %v4440_v53 = vadd.f32 %v6924_v59, %v4399_v6  ;;  %v7624_v6 = vld [vmem:[#allocation40_spill] sm:$0xff] }
 0x453   : > { %4728 = vst.msk [vmem:[%s6969_s18 + $0x20] sm:$0xf] %vm4719_vm6, %v4691_v62  ;;  %v4242_v29 = vadd.f32 %v6947_v40, %v4202_v13  ;;  %v4027_v36 = vpack.c.bf16 %v4005_v12, %v4004_v60  ;;  %v3890_v44 = vadd.f32 %v3842_v58, %v3642_v11  ;;  %v3149_v60 = vadd.f32 %v7620_v16, %v6757_v3 }
 0x454   : > { %v4526_v12 = vsel %vm4501_vm9, %v4523_v38, %v4525_v31  ;;  %v4527_v30 = vrot.slane %v4440_v53, 3  ;;  %v4402_v53 = vmul.f32 %v6910_v22, %v7088_v39 }
 0x455   : > { %v4620_v8 = vadd.f32 %v4522_v2, %v4242_v29  ;;  %5176 = vmatmul.msk.bf16.gmra.mxu3 %vm1694_vm14, %v4027_v36  ;;  %v3930_v26 = vmul.f32 %v6785_v28, %v3890_v44  ;;  %v3397_v3 = vadd.f32 %v7621_v25, %v3149_v60  ;;  %v4400_v29 = vmul.f32 %v6910_v22, %v7056_v34  ;;  %v7146_v36 = vld [vmem:[%s7437_s7] ss:$0 sm:$0xff]  ;;  %v7625_v60 = vld [vmem:[#allocation36_spill] sm:$0xff] }
 0x457   : > { %v3844_v51 = vpop.f32.mrf.mxu2  ;;  %v4656_v14 = vmax.f32 %v4620_v8, 0.0  ;;  %v3970_v46 = vadd.f32 %v6793_v0, %v3930_v26  ;;  %v4441_v34 = vadd.f32 %v6924_v59, %v4400_v29 }
 0x458   : > { %v3596_v61 = vpop.f32.mrf.mxu1  ;;  %v4124_v49 = vpop.f32.mrf.mxu3 }
 0x459   : > { %v4692_v9 = vpack.c.bf16 %v4656_v14, %v4656_v14  ;;  %v3643_v18 = vadd.f32 %v3596_v61, %v3395_v33  ;;  %v4203_v43 = vmul.f32 %v6941_v27, %v4124_v49  ;;  %v4006_v23 = vmax.f32 %v3970_v46, 0.0  ;;  %v7135_v7 = vpop.f32.mrf.mxu0 }
 0x45a   : > { %v4528_v61 = vsel %vm4501_vm9, %v4525_v31, %v4527_v30  ;;  %v4529_v46 = vrot.slane %v4441_v34, 3  ;;  %v7623_v31 = vld [vmem:[#allocation39_spill] sm:$0xff]  ;;  %v7627_v34 = vld [vmem:[#allocation37_spill] sm:$0xff] }
 0x45b   : > { %4729 = vst.msk [vmem:[%s6969_s18 + $0x24] sm:$0xf] %vm4719_vm6, %v4692_v9  ;;  %v3891_v56 = vadd.f32 %v3844_v51, %v3643_v18  ;;  %v4243_v10 = vadd.f32 %v6947_v40, %v4203_v43 }
 0x45d   : > { %v3931_v37 = vmul.f32 %v6785_v28, %v3891_v56  ;;  %v4621_v5 = vadd.f32 %v4524_v1, %v4243_v10  ;;  %v7622_v10 = vld [vmem:[#allocation35_spill] sm:$0xff]  ;;  %v4401_v1 = vmul.f32 %v6910_v22, %v7073_v54 }
 0x45e   : > { %v3398_v24 = vadd.f32 %v7622_v10, %v6763_v19 }
 0x45f   : > { %v3847_v21 = vpop.f32.mrf.mxu2  ;;  %v3971_v45 = vadd.f32 %v6793_v0, %v3931_v37  ;;  %v4657_v15 = vmax.f32 %v4621_v5, 0.0  ;;  %v4442_v54 = vadd.f32 %v6924_v59, %v4401_v1  ;;  %v7628_v1 = vld [vmem:[#allocation42_spill] sm:$0xff] }
 0x460   : > { %v3599_v58 = vpop.f32.mrf.mxu1  ;;  %v4126_v52 = vpop.f32.mrf.mxu3 }
 0x461   : > { %v4007_v17 = vmax.f32 %v3971_v45, 0.0  ;;  %v4693_v57 = vpack.c.bf16 %v4657_v15, %v4657_v15  ;;  %v3644_v55 = vadd.f32 %v3599_v58, %v3396_v50  ;;  %v4204_v28 = vmul.f32 %v6941_v27, %v4126_v52  ;;  %v7153_v38 = vpop.f32.mrf.mxu0 }
 0x463   : > { %4730 = vst.msk [vmem:[%s6969_s18 + $0x28] sm:$0xf] %vm4719_vm6, %v4693_v57  ;;  %v4244_v0 = vadd.f32 %v6947_v40, %v4204_v28  ;;  %v4028_v20 = vpack.c.bf16 %v4007_v17, %v4006_v23  ;;  %v3892_v4 = vadd.f32 %v3847_v21, %v3644_v55  ;;  %v3151_v23 = vadd.f32 %v7624_v6, %v7623_v31  ;;  %v7629_v6 = vld [vmem:[#allocation38_spill] sm:$0xff] }
 0x464   : > { %v4530_v57 = vsel %vm4501_vm9, %v4527_v30, %v4529_v46 }
 0x465   : > { %v4622_v62 = vadd.f32 %v4526_v12, %v4244_v0  ;;  %5177 = vmatmul.msk.bf16.gmra.mxu3 %vm1694_vm14, %v4028_v20  ;;  %v3932_v42 = vmul.f32 %v7146_v36, %v3892_v4  ;;  %v3399_v0 = vadd.f32 %v7625_v60, %v3151_v23  ;;  %v4531_v20 = vrot.slane %v4442_v54, 3 }
 0x467   : > { %v3849_v11 = vpop.f32.mrf.mxu2  ;;  %v4658_v13 = vmax.f32 %v4622_v62, 0.0  ;;  %v3972_v26 = vadd.f32 %v7159_v41, %v3932_v42  ;;  %v4443_v42 = vadd.f32 %v6924_v59, %v4402_v53  ;;  %v4532_v39 = vsel %vm4501_vm9, %v4529_v46, %v4531_v20 }
 0x468   : > { %v3601_v44 = vpop.f32.mrf.mxu1  ;;  %v4129_v2 = vpop.f32.mrf.mxu3 }
 0x469   : > { %v4694_v8 = vpack.c.bf16 %v4658_v13, %v4658_v13  ;;  %v3645_v51 = vadd.f32 %v3601_v44, %v3397_v3  ;;  %v4205_v14 = vmul.f32 %v6941_v27, %v4129_v2  ;;  %v4008_v37 = vmax.f32 %v3972_v26, 0.0  ;;  %v7175_v52 = vpop.f32.mrf.mxu0 }
 0x46b   : > { %4731 = vst.msk [vmem:[%s6969_s18 + $0x2c] sm:$0xf] %vm4719_vm6, %v4694_v8  ;;  %v3893_v32 = vadd.f32 %v3849_v11, %v3645_v51  ;;  %v4245_v33 = vadd.f32 %v6947_v40, %v4205_v14 }
 0x46d   : > { %v3933_v49 = vmul.f32 %v7146_v36, %v3893_v32  ;;  %v4623_v9 = vadd.f32 %v4528_v61, %v4245_v33  ;;  %v7626_v33 = vld [vmem:[#allocation41_spill] sm:$0xff]  ;;  %v4533_v61 = vrot.slane %v4443_v42, 3 }
 0x46e   : > { %v3400_v26 = vadd.f32 %v7627_v34, %v7626_v33  ;;  %v4406_v34 = vmul.f32 %v6910_v22, %v7153_v38  ;;  %v4407_v38 = vmul.f32 %v6910_v22, %v7175_v52 }
 0x46f   : > { %v3852_v18 = vpop.f32.mrf.mxu2  ;;  %v3973_v43 = vadd.f32 %v7159_v41, %v3933_v49  ;;  %v4659_v56 = vmax.f32 %v4623_v9, 0.0  ;;  %v4403_v49 = vmul.f32 %v6910_v22, %v7105_v35 }
 0x470   : > { %v3604_v5 = vpop.f32.mrf.mxu1  ;;  %v4131_v21 = vpop.f32.mrf.mxu3 }
 0x471   : > { %v4009_v45 = vmax.f32 %v3973_v43, 0.0  ;;  %v4695_v15 = vpack.c.bf16 %v4659_v56, %v4659_v56  ;;  %v3646_v63 = vadd.f32 %v3604_v5, %v3398_v24  ;;  %v4206_v50 = vmul.f32 %v6941_v27, %v4131_v21  ;;  %v7188_v29 = vpop.f32.mrf.mxu0 }
 0x472   : > { %v4444_v35 = vadd.f32 %v6924_v59, %v4403_v49  ;;  %v4408_v52 = vmul.f32 %v6910_v22, %v7188_v29 }
 0x473   : > { %4732 = vst.msk [vmem:[%s6969_s18 + $0x30] sm:$0xf] %vm4719_vm6, %v4695_v15  ;;  %v4246_v58 = vadd.f32 %v6947_v40, %v4206_v50  ;;  %v4029_v19 = vpack.c.bf16 %v4009_v45, %v4008_v37  ;;  %v3894_v17 = vadd.f32 %v3852_v18, %v3646_v63  ;;  %v3153_v37 = vadd.f32 %v6917_v47, %v7628_v1 }
 0x474   : > { %v4534_v15 = vsel %vm4501_vm9, %v4531_v20, %v4533_v61  ;;  %v4535_v47 = vrot.slane %v4444_v35, 3 }
 0x475   : > { %v4624_v55 = vadd.f32 %v4530_v57, %v4246_v58  ;;  %5178 = vmatmul.msk.bf16.gmra.mxu3 %vm1694_vm14, %v4029_v19  ;;  %v3934_v4 = vmul.f32 %v7146_v36, %v3894_v17  ;;  %v3401_v23 = vadd.f32 %v7629_v6, %v3153_v37  ;;  %v4404_v58 = vmul.f32 %v6910_v22, %v7118_v48 }
 0x476   : > { %v4536_v48 = vsel %vm4501_vm9, %v4533_v61, %v4535_v47 }
 0x477   : > { %v3854_v28 = vpop.f32.mrf.mxu2  ;;  %v4660_v16 = vmax.f32 %v4624_v55, 0.0  ;;  %v3974_v44 = vadd.f32 %v7159_v41, %v3934_v4  ;;  %v4445_v53 = vadd.f32 %v6924_v59, %v4404_v58 }
 0x478   : > { %v3606_v12 = vpop.f32.mrf.mxu1  ;;  %v4134_v62 = vpop.f32.mrf.mxu3 }
 0x479   : > { %v4696_v11 = vpack.c.bf16 %v4660_v16, %v4660_v16  ;;  %v3647_v13 = vadd.f32 %v3606_v12, %v3399_v0  ;;  %v4207_v25 = vmul.f32 %v6941_v27, %v4134_v62  ;;  %v4010_v9 = vmax.f32 %v3974_v44, 0.0  ;;  %v7205_v45 = vpop.f32.mrf.mxu0 }
 0x47a   : > { %v4409_v29 = vmul.f32 %v6910_v22, %v7205_v45 }
 0x47b   : > { %4733 = vst.msk [vmem:[%s6969_s18 + $0x34] sm:$0xf] %vm4719_vm6, %v4696_v11  ;;  %v3895_v3 = vadd.f32 %v3854_v28, %v3647_v13  ;;  %v4247_v30 = vadd.f32 %v6947_v40, %v4207_v25  ;;  %v4537_v25 = vrot.slane %v4445_v53, 3 }
 0x47d   : > { %v3935_v2 = vmul.f32 %v7146_v36, %v3895_v3  ;;  %v4625_v8 = vadd.f32 %v4532_v39, %v4247_v30  ;;  %v4405_v3 = vmul.f32 %v6910_v22, %v7135_v7 }
 0x47f   : > { %v3975_v51 = vadd.f32 %v7159_v41, %v3935_v2  ;;  %v4661_v14 = vmax.f32 %v4625_v8, 0.0  ;;  %v3857_v32 = vpop.f32.mrf.mxu2 }
 0x480   : > { %v3609_v18 = vpop.f32.mrf.mxu1  ;;  %v4136_v43 = vpop.f32.mrf.mxu3 }
 0x481   : > { %v4011_v56 = vmax.f32 %v3975_v51, 0.0  ;;  %v4697_v10 = vpack.c.bf16 %v4661_v14, %v4661_v14  ;;  %v3648_v24 = vadd.f32 %v3609_v18, %v3400_v26  ;;  %v4208_v46 = vmul.f32 %v6941_v27, %v4136_v43  ;;  %v7218_v20 = vpop.f32.mrf.mxu0 }
 0x482   : > { %v4538_v14 = vsel %vm4501_vm9, %v4535_v47, %v4537_v25  ;;  %v4447_v43 = vadd.f32 %v6924_v59, %v4406_v34  ;;  %v4410_v45 = vmul.f32 %v6910_v22, %v7218_v20 }
 0x483   : > { %4734 = vst.msk [vmem:[%s6969_s18 + $0x38] sm:$0xf] %vm4719_vm6, %v4697_v10  ;;  %v4248_v5 = vadd.f32 %v6947_v40, %v4208_v46  ;;  %v4030_v21 = vpack.c.bf16 %v4011_v56, %v4010_v9  ;;  %v3896_v63 = vadd.f32 %v3857_v32, %v3648_v24 }
 0x484   : > { %v4541_v46 = vrot.slane %v4447_v43, 3 }
 0x485   : > { %v4626_v50 = vadd.f32 %v4534_v15, %v4248_v5  ;;  %5179 = vmatmul.msk.bf16.gmra.mxu3 %vm1694_vm14, %v4030_v21  ;;  %v3936_v17 = vmul.f32 %v7146_v36, %v3896_v63  ;;  %v4448_v15 = vadd.f32 %v6924_v59, %v4407_v38 }
 0x487   : > { %v4662_v31 = vmax.f32 %v4626_v50, 0.0  ;;  %v3859_v16 = vpop.f32.mrf.mxu2  ;;  %v3976_v4 = vadd.f32 %v7159_v41, %v3936_v17  ;;  %v4543_v6 = vrot.slane %v4448_v15, 3  ;;  %v4449_v17 = vadd.f32 %v6924_v59, %v4408_v52 }
 0x488   : > { %v3611_v19 = vpop.f32.mrf.mxu1  ;;  %v4139_v54 = vpop.f32.mrf.mxu3 }
 0x489   : > { %v4698_v57 = vpack.c.bf16 %v4662_v31, %v4662_v31  ;;  %v3649_v55 = vadd.f32 %v3611_v19, %v3401_v23  ;;  %v4209_v28 = vmul.f32 %v6941_v27, %v4139_v54  ;;  %v4012_v42 = vmax.f32 %v3976_v4, 0.0  ;;  %v7231_v51 = vpop.f32.mrf.mxu0 }
 0x48a   : > { %v4411_v20 = vmul.f32 %v6910_v22, %v7231_v51 }
 0x48b   : > { %4735 = vst.msk [vmem:[%s6969_s18 + $0x3c] sm:$0xf] %vm4719_vm6, %v4698_v57  ;;  %v3897_v60 = vadd.f32 %v3859_v16, %v3649_v55  ;;  %v4249_v0 = vadd.f32 %v6947_v40, %v4209_v28  ;;  %v4544_v57 = vsel %vm4501_vm9, %v4541_v46, %v4543_v6  ;;  %v4545_v16 = vrot.slane %v4449_v17, 3 }
 0x48d   : > { %v3937_v12 = vmul.f32 %v7146_v36, %v3897_v60  ;;  %v4627_v62 = vadd.f32 %v4536_v48, %v4249_v0 }
 0x48f   : > { %v3977_v11 = vadd.f32 %v7159_v41, %v3937_v12  ;;  %v4663_v13 = vmax.f32 %v4627_v62, 0.0  ;;  %v4446_v41 = vadd.f32 %v6924_v59, %v4405_v3  ;;  %v4450_v12 = vadd.f32 %v6924_v59, %v4409_v29 }
 0x490   : > { %v4141_v30 = vpop.f32.mrf.mxu3  ;;  %v4546_v62 = vsel %vm4501_vm9, %v4543_v6, %v4545_v16 }
 0x491   : > { %v4013_v44 = vmax.f32 %v3977_v11, 0.0  ;;  %v4699_v39 = vpack.c.bf16 %v4663_v13, %v4663_v13  ;;  %v4210_v2 = vmul.f32 %v6941_v27, %v4141_v30  ;;  %v4539_v33 = vrot.slane %v4446_v41, 3  ;;  %v7242_v18 = vpop.f32.mrf.mxu0 }
 0x492   : > { %v4412_v51 = vmul.f32 %v6910_v22, %v7242_v18 }
 0x493   : > { %4736 = vst.msk [vmem:[%s6969_s18 + $0x40] sm:$0xf] %vm4719_vm6, %v4699_v39  ;;  %v4250_v8 = vadd.f32 %v6947_v40, %v4210_v2  ;;  %v4031_v36 = vpack.c.bf16 %v4013_v44, %v4012_v42  ;;  %v4540_v56 = vsel %vm4501_vm9, %v4537_v25, %v4539_v33  ;;  %v4542_v63 = vsel %vm4501_vm9, %v4539_v33, %v4541_v46 }
 0x494   : > { %v4547_v25 = vrot.slane %v4450_v12, 3  ;;  %v4451_v2 = vadd.f32 %v6924_v59, %v4410_v45 }
 0x495   : > { %v4628_v32 = vadd.f32 %v4538_v14, %v4250_v8  ;;  %5180 = vmatmul.msk.bf16.gmra.mxu3 %vm1694_vm14, %v4031_v36 }
 0x496   : > { %v4548_v8 = vsel %vm4501_vm9, %v4545_v16, %v4547_v25  ;;  %v4549_v14 = vrot.slane %v4451_v2, 3 }
 0x497   : > { %v4664_v7 = vmax.f32 %v4628_v32, 0.0 }
 0x498   : > { %v4144_v26 = vpop.f32.mrf.mxu3 }
 0x499   : > { %v4700_v61 = vpack.c.bf16 %v4664_v7, %v4664_v7  ;;  %v4211_v49 = vmul.f32 %v6941_v27, %v4144_v26  ;;  %v7252_v35 = vpop.f32.mrf.mxu0 }
 0x49a   : > { %v4413_v18 = vmul.f32 %v6910_v22, %v7252_v35  ;;  %v7319_v22 = vld [vmem:[%s7441_s11] ss:$0 sm:$0xff] }
 0x49b   : > { %4737 = vst.msk [vmem:[%s6969_s18 + $0x44] sm:$0xf] %vm4719_vm6, %v4700_v61  ;;  %v4251_v9 = vadd.f32 %v6947_v40, %v4211_v49  ;;  %v4452_v61 = vadd.f32 %v6924_v59, %v4411_v20  ;;  %v4550_v49 = vsel %vm4501_vm9, %v4547_v25, %v4549_v14 }
 0x49d   : > { %v4629_v10 = vadd.f32 %v4540_v56, %v4251_v9  ;;  %v4551_v56 = vrot.slane %v4452_v61, 3 }
 0x49f   : > { %v4665_v24 = vmax.f32 %v4629_v10, 0.0 }
 0x4a0   : > { %v4146_v1 = vpop.f32.mrf.mxu3 }
 0x4a1   : > { %v4701_v37 = vpack.c.bf16 %v4665_v24, %v4665_v24  ;;  %v4212_v5 = vmul.f32 %v6941_v27, %v4146_v1  ;;  %v7262_v54 = vpop.f32.mrf.mxu0 }
 0x4a2   : > { %v4414_v35 = vmul.f32 %v7319_v22, %v7262_v54 }
 0x4a3   : > { %4738 = vst.msk [vmem:[%s6969_s18 + $0x48] sm:$0xf] %vm4719_vm6, %v4701_v37  ;;  %v4252_v21 = vadd.f32 %v6947_v40, %v4212_v5  ;;  %v4453_v37 = vadd.f32 %v6924_v59, %v4412_v51  ;;  %v4552_v5 = vsel %vm4501_vm9, %v4549_v14, %v4551_v56  ;;  %v7359_v14 = vld [vmem:[%s7440_s10] ss:$0 sm:$0xff] }
 0x4a5   : > { %v4630_v50 = vadd.f32 %v4542_v63, %v4252_v21  ;;  %v4553_v63 = vrot.slane %v4453_v37, 3 }
 0x4a7   : > { %v4666_v31 = vmax.f32 %v4630_v50, 0.0 }
 0x4a8   : > { %v4149_v23 = vpop.f32.mrf.mxu3 }
 0x4a9   : > { %v4702_v47 = vpack.c.bf16 %v4666_v31, %v4666_v31  ;;  %v4213_v58 = vmul.f32 %v6941_v27, %v4149_v23  ;;  %v7272_v4 = vpop.f32.mrf.mxu0 }
 0x4aa   : > { %v4415_v54 = vmul.f32 %v7319_v22, %v7272_v4 }
 0x4ab   : > { %4739 = vst.msk [vmem:[%s6969_s18 + $0x4c] sm:$0xf] %vm4719_vm6, %v4702_v47  ;;  %v4253_v19 = vadd.f32 %v6947_v40, %v4213_v58  ;;  %v4454_v47 = vadd.f32 %v6924_v59, %v4413_v18  ;;  %v4554_v58 = vsel %vm4501_vm9, %v4551_v56, %v4553_v63 }
 0x4ad   : > { %v4631_v55 = vadd.f32 %v4544_v57, %v4253_v19  ;;  %v4555_v57 = vrot.slane %v4454_v47, 3 }
 0x4af   : > { %v4667_v28 = vmax.f32 %v4631_v55, 0.0 }
 0x4b0   : > { %v4151_v60 = vpop.f32.mrf.mxu3 }
 0x4b1   : > { %v4703_v0 = vpack.c.bf16 %v4667_v28, %v4667_v28  ;;  %v4214_v53 = vmul.f32 %v6941_v27, %v4151_v60  ;;  %v7282_v39 = vpop.f32.mrf.mxu0 }
 0x4b3   : > { %4740 = vst.msk [vmem:[%s6969_s18 + $0x50] sm:$0xf] %vm4719_vm6, %v4703_v0  ;;  %v4254_v48 = vadd.f32 %v6947_v40, %v4214_v53  ;;  %v4455_v0 = vadd.f32 %v6924_v59, %v4414_v35  ;;  %v4556_v53 = vsel %vm4501_vm9, %v4553_v63, %v4555_v57  ;;  %v7342_v59 = vld [vmem:[%s7442_s12] ss:$0 sm:$0xff] }
 0x4b5   : > { %v4632_v11 = vadd.f32 %v4546_v62, %v4254_v48  ;;  %v4557_v62 = vrot.slane %v4455_v0, 3 }
 0x4b7   : > { %v4668_v13 = vmax.f32 %v4632_v11, 0.0  ;;  %v4558_v4 = vsel %vm4501_vm9, %v4555_v57, %v4557_v62 }
 0x4b8   : > { %v4154_v3 = vpop.f32.mrf.mxu3 }
 0x4b9   : > { %v4704_v30 = vpack.c.bf16 %v4668_v13, %v4668_v13  ;;  %v4215_v42 = vmul.f32 %v6941_v27, %v4154_v3  ;;  %v7292_v26 = vpop.f32.mrf.mxu0 }
 0x4bb   : > { %4741 = vst.msk [vmem:[%s6969_s18 + $0x54] sm:$0xf] %vm4719_vm6, %v4704_v30  ;;  %v4255_v44 = vadd.f32 %v6947_v40, %v4215_v42  ;;  %v4456_v30 = vadd.f32 %v7342_v59, %v4415_v54 }
 0x4bd   : > { %v4633_v36 = vadd.f32 %v4548_v8, %v4255_v44  ;;  %v4559_v2 = vrot.slane %v4456_v30, 3 }
 0x4bf   : > { %v4669_v41 = vmax.f32 %v4633_v36, 0.0 }
 0x4c0   : > { %v4156_v32 = vpop.f32.mrf.mxu3 }
 0x4c1   : > { %v4705_v7 = vpack.c.bf16 %v4669_v41, %v4669_v41  ;;  %v4216_v33 = vmul.f32 %v6941_v27, %v4156_v32  ;;  %v7302_v1 = vpop.f32.mrf.mxu0 }
 0x4c3   : > { %4742 = vst.msk [vmem:[%s6969_s18 + $0x58] sm:$0xf] %vm4719_vm6, %v4705_v7  ;;  %v4256_v34 = vadd.f32 %v6947_v40, %v4216_v33  ;;  %v4560_v7 = vsel %vm4501_vm9, %v4557_v62, %v4559_v2 }
 0x4c5   : > { %v4634_v9 = vadd.f32 %v4550_v49, %v4256_v34  ;;  %v4417_v49 = vmul.f32 %v7319_v22, %v7292_v26  ;;  %v4418_v26 = vmul.f32 %v7319_v22, %v7302_v1 }
 0x4c7   : > { %v4670_v43 = vmax.f32 %v4634_v9, 0.0 }
 0x4c8   : > { %v4159_v10 = vpop.f32.mrf.mxu3 }
 0x4c9   : > { %v4706_v24 = vpack.c.bf16 %v4670_v43, %v4670_v43  ;;  %v4217_v46 = vmul.f32 %v6941_v27, %v4159_v10  ;;  %v7312_v23 = vpop.f32.mrf.mxu0 }
 0x4ca   : > { %v4419_v1 = vmul.f32 %v7319_v22, %v7312_v23 }
 0x4cb   : > { %4743 = vst.msk [vmem:[%s6969_s18 + $0x5c] sm:$0xf] %vm4719_vm6, %v4706_v24  ;;  %v4257_v38 = vadd.f32 %v6947_v40, %v4217_v46  ;;  %v4458_v24 = vadd.f32 %v7342_v59, %v4417_v49 }
 0x4cd   : > { %v4635_v21 = vadd.f32 %v4552_v5, %v4257_v38  ;;  %v4563_v5 = vrot.slane %v4458_v24, 3 }
 0x4cf   : > { %v4671_v15 = vmax.f32 %v4635_v21, 0.0 }
 0x4d0   : > { %v4161_v50 = vpop.f32.mrf.mxu3 }
 0x4d1   : > { %v4707_v31 = vpack.c.bf16 %v4671_v15, %v4671_v15  ;;  %v4218_v6 = vmul.f32 %v6941_v27, %v4161_v50  ;;  %v7327_v60 = vpop.f32.mrf.mxu0 }
 0x4d2   : > { %v4420_v23 = vmul.f32 %v7319_v22, %v7327_v60 }
 0x4d3   : > { %4744 = vst.msk [vmem:[%s6969_s18 + $0x60] sm:$0xf] %vm4719_vm6, %v4707_v31  ;;  %v4258_v52 = vadd.f32 %v6947_v40, %v4218_v6  ;;  %v4459_v31 = vadd.f32 %v7342_v59, %v4418_v26 }
 0x4d5   : > { %v4636_v19 = vadd.f32 %v4554_v58, %v4258_v52  ;;  %v4565_v58 = vrot.slane %v4459_v31, 3 }
 0x4d7   : > { %v4672_v17 = vmax.f32 %v4636_v19, 0.0 }
 0x4d8   : > { %v4164_v55 = vpop.f32.mrf.mxu3 }
 0x4d9   : > { %v4708_v28 = vpack.c.bf16 %v4672_v17, %v4672_v17  ;;  %v4219_v16 = vmul.f32 %v6941_v27, %v4164_v55  ;;  %v7337_v3 = vpop.f32.mrf.mxu0 }
 0x4db   : > { %4745 = vst.msk [vmem:[%s6969_s18 + $0x64] sm:$0xf] %vm4719_vm6, %v4708_v28  ;;  %v4259_v29 = vadd.f32 %v6947_v40, %v4219_v16  ;;  %v4460_v28 = vadd.f32 %v7342_v59, %v4419_v1  ;;  %v4566_v16 = vsel %vm4501_vm9, %v4563_v5, %v4565_v58 }
 0x4dd   : > { %v4637_v48 = vadd.f32 %v4556_v53, %v4259_v29  ;;  %v4567_v53 = vrot.slane %v4460_v28, 3 }
 0x4df   : > { %v4673_v12 = vmax.f32 %v4637_v48, 0.0 }
 0x4e0   : > { %v4166_v11 = vpop.f32.mrf.mxu3 }
 0x4e1   : > { %v4709_v13 = vpack.c.bf16 %v4673_v12, %v4673_v12  ;;  %v4220_v25 = vmul.f32 %v6941_v27, %v4166_v11  ;;  %v4416_v27 = vmul.f32 %v7319_v22, %v7282_v39  ;;  %v7362_v39 = vpop.f32.mrf.mxu0  ;;  %v4461_v11 = vadd.f32 %v7342_v59, %v4420_v23 }
 0x4e3   : > { %4746 = vst.msk [vmem:[%s6969_s18 + $0x68] sm:$0xf] %vm4719_vm6, %v4709_v13  ;;  %v4260_v45 = vadd.f32 %v6947_v40, %v4220_v25  ;;  %v7351_v40 = vld [vmem:[%s7439_s9] ss:$0 sm:$0xff]  ;;  %v4457_v32 = vadd.f32 %v7342_v59, %v4416_v27  ;;  %v4568_v13 = vsel %vm4501_vm9, %v4565_v58, %v4567_v53  ;;  %v4569_v30 = vrot.slane %v4461_v11, 3 }
 0x4e5   : > { %v4638_v42 = vadd.f32 %v4558_v4, %v4260_v45  ;;  %v4561_v61 = vrot.slane %v4457_v32, 3  ;;  %v4421_v4 = vmul.f32 %v7319_v22, %v7337_v3  ;;  %v4422_v32 = vmul.f32 %v7319_v22, %v7362_v39 }
 0x4e7   : > { %v4674_v44 = vmax.f32 %v4638_v42, 0.0  ;;  %v4562_v46 = vsel %vm4501_vm9, %v4559_v2, %v4561_v61  ;;  %v4564_v6 = vsel %vm4501_vm9, %v4561_v61, %v4563_v5  ;;  %v4462_v27 = vadd.f32 %v7342_v59, %v4421_v4 }
 0x4e8   : > { %v4169_v8 = vpop.f32.mrf.mxu3  ;;  %v4463_v61 = vadd.f32 %v7342_v59, %v4422_v32 }
 0x4e9   : > { %v4710_v36 = vpack.c.bf16 %v4674_v44, %v4674_v44  ;;  %v4221_v41 = vmul.f32 %v7351_v40, %v4169_v8  ;;  %v4377_v10 = vpop.f32.mrf.mxu0  ;;  %v4570_v8 = vsel %vm4501_vm9, %v4567_v53, %v4569_v30 }
 0x4eb   : > { %4747 = vst.msk [vmem:[%s6969_s18 + $0x6c] sm:$0xf] %vm4719_vm6, %v4710_v36  ;;  %v4261_v20 = vadd.f32 %v7359_v14, %v4221_v41 }
 0x4ed   : > { %v4639_v33 = vadd.f32 %v4560_v7, %v4261_v20  ;;  %v4571_v20 = vrot.slane %v4462_v27, 3 }
 0x4ef   : > { %v4675_v34 = vmax.f32 %v4639_v33, 0.0  ;;  %v4572_v49 = vsel %vm4501_vm9, %v4569_v30, %v4571_v20 }
 0x4f0   : > { %v4171_v9 = vpop.f32.mrf.mxu3 }
 0x4f1   : > { %v4711_v43 = vpack.c.bf16 %v4675_v34, %v4675_v34  ;;  %v4222_v56 = vmul.f32 %v7351_v40, %v4171_v9  ;;  %v4379_v50 = vpop.f32.mrf.mxu0 }
 0x4f3   : > { %4748 = vst.msk [vmem:[%s6969_s18 + $0x70] sm:$0xf] %vm4719_vm6, %v4711_v43  ;;  %v4262_v51 = vadd.f32 %v7359_v14, %v4222_v56  ;;  %v4573_v56 = vrot.slane %v4463_v61, 3 }
 0x4f5   : > { %v4640_v38 = vadd.f32 %v4562_v46, %v4262_v51  ;;  %v4574_v24 = vsel %vm4501_vm9, %v4571_v20, %v4573_v56 }
 0x4f7   : > { %v4676_v37 = vmax.f32 %v4640_v38, 0.0 }
 0x4f8   : > { %v4174_v21 = vpop.f32.mrf.mxu3 }
 0x4f9   : > { %v4712_v15 = vpack.c.bf16 %v4676_v37, %v4676_v37  ;;  %v4223_v63 = vmul.f32 %v7351_v40, %v4174_v21  ;;  %v4380_v55 = vpop.f32.mrf.mxu0 }
 0x4fb   : > { %4749 = vst.msk [vmem:[%s6969_s18 + $0x74] sm:$0xf] %vm4719_vm6, %v4712_v15  ;;  %v4263_v18 = vadd.f32 %v7359_v14, %v4223_v63 }
 0x4fd   : > { %v4641_v52 = vadd.f32 %v4564_v6, %v4263_v18 }
 0x4ff   : > { %v4677_v47 = vmax.f32 %v4641_v52, 0.0 }
 0x500   : > { %v4176_v19 = vpop.f32.mrf.mxu3 }
 0x501   : > { %v4713_v17 = vpack.c.bf16 %v4677_v47, %v4677_v47  ;;  %v4224_v57 = vmul.f32 %v7351_v40, %v4176_v19 }
 0x503   : > { %4750 = vst.msk [vmem:[%s6969_s18 + $0x78] sm:$0xf] %vm4719_vm6, %v4713_v17  ;;  %v4264_v35 = vadd.f32 %v7359_v14, %v4224_v57 }
 0x505   : > { %v4642_v29 = vadd.f32 %v4566_v16, %v4264_v35 }
 0x507   : > { %v4678_v0 = vmax.f32 %v4642_v29, 0.0 }
 0x508   : > { %v4179_v48 = vpop.f32.mrf.mxu3 }
 0x509   : > { %v4714_v12 = vpack.c.bf16 %v4678_v0, %v4678_v0  ;;  %v4225_v62 = vmul.f32 %v7351_v40, %v4179_v48 }
 0x50b   : > { %4751 = vst.msk [vmem:[%s6969_s18 + $0x7c] sm:$0xf] %vm4719_vm6, %v4714_v12  ;;  %v4265_v54 = vadd.f32 %v7359_v14, %v4225_v62 }
 0x50d   : > { %v4643_v25 = vadd.f32 %v4568_v13, %v4265_v54 }
 0x50f   : > { %v4679_v45 = vmax.f32 %v4643_v25, 0.0 }
 0x510   : > { %v4181_v60 = vpop.f32.mrf.mxu3 }
 0x511   : > { %v4715_v42 = vpack.c.bf16 %v4679_v45, %v4679_v45  ;;  %v4226_v44 = vmul.f32 %v7351_v40, %v4181_v60 }
 0x513   : > { %4752 = vst.msk [vmem:[%s6969_s18 + $0x80] sm:$0xf] %vm4719_vm6, %v4715_v42  ;;  %v4266_v2 = vadd.f32 %v7359_v14, %v4226_v44 }
 0x515   : > { %v4644_v36 = vadd.f32 %v4570_v8, %v4266_v2 }
 0x517   : > { %v4680_v41 = vmax.f32 %v4644_v36, 0.0 }
 0x518   : > { %v4184_v3 = vpop.f32.mrf.mxu3 }
 0x519   : > { %v4716_v7 = vpack.c.bf16 %v4680_v41, %v4680_v41  ;;  %v4227_v33 = vmul.f32 %v7351_v40, %v4184_v3 }
 0x51b   : > { %4753 = vst.msk [vmem:[%s6969_s18 + $0x84] sm:$0xf] %vm4719_vm6, %v4716_v7  ;;  %v4267_v34 = vadd.f32 %v7359_v14, %v4227_v33 }
 0x51d   : > { %v4645_v9 = vadd.f32 %v4572_v49, %v4267_v34 }
 0x51f   : > { %v4681_v43 = vmax.f32 %v4645_v9, 0.0 }
 0x520   : > { %v4186_v51 = vpop.f32.mrf.mxu3 }
 0x521   : > { %v4717_v10 = vpack.c.bf16 %v4681_v43, %v4681_v43  ;;  %v4228_v22 = vmul.f32 %v7351_v40, %v4186_v51 }
 0x523   : > { %4754 = vst.msk [vmem:[%s6969_s18 + $0x88] sm:$0xf] %vm4719_vm6, %v4717_v10  ;;  %v4268_v39 = vadd.f32 %v7359_v14, %v4228_v22 }
 0x525   : > { %v4646_v46 = vadd.f32 %v4574_v24, %v4268_v39 }
 0x527   : > { %v4682_v38 = vmax.f32 %v4646_v46, 0.0 }
 0x529   : > { %v4718_v37 = vpack.c.bf16 %v4682_v38, %v4682_v38 }
 0x52b   : > { %4755 = vst.msk [vmem:[%s6969_s18 + $0x8c] sm:$0xf] %vm4719_vm6, %v4718_v37 }
 0x52c PF: > { %s23_s27 = sadd.s32 1, %s5314_s27   ;;  %s7630_s25 = smov %s5310_s26 }
 0x52d   : > { %p20_p5 = scmp.ge.s32.totalorder %s23_s27, 4   ;;  %s7631_s26 = smov %s7633_s28 }
 0x52f   :  { %22 = sbr.rel (!%p20_p5) target bundleno = 2 (0x2), region = 111 }

</bundles_post_ra>
